<compile_context>
chip_gen: v5e
topology: v5e:2x2
jax: 0.10.0
libtpu: 0.0.40
codegen_flags: <defaults>
</compile_context>

<pallas_src>
import numpy as np
import jax
import jax.numpy as jnp
from jax.experimental import pallas as pl
from jax.experimental.pallas import tpu as pltpu

# ----------------------------- model config ---------------------------------
VOCAB_SIZE = 50
EMBED_DIM = 32
HIDDEN = 32
NUM_LAYERS = 3
CLASS_NUM = 6
SEQ_LEN = 8
BATCH = 8            # fills all 8 sublanes / MXU push rows (perf feedback)


# ------------------------- fused Pallas kernel -------------------------------
def fused_bilstm_kernel(len_ref, x_ref,
                        w0_ref, b0_ref, w1_ref, b1_ref, w2_ref, b2_ref,
                        fcw_ref, fcb_ref,
                        out_ref,
                        seq_a, seq_b):
    T, B, _ = x_ref.shape
    H = fcw_ref.shape[0] // 2
    f32 = jnp.float32
    len_v = len_ref[...]                                   # (B, 1) float32

    def run_layer(load_x, w_ref, b_ref, out_scr):
        # Hoisted out of the unrolled time loop: weight load + bias broadcast
        # would otherwise be re-emitted per step (no CSE of broadcast_in_dim).
        w = w_ref[...]                                     # (K, 8H) bf16
        bias = jnp.broadcast_to(b_ref[...], (B, 8 * H))    # (B, 8H) f32
        h = jnp.zeros((B, 2 * H), f32)                     # [h_fwd | h_bwd]
        c = jnp.zeros((B, 2 * H), f32)                     # [c_fwd | c_bwd]
        for s in range(T):                                 # fully unrolled, static indices
            t_f, t_b = s, T - 1 - s
            # One bf16 MXU push per step for BOTH directions (input proj folded in).
            lhs = jnp.concatenate([h, load_x(t_f), load_x(t_b)], axis=-1)
            gates = (jnp.dot(lhs.astype(jnp.bfloat16), w,
                             preferred_element_type=f32) + bias)    # (B, 8H) f32
            # Gate cols: [i_f i_b | f_f f_b | o_f o_b | g_f g_b]
            # -> sigmoid over 6H lanes, tanh over 2H lanes only.
            sig = jax.nn.sigmoid(gates[:, :6 * H])
            g = jnp.tanh(gates[:, 6 * H:])                 # (B, 2H)
            i = sig[:, 0:2 * H]
            f = sig[:, 2 * H:4 * H]
            o = sig[:, 4 * H:6 * H]
            # Single fused cell update for both directions on (B, 2H).
            c_new = f * c + i * g
            h_new = o * jnp.tanh(c_new)
            # Packed-sequence semantics: suppress updates at padded positions.
            thr = jnp.concatenate([jnp.full((1, H), t_f, f32),
                                   jnp.full((1, H), t_b, f32)], axis=-1)
            valid = len_v > thr                            # (B, 2H) -> vsel
            h = jnp.where(valid, h_new, h)
            c = jnp.where(valid, c_new, c)
            if out_scr is not None:                        # per-step outputs stay in VMEM
                out_scr[t_f, :, 0:H] = h[:, 0:H]
                out_scr[t_b, :, H:2 * H] = h[:, H:2 * H]
        return h

    run_layer(lambda t: x_ref[t], w0_ref, b0_ref, seq_a)   # layer 0: input = embeddings
    run_layer(lambda t: seq_a[t], w1_ref, b1_ref, seq_b)   # layer 1
    h = run_layer(lambda t: seq_b[t], w2_ref, b2_ref, None)  # layer 2 (only finals)

    # FC head fused in (kept f32): cat(hidden[-2], hidden[-1]) @ W + b
    out_ref[...] = (jnp.dot(h, fcw_ref[...], preferred_element_type=f32)
                    + fcb_ref[...])


# --------------------------- wrapper / packing --------------------------------
# Destination gate-column block (width H) for each gate; bwd direction adds +1.
_GATE_DST = {"i": 0, "f": 2, "o": 4, "g": 6}
# Source gate-column block in the torch-style (i, f, g, o) parameter layout.
_GATE_SRC = {"i": 0, "f": 1, "g": 2, "o": 3}


def _pack_layer(p_f, p_b, in_dim, H):
    # Rows: [h_fwd (H) | h_bwd (H) | x_fwd (in_dim) | x_bwd (in_dim)]
    # Cols: [i_f | i_b | f_f | f_b | o_f | o_b | g_f | g_b]   (each width H)
    K = 2 * H + 2 * in_dim
    w = jnp.zeros((K, 8 * H), jnp.float32)
    b = jnp.zeros((1, 8 * H), jnp.float32)
    for d_off, p, h_row, x_row in ((0, p_f, 0, 2 * H),
                                   (1, p_b, H, 2 * H + in_dim)):
        for gate in ("i", "f", "g", "o"):
            src = _GATE_SRC[gate]
            dst = _GATE_DST[gate] + d_off
            w = w.at[h_row:h_row + H, dst * H:(dst + 1) * H].set(
                p["w_hh"][:, src * H:(src + 1) * H])
            w = w.at[x_row:x_row + in_dim, dst * H:(dst + 1) * H].set(
                p["w_ih"][:, src * H:(src + 1) * H])
            b = b.at[:, dst * H:(dst + 1) * H].set(
                p["b"][:, src * H:(src + 1) * H])
    # bf16 weights: MXU-native operands; accumulation stays f32, bias stays f32.
    return w.astype(jnp.bfloat16), b


def forward_pallas(params, tokens, lengths):
    T, B = tokens.shape
    H = HIDDEN
    # TODO(synk): embedding gather left to XLA; an in-kernel VMEM gather is not
    # worth it at this vocab/seq size.
    emb = jnp.take(params["embedding"], tokens, axis=0)    # (T, B, E) f32
    len_col = lengths.astype(jnp.float32)[:, None]         # (B, 1)

    packed = []
    for l in range(NUM_LAYERS):
        in_dim = EMBED_DIM if l == 0 else 2 * HIDDEN
        w, b = _pack_layer(params["lstm"][l]["fwd"], params["lstm"][l]["bwd"],
                           in_dim, H)
        packed += [w, b]

    # TODO(synk): on v7x, add a batch-tiled parallel grid axis (needs B>=16 for
    # (8,128)-clean batch tiles) to engage the second TensorCore; on v5e, split
    # the fused dot into two (H+D, 4H) per-direction dots to halve streamed K.
    vmem = pl.BlockSpec(memory_space=pltpu.MemorySpace.VMEM)
    return pl.pallas_call(
        fused_bilstm_kernel,
        out_shape=jax.ShapeDtypeStruct((B, CLASS_NUM), jnp.float32),
        in_specs=[vmem] * 10,
        out_specs=vmem,
        scratch_shapes=[pltpu.VMEM((T, B, 2 * H), jnp.float32),
                        pltpu.VMEM((T, B, 2 * H), jnp.float32)],
    )(len_col, emb, *packed, params["fc_w"], params["fc_b"])


# ------------------------------ pure-JAX reference ---------------------------
def lstm_layer_ref(x_seq, mask_seq, w_ih, w_hh, b, reverse):
    if reverse:
        x_seq = x_seq[::-1]
        mask_seq = mask_seq[::-1]
    T, B, _ = x_seq.shape
    H = w_hh.shape[0]
    h = jnp.zeros((B, H), jnp.float32)
    c = jnp.zeros((B, H), jnp.float32)
    outs = []
    for t in range(T):
        m = mask_seq[t]
        gates = x_seq[t] @ w_ih + h @ w_hh + b
        i = jax.nn.sigmoid(gates[:, 0 * H:1 * H])
        f = jax.nn.sigmoid(gates[:, 1 * H:2 * H])
        g = jnp.tanh(gates[:, 2 * H:3 * H])
        o = jax.nn.sigmoid(gates[:, 3 * H:4 * H])
        c_new = f * c + i * g
        h_new = o * jnp.tanh(c_new)
        c = m * c_new + (1.0 - m) * c
        h = m * h_new + (1.0 - m) * h
        outs.append(h)
    out = jnp.stack(outs)
    if reverse:
        out = out[::-1]
    return out


def forward_ref(params, tokens, lengths):
    T, B = tokens.shape
    H = HIDDEN
    emb = jnp.take(params["embedding"], tokens, axis=0)
    mask2d = (jnp.arange(T)[:, None] < lengths[None, :]).astype(jnp.float32)
    mask = jnp.broadcast_to(mask2d[:, :, None], (T, B, H))
    x = emb
    out_f = out_b = None
    for l in range(NUM_LAYERS):
        p_f = params["lstm"][l]["fwd"]
        p_b = params["lstm"][l]["bwd"]
        out_f = lstm_layer_ref(x, mask, p_f["w_ih"], p_f["w_hh"], p_f["b"], False)
        out_b = lstm_layer_ref(x, mask, p_b["w_ih"], p_b["w_hh"], p_b["b"], True)
        x = jnp.concatenate([out_f, out_b], axis=-1)
    feat = jnp.concatenate([out_f[-1], out_b[0]], axis=-1)
    return feat @ params["fc_w"] + params["fc_b"]


# ------------------------------ parameter init --------------------------------
def init_params(key):
    def uni(k, shape):
        return jax.random.uniform(k, shape, jnp.float32, -0.1, 0.1)

    keys = jax.random.split(key, 64)
    ki = iter(range(64))
    params = {"embedding": uni(keys[next(ki)], (VOCAB_SIZE, EMBED_DIM))}

    lstm = []
    for l in range(NUM_LAYERS):
        in_dim = EMBED_DIM if l == 0 else 2 * HIDDEN
        layer = {}
        for d in ("fwd", "bwd"):
            layer[d] = {
                "w_ih": uni(keys[next(ki)], (in_dim, 4 * HIDDEN)),
                "w_hh": uni(keys[next(ki)], (HIDDEN, 4 * HIDDEN)),
                # combined b_ih + b_hh
                "b": uni(keys[next(ki)], (1, 4 * HIDDEN)),
            }
        lstm.append(layer)
    params["lstm"] = lstm
    params["fc_w"] = uni(keys[next(ki)], (2 * HIDDEN, CLASS_NUM))
    params["fc_b"] = uni(keys[next(ki)], (1, CLASS_NUM))
    return params


# ----------------------------------- main -------------------------------------
if __name__ == "__main__":
    key = jax.random.PRNGKey(0)
    k_param, k_tok = jax.random.split(key)
    params = init_params(k_param)

    tokens = jax.random.randint(k_tok, (SEQ_LEN, BATCH), 0, VOCAB_SIZE,
                                dtype=jnp.int32)                  # (T, B)
    lengths = jnp.array([8, 5, 3, 8, 1, 6, 7, 2], dtype=jnp.int32)  # variable lengths

    fwd = jax.jit(forward_pallas)
    logits = jax.block_until_ready(fwd(params, tokens, lengths))

    logits_ref = forward_ref(params, tokens, lengths)
    # bf16 matmul operands (f32 accumulation) vs f32 reference -> loosen tol.
    np.testing.assert_allclose(np.asarray(logits), np.asarray(logits_ref),
                               rtol=2e-2, atol=2e-2)

    assert logits.shape == (BATCH, CLASS_NUM)
    print("KERNEL_OK")
</pallas_src>

<mosaic_0001>
module attributes {stable_mosaic.version = 11 : i64} {
  func.func @fused_bilstm_kernel(%arg0: memref<8x1xf32, #tpu.memory_space<vmem>>, %arg1: memref<8x8x32xf32, #tpu.memory_space<vmem>>, %arg2: memref<128x256xbf16, #tpu.memory_space<vmem>>, %arg3: memref<1x256xf32, #tpu.memory_space<vmem>>, %arg4: memref<192x256xbf16, #tpu.memory_space<vmem>>, %arg5: memref<1x256xf32, #tpu.memory_space<vmem>>, %arg6: memref<192x256xbf16, #tpu.memory_space<vmem>>, %arg7: memref<1x256xf32, #tpu.memory_space<vmem>>, %arg8: memref<64x6xf32, #tpu.memory_space<vmem>>, %arg9: memref<1x6xf32, #tpu.memory_space<vmem>>, %arg10: memref<8x6xf32, #tpu.memory_space<vmem>>, %arg11: memref<8x8x64xf32, #tpu.memory_space<vmem>>, %arg12: memref<8x8x64xf32, #tpu.memory_space<vmem>>) attributes {dimension_semantics = [], scalar_prefetch = 0 : i64, scratch_operands = 2 : i64, tpu.core_type = #tpu.core_type<tc>} {
    %c0 = arith.constant 0 : index
    %c0_0 = arith.constant 0 : index
    %0 = vector.load %arg0[%c0, %c0_0] : memref<8x1xf32, #tpu.memory_space<vmem>>, vector<8x1xf32>
    %c0_1 = arith.constant 0 : index
    %c0_2 = arith.constant 0 : index
    %1 = vector.load %arg2[%c0_1, %c0_2] : memref<128x256xbf16, #tpu.memory_space<vmem>>, vector<128x256xbf16>
    %c0_3 = arith.constant 0 : index
    %c0_4 = arith.constant 0 : index
    %2 = vector.load %arg3[%c0_3, %c0_4] : memref<1x256xf32, #tpu.memory_space<vmem>>, vector<1x256xf32>
    %3 = vector.shape_cast %2 : vector<1x256xf32> to vector<1x256xf32>
    %4 = vector.broadcast %3 : vector<1x256xf32> to vector<8x256xf32>
    %cst = arith.constant 0.000000e+00 : f32
    %5 = vector.broadcast %cst : f32 to vector<8x64xf32>
    %cst_5 = arith.constant 0.000000e+00 : f32
    %6 = vector.broadcast %cst_5 : f32 to vector<8x64xf32>
    %c0_6 = arith.constant 0 : index
    %c0_7 = arith.constant 0 : index
    %c0_8 = arith.constant 0 : index
    %7 = vector.load %arg1[%c0_6, %c0_7, %c0_8] : memref<8x8x32xf32, #tpu.memory_space<vmem>>, vector<1x8x32xf32>
    %8 = vector.shape_cast %7 : vector<1x8x32xf32> to vector<8x32xf32>
    %c7 = arith.constant 7 : index
    %c0_9 = arith.constant 0 : index
    %c0_10 = arith.constant 0 : index
    %9 = vector.load %arg1[%c7, %c0_9, %c0_10] : memref<8x8x32xf32, #tpu.memory_space<vmem>>, vector<1x8x32xf32>
    %10 = vector.shape_cast %9 : vector<1x8x32xf32> to vector<8x32xf32>
    %11 = tpu.concatenate %5, %8, %10 in 1 : vector<8x64xf32>, vector<8x32xf32>, vector<8x32xf32> -> vector<8x128xf32>
    %12 = arith.truncf %11 : vector<8x128xf32> to vector<8x128xbf16>
    %cst_11 = arith.constant dense<0.000000e+00> : vector<8x256xf32>
    %13 = tpu.matmul %12, %1, %cst_11 {dimension_numbers = #tpu.dot_dimension_numbers<[1], [0], [0], [1], [0, 0, 1, 1], [], []>} : vector<8x128xbf16>, vector<128x256xbf16>, vector<8x256xf32> -> vector<8x256xf32>
    %14 = arith.addf %13, %4 : vector<8x256xf32>
    %15 = vector.extract_strided_slice %14 {offsets = [0, 0], sizes = [8, 192], strides = [1, 1]} : vector<8x256xf32> to vector<8x192xf32>
    %16 = arith.negf %15 : vector<8x192xf32>
    %17 = math.exp %16 : vector<8x192xf32>
    %cst_12 = arith.constant 1.000000e+00 : f32
    %18 = vector.broadcast %cst_12 : f32 to vector<8x192xf32>
    %19 = arith.addf %18, %17 : vector<8x192xf32>
    %20 = arith.divf %18, %19 : vector<8x192xf32>
    %21 = vector.extract_strided_slice %14 {offsets = [0, 192], sizes = [8, 64], strides = [1, 1]} : vector<8x256xf32> to vector<8x64xf32>
    %22 = math.tanh %21 : vector<8x64xf32>
    %23 = vector.extract_strided_slice %20 {offsets = [0, 0], sizes = [8, 64], strides = [1, 1]} : vector<8x192xf32> to vector<8x64xf32>
    %24 = vector.extract_strided_slice %20 {offsets = [0, 64], sizes = [8, 64], strides = [1, 1]} : vector<8x192xf32> to vector<8x64xf32>
    %25 = vector.extract_strided_slice %20 {offsets = [0, 128], sizes = [8, 64], strides = [1, 1]} : vector<8x192xf32> to vector<8x64xf32>
    %26 = arith.mulf %24, %6 : vector<8x64xf32>
    %27 = arith.mulf %23, %22 : vector<8x64xf32>
    %28 = arith.addf %26, %27 : vector<8x64xf32>
    %29 = math.tanh %28 : vector<8x64xf32>
    %30 = arith.mulf %25, %29 : vector<8x64xf32>
    %cst_13 = arith.constant 0.000000e+00 : f32
    %31 = vector.broadcast %cst_13 : f32 to vector<1x32xf32>
    %cst_14 = arith.constant 7.000000e+00 : f32
    %32 = vector.broadcast %cst_14 : f32 to vector<1x32xf32>
    %33 = tpu.concatenate %31, %32 in 1 : vector<1x32xf32>, vector<1x32xf32> -> vector<1x64xf32>
    %34 = vector.broadcast %0 : vector<8x1xf32> to vector<8x64xf32>
    %35 = vector.broadcast %33 : vector<1x64xf32> to vector<8x64xf32>
    %36 = arith.cmpf ogt, %34, %35 : vector<8x64xf32>
    %37 = arith.select %36, %30, %5 : vector<8x64xi1>, vector<8x64xf32>
    %38 = arith.select %36, %28, %6 : vector<8x64xi1>, vector<8x64xf32>
    %39 = vector.extract_strided_slice %37 {offsets = [0, 0], sizes = [8, 32], strides = [1, 1]} : vector<8x64xf32> to vector<8x32xf32>
    %c0_15 = arith.constant 0 : index
    %c0_16 = arith.constant 0 : index
    %c0_17 = arith.constant 0 : index
    %40 = vector.load %arg11[%c0_15, %c0_16, %c0_17] : memref<8x8x64xf32, #tpu.memory_space<vmem>>, vector<1x8x32xf32>
    %41 = vector.shape_cast %40 : vector<1x8x32xf32> to vector<8x32xf32>
    %42 = vector.shape_cast %39 : vector<8x32xf32> to vector<1x8x32xf32>
    tpu.vector_store %arg11[%c0_15, %c0_16, %c0_17], %42 {strides = array<i32>} : memref<8x8x64xf32, #tpu.memory_space<vmem>>, vector<1x8x32xf32>,
    %43 = vector.extract_strided_slice %37 {offsets = [0, 32], sizes = [8, 32], strides = [1, 1]} : vector<8x64xf32> to vector<8x32xf32>
    %c7_18 = arith.constant 7 : index
    %c0_19 = arith.constant 0 : index
    %c32 = arith.constant 32 : index
    %44 = vector.load %arg11[%c7_18, %c0_19, %c32] : memref<8x8x64xf32, #tpu.memory_space<vmem>>, vector<1x8x32xf32>
    %45 = vector.shape_cast %44 : vector<1x8x32xf32> to vector<8x32xf32>
    %46 = vector.shape_cast %43 : vector<8x32xf32> to vector<1x8x32xf32>
    tpu.vector_store %arg11[%c7_18, %c0_19, %c32], %46 {strides = array<i32>} : memref<8x8x64xf32, #tpu.memory_space<vmem>>, vector<1x8x32xf32>,
    %c1 = arith.constant 1 : index
    %c0_20 = arith.constant 0 : index
    %c0_21 = arith.constant 0 : index
    %47 = vector.load %arg1[%c1, %c0_20, %c0_21] : memref<8x8x32xf32, #tpu.memory_space<vmem>>, vector<1x8x32xf32>
    %48 = vector.shape_cast %47 : vector<1x8x32xf32> to vector<8x32xf32>
    %c6 = arith.constant 6 : index
    %c0_22 = arith.constant 0 : index
    %c0_23 = arith.constant 0 : index
    %49 = vector.load %arg1[%c6, %c0_22, %c0_23] : memref<8x8x32xf32, #tpu.memory_space<vmem>>, vector<1x8x32xf32>
    %50 = vector.shape_cast %49 : vector<1x8x32xf32> to vector<8x32xf32>
    %51 = tpu.concatenate %37, %48, %50 in 1 : vector<8x64xf32>, vector<8x32xf32>, vector<8x32xf32> -> vector<8x128xf32>
    %52 = arith.truncf %51 : vector<8x128xf32> to vector<8x128xbf16>
    %cst_24 = arith.constant dense<0.000000e+00> : vector<8x256xf32>
    %53 = tpu.matmul %52, %1, %cst_24 {dimension_numbers = #tpu.dot_dimension_numbers<[1], [0], [0], [1], [0, 0, 1, 1], [], []>} : vector<8x128xbf16>, vector<128x256xbf16>, vector<8x256xf32> -> vector<8x256xf32>
    %54 = arith.addf %53, %4 : vector<8x256xf32>
    %55 = vector.extract_strided_slice %54 {offsets = [0, 0], sizes = [8, 192], strides = [1, 1]} : vector<8x256xf32> to vector<8x192xf32>
    %56 = arith.negf %55 : vector<8x192xf32>
    %57 = math.exp %56 : vector<8x192xf32>
    %cst_25 = arith.constant 1.000000e+00 : f32
    %58 = vector.broadcast %cst_25 : f32 to vector<8x192xf32>
    %59 = arith.addf %58, %57 : vector<8x192xf32>
    %60 = arith.divf %58, %59 : vector<8x192xf32>
    %61 = vector.extract_strided_slice %54 {offsets = [0, 192], sizes = [8, 64], strides = [1, 1]} : vector<8x256xf32> to vector<8x64xf32>
    %62 = math.tanh %61 : vector<8x64xf32>
    %63 = vector.extract_strided_slice %60 {offsets = [0, 0], sizes = [8, 64], strides = [1, 1]} : vector<8x192xf32> to vector<8x64xf32>
    %64 = vector.extract_strided_slice %60 {offsets = [0, 64], sizes = [8, 64], strides = [1, 1]} : vector<8x192xf32> to vector<8x64xf32>
    %65 = vector.extract_strided_slice %60 {offsets = [0, 128], sizes = [8, 64], strides = [1, 1]} : vector<8x192xf32> to vector<8x64xf32>
    %66 = arith.mulf %64, %38 : vector<8x64xf32>
    %67 = arith.mulf %63, %62 : vector<8x64xf32>
    %68 = arith.addf %66, %67 : vector<8x64xf32>
    %69 = math.tanh %68 : vector<8x64xf32>
    %70 = arith.mulf %65, %69 : vector<8x64xf32>
    %cst_26 = arith.constant 1.000000e+00 : f32
    %71 = vector.broadcast %cst_26 : f32 to vector<1x32xf32>
    %cst_27 = arith.constant 6.000000e+00 : f32
    %72 = vector.broadcast %cst_27 : f32 to vector<1x32xf32>
    %73 = tpu.concatenate %71, %72 in 1 : vector<1x32xf32>, vector<1x32xf32> -> vector<1x64xf32>
    %74 = vector.broadcast %0 : vector<8x1xf32> to vector<8x64xf32>
    %75 = vector.broadcast %73 : vector<1x64xf32> to vector<8x64xf32>
    %76 = arith.cmpf ogt, %74, %75 : vector<8x64xf32>
    %77 = arith.select %76, %70, %37 : vector<8x64xi1>, vector<8x64xf32>
    %78 = arith.select %76, %68, %38 : vector<8x64xi1>, vector<8x64xf32>
    %79 = vector.extract_strided_slice %77 {offsets = [0, 0], sizes = [8, 32], strides = [1, 1]} : vector<8x64xf32> to vector<8x32xf32>
    %c1_28 = arith.constant 1 : index
    %c0_29 = arith.constant 0 : index
    %c0_30 = arith.constant 0 : index
    %80 = vector.load %arg11[%c1_28, %c0_29, %c0_30] : memref<8x8x64xf32, #tpu.memory_space<vmem>>, vector<1x8x32xf32>
    %81 = vector.shape_cast %80 : vector<1x8x32xf32> to vector<8x32xf32>
    %82 = vector.shape_cast %79 : vector<8x32xf32> to vector<1x8x32xf32>
    tpu.vector_store %arg11[%c1_28, %c0_29, %c0_30], %82 {strides = array<i32>} : memref<8x8x64xf32, #tpu.memory_space<vmem>>, vector<1x8x32xf32>,
    %83 = vector.extract_strided_slice %77 {offsets = [0, 32], sizes = [8, 32], strides = [1, 1]} : vector<8x64xf32> to vector<8x32xf32>
    %c6_31 = arith.constant 6 : index
    %c0_32 = arith.constant 0 : index
    %c32_33 = arith.constant 32 : index
    %84 = vector.load %arg11[%c6_31, %c0_32, %c32_33] : memref<8x8x64xf32, #tpu.memory_space<vmem>>, vector<1x8x32xf32>
    %85 = vector.shape_cast %84 : vector<1x8x32xf32> to vector<8x32xf32>
    %86 = vector.shape_cast %83 : vector<8x32xf32> to vector<1x8x32xf32>
    tpu.vector_store %arg11[%c6_31, %c0_32, %c32_33], %86 {strides = array<i32>} : memref<8x8x64xf32, #tpu.memory_space<vmem>>, vector<1x8x32xf32>,
    %c2 = arith.constant 2 : index
    %c0_34 = arith.constant 0 : index
    %c0_35 = arith.constant 0 : index
    %87 = vector.load %arg1[%c2, %c0_34, %c0_35] : memref<8x8x32xf32, #tpu.memory_space<vmem>>, vector<1x8x32xf32>
    %88 = vector.shape_cast %87 : vector<1x8x32xf32> to vector<8x32xf32>
    %c5 = arith.constant 5 : index
    %c0_36 = arith.constant 0 : index
    %c0_37 = arith.constant 0 : index
    %89 = vector.load %arg1[%c5, %c0_36, %c0_37] : memref<8x8x32xf32, #tpu.memory_space<vmem>>, vector<1x8x32xf32>
    %90 = vector.shape_cast %89 : vector<1x8x32xf32> to vector<8x32xf32>
    %91 = tpu.concatenate %77, %88, %90 in 1 : vector<8x64xf32>, vector<8x32xf32>, vector<8x32xf32> -> vector<8x128xf32>
    %92 = arith.truncf %91 : vector<8x128xf32> to vector<8x128xbf16>
    %cst_38 = arith.constant dense<0.000000e+00> : vector<8x256xf32>
    %93 = tpu.matmul %92, %1, %cst_38 {dimension_numbers = #tpu.dot_dimension_numbers<[1], [0], [0], [1], [0, 0, 1, 1], [], []>} : vector<8x128xbf16>, vector<128x256xbf16>, vector<8x256xf32> -> vector<8x256xf32>
    %94 = arith.addf %93, %4 : vector<8x256xf32>
    %95 = vector.extract_strided_slice %94 {offsets = [0, 0], sizes = [8, 192], strides = [1, 1]} : vector<8x256xf32> to vector<8x192xf32>
    %96 = arith.negf %95 : vector<8x192xf32>
    %97 = math.exp %96 : vector<8x192xf32>
    %cst_39 = arith.constant 1.000000e+00 : f32
    %98 = vector.broadcast %cst_39 : f32 to vector<8x192xf32>
    %99 = arith.addf %98, %97 : vector<8x192xf32>
    %100 = arith.divf %98, %99 : vector<8x192xf32>
    %101 = vector.extract_strided_slice %94 {offsets = [0, 192], sizes = [8, 64], strides = [1, 1]} : vector<8x256xf32> to vector<8x64xf32>
    %102 = math.tanh %101 : vector<8x64xf32>
    %103 = vector.extract_strided_slice %100 {offsets = [0, 0], sizes = [8, 64], strides = [1, 1]} : vector<8x192xf32> to vector<8x64xf32>
    %104 = vector.extract_strided_slice %100 {offsets = [0, 64], sizes = [8, 64], strides = [1, 1]} : vector<8x192xf32> to vector<8x64xf32>
    %105 = vector.extract_strided_slice %100 {offsets = [0, 128], sizes = [8, 64], strides = [1, 1]} : vector<8x192xf32> to vector<8x64xf32>
    %106 = arith.mulf %104, %78 : vector<8x64xf32>
    %107 = arith.mulf %103, %102 : vector<8x64xf32>
    %108 = arith.addf %106, %107 : vector<8x64xf32>
    %109 = math.tanh %108 : vector<8x64xf32>
    %110 = arith.mulf %105, %109 : vector<8x64xf32>
    %cst_40 = arith.constant 2.000000e+00 : f32
    %111 = vector.broadcast %cst_40 : f32 to vector<1x32xf32>
    %cst_41 = arith.constant 5.000000e+00 : f32
    %112 = vector.broadcast %cst_41 : f32 to vector<1x32xf32>
    %113 = tpu.concatenate %111, %112 in 1 : vector<1x32xf32>, vector<1x32xf32> -> vector<1x64xf32>
    %114 = vector.broadcast %0 : vector<8x1xf32> to vector<8x64xf32>
    %115 = vector.broadcast %113 : vector<1x64xf32> to vector<8x64xf32>
    %116 = arith.cmpf ogt, %114, %115 : vector<8x64xf32>
    %117 = arith.select %116, %110, %77 : vector<8x64xi1>, vector<8x64xf32>
    %118 = arith.select %116, %108, %78 : vector<8x64xi1>, vector<8x64xf32>
    %119 = vector.extract_strided_slice %117 {offsets = [0, 0], sizes = [8, 32], strides = [1, 1]} : vector<8x64xf32> to vector<8x32xf32>
    %c2_42 = arith.constant 2 : index
    %c0_43 = arith.constant 0 : index
    %c0_44 = arith.constant 0 : index
    %120 = vector.load %arg11[%c2_42, %c0_43, %c0_44] : memref<8x8x64xf32, #tpu.memory_space<vmem>>, vector<1x8x32xf32>
    %121 = vector.shape_cast %120 : vector<1x8x32xf32> to vector<8x32xf32>
    %122 = vector.shape_cast %119 : vector<8x32xf32> to vector<1x8x32xf32>
    tpu.vector_store %arg11[%c2_42, %c0_43, %c0_44], %122 {strides = array<i32>} : memref<8x8x64xf32, #tpu.memory_space<vmem>>, vector<1x8x32xf32>,
    %123 = vector.extract_strided_slice %117 {offsets = [0, 32], sizes = [8, 32], strides = [1, 1]} : vector<8x64xf32> to vector<8x32xf32>
    %c5_45 = arith.constant 5 : index
    %c0_46 = arith.constant 0 : index
    %c32_47 = arith.constant 32 : index
    %124 = vector.load %arg11[%c5_45, %c0_46, %c32_47] : memref<8x8x64xf32, #tpu.memory_space<vmem>>, vector<1x8x32xf32>
    %125 = vector.shape_cast %124 : vector<1x8x32xf32> to vector<8x32xf32>
    %126 = vector.shape_cast %123 : vector<8x32xf32> to vector<1x8x32xf32>
    tpu.vector_store %arg11[%c5_45, %c0_46, %c32_47], %126 {strides = array<i32>} : memref<8x8x64xf32, #tpu.memory_space<vmem>>, vector<1x8x32xf32>,
    %c3 = arith.constant 3 : index
    %c0_48 = arith.constant 0 : index
    %c0_49 = arith.constant 0 : index
    %127 = vector.load %arg1[%c3, %c0_48, %c0_49] : memref<8x8x32xf32, #tpu.memory_space<vmem>>, vector<1x8x32xf32>
    %128 = vector.shape_cast %127 : vector<1x8x32xf32> to vector<8x32xf32>
    %c4 = arith.constant 4 : index
    %c0_50 = arith.constant 0 : index
    %c0_51 = arith.constant 0 : index
    %129 = vector.load %arg1[%c4, %c0_50, %c0_51] : memref<8x8x32xf32, #tpu.memory_space<vmem>>, vector<1x8x32xf32>
    %130 = vector.shape_cast %129 : vector<1x8x32xf32> to vector<8x32xf32>
    %131 = tpu.concatenate %117, %128, %130 in 1 : vector<8x64xf32>, vector<8x32xf32>, vector<8x32xf32> -> vector<8x128xf32>
    %132 = arith.truncf %131 : vector<8x128xf32> to vector<8x128xbf16>
    %cst_52 = arith.constant dense<0.000000e+00> : vector<8x256xf32>
    %133 = tpu.matmul %132, %1, %cst_52 {dimension_numbers = #tpu.dot_dimension_numbers<[1], [0], [0], [1], [0, 0, 1, 1], [], []>} : vector<8x128xbf16>, vector<128x256xbf16>, vector<8x256xf32> -> vector<8x256xf32>
    %134 = arith.addf %133, %4 : vector<8x256xf32>
    %135 = vector.extract_strided_slice %134 {offsets = [0, 0], sizes = [8, 192], strides = [1, 1]} : vector<8x256xf32> to vector<8x192xf32>
    %136 = arith.negf %135 : vector<8x192xf32>
    %137 = math.exp %136 : vector<8x192xf32>
    %cst_53 = arith.constant 1.000000e+00 : f32
    %138 = vector.broadcast %cst_53 : f32 to vector<8x192xf32>
    %139 = arith.addf %138, %137 : vector<8x192xf32>
    %140 = arith.divf %138, %139 : vector<8x192xf32>
    %141 = vector.extract_strided_slice %134 {offsets = [0, 192], sizes = [8, 64], strides = [1, 1]} : vector<8x256xf32> to vector<8x64xf32>
    %142 = math.tanh %141 : vector<8x64xf32>
    %143 = vector.extract_strided_slice %140 {offsets = [0, 0], sizes = [8, 64], strides = [1, 1]} : vector<8x192xf32> to vector<8x64xf32>
    %144 = vector.extract_strided_slice %140 {offsets = [0, 64], sizes = [8, 64], strides = [1, 1]} : vector<8x192xf32> to vector<8x64xf32>
    %145 = vector.extract_strided_slice %140 {offsets = [0, 128], sizes = [8, 64], strides = [1, 1]} : vector<8x192xf32> to vector<8x64xf32>
    %146 = arith.mulf %144, %118 : vector<8x64xf32>
    %147 = arith.mulf %143, %142 : vector<8x64xf32>
    %148 = arith.addf %146, %147 : vector<8x64xf32>
    %149 = math.tanh %148 : vector<8x64xf32>
    %150 = arith.mulf %145, %149 : vector<8x64xf32>
    %cst_54 = arith.constant 3.000000e+00 : f32
    %151 = vector.broadcast %cst_54 : f32 to vector<1x32xf32>
    %cst_55 = arith.constant 4.000000e+00 : f32
    %152 = vector.broadcast %cst_55 : f32 to vector<1x32xf32>
    %153 = tpu.concatenate %151, %152 in 1 : vector<1x32xf32>, vector<1x32xf32> -> vector<1x64xf32>
    %154 = vector.broadcast %0 : vector<8x1xf32> to vector<8x64xf32>
    %155 = vector.broadcast %153 : vector<1x64xf32> to vector<8x64xf32>
    %156 = arith.cmpf ogt, %154, %155 : vector<8x64xf32>
    %157 = arith.select %156, %150, %117 : vector<8x64xi1>, vector<8x64xf32>
    %158 = arith.select %156, %148, %118 : vector<8x64xi1>, vector<8x64xf32>
    %159 = vector.extract_strided_slice %157 {offsets = [0, 0], sizes = [8, 32], strides = [1, 1]} : vector<8x64xf32> to vector<8x32xf32>
    %c3_56 = arith.constant 3 : index
    %c0_57 = arith.constant 0 : index
    %c0_58 = arith.constant 0 : index
    %160 = vector.load %arg11[%c3_56, %c0_57, %c0_58] : memref<8x8x64xf32, #tpu.memory_space<vmem>>, vector<1x8x32xf32>
    %161 = vector.shape_cast %160 : vector<1x8x32xf32> to vector<8x32xf32>
    %162 = vector.shape_cast %159 : vector<8x32xf32> to vector<1x8x32xf32>
    tpu.vector_store %arg11[%c3_56, %c0_57, %c0_58], %162 {strides = array<i32>} : memref<8x8x64xf32, #tpu.memory_space<vmem>>, vector<1x8x32xf32>,
    %163 = vector.extract_strided_slice %157 {offsets = [0, 32], sizes = [8, 32], strides = [1, 1]} : vector<8x64xf32> to vector<8x32xf32>
    %c4_59 = arith.constant 4 : index
    %c0_60 = arith.constant 0 : index
    %c32_61 = arith.constant 32 : index
    %164 = vector.load %arg11[%c4_59, %c0_60, %c32_61] : memref<8x8x64xf32, #tpu.memory_space<vmem>>, vector<1x8x32xf32>
    %165 = vector.shape_cast %164 : vector<1x8x32xf32> to vector<8x32xf32>
    %166 = vector.shape_cast %163 : vector<8x32xf32> to vector<1x8x32xf32>
    tpu.vector_store %arg11[%c4_59, %c0_60, %c32_61], %166 {strides = array<i32>} : memref<8x8x64xf32, #tpu.memory_space<vmem>>, vector<1x8x32xf32>,
    %c4_62 = arith.constant 4 : index
    %c0_63 = arith.constant 0 : index
    %c0_64 = arith.constant 0 : index
    %167 = vector.load %arg1[%c4_62, %c0_63, %c0_64] : memref<8x8x32xf32, #tpu.memory_space<vmem>>, vector<1x8x32xf32>
    %168 = vector.shape_cast %167 : vector<1x8x32xf32> to vector<8x32xf32>
    %c3_65 = arith.constant 3 : index
    %c0_66 = arith.constant 0 : index
    %c0_67 = arith.constant 0 : index
    %169 = vector.load %arg1[%c3_65, %c0_66, %c0_67] : memref<8x8x32xf32, #tpu.memory_space<vmem>>, vector<1x8x32xf32>
    %170 = vector.shape_cast %169 : vector<1x8x32xf32> to vector<8x32xf32>
    %171 = tpu.concatenate %157, %168, %170 in 1 : vector<8x64xf32>, vector<8x32xf32>, vector<8x32xf32> -> vector<8x128xf32>
    %172 = arith.truncf %171 : vector<8x128xf32> to vector<8x128xbf16>
    %cst_68 = arith.constant dense<0.000000e+00> : vector<8x256xf32>
    %173 = tpu.matmul %172, %1, %cst_68 {dimension_numbers = #tpu.dot_dimension_numbers<[1], [0], [0], [1], [0, 0, 1, 1], [], []>} : vector<8x128xbf16>, vector<128x256xbf16>, vector<8x256xf32> -> vector<8x256xf32>
    %174 = arith.addf %173, %4 : vector<8x256xf32>
    %175 = vector.extract_strided_slice %174 {offsets = [0, 0], sizes = [8, 192], strides = [1, 1]} : vector<8x256xf32> to vector<8x192xf32>
    %176 = arith.negf %175 : vector<8x192xf32>
    %177 = math.exp %176 : vector<8x192xf32>
    %cst_69 = arith.constant 1.000000e+00 : f32
    %178 = vector.broadcast %cst_69 : f32 to vector<8x192xf32>
    %179 = arith.addf %178, %177 : vector<8x192xf32>
    %180 = arith.divf %178, %179 : vector<8x192xf32>
    %181 = vector.extract_strided_slice %174 {offsets = [0, 192], sizes = [8, 64], strides = [1, 1]} : vector<8x256xf32> to vector<8x64xf32>
    %182 = math.tanh %181 : vector<8x64xf32>
    %183 = vector.extract_strided_slice %180 {offsets = [0, 0], sizes = [8, 64], strides = [1, 1]} : vector<8x192xf32> to vector<8x64xf32>
    %184 = vector.extract_strided_slice %180 {offsets = [0, 64], sizes = [8, 64], strides = [1, 1]} : vector<8x192xf32> to vector<8x64xf32>
    %185 = vector.extract_strided_slice %180 {offsets = [0, 128], sizes = [8, 64], strides = [1, 1]} : vector<8x192xf32> to vector<8x64xf32>
    %186 = arith.mulf %184, %158 : vector<8x64xf32>
    %187 = arith.mulf %183, %182 : vector<8x64xf32>
    %188 = arith.addf %186, %187 : vector<8x64xf32>
    %189 = math.tanh %188 : vector<8x64xf32>
    %190 = arith.mulf %185, %189 : vector<8x64xf32>
    %cst_70 = arith.constant 4.000000e+00 : f32
    %191 = vector.broadcast %cst_70 : f32 to vector<1x32xf32>
    %cst_71 = arith.constant 3.000000e+00 : f32
    %192 = vector.broadcast %cst_71 : f32 to vector<1x32xf32>
    %193 = tpu.concatenate %191, %192 in 1 : vector<1x32xf32>, vector<1x32xf32> -> vector<1x64xf32>
    %194 = vector.broadcast %0 : vector<8x1xf32> to vector<8x64xf32>
    %195 = vector.broadcast %193 : vector<1x64xf32> to vector<8x64xf32>
    %196 = arith.cmpf ogt, %194, %195 : vector<8x64xf32>
    %197 = arith.select %196, %190, %157 : vector<8x64xi1>, vector<8x64xf32>
    %198 = arith.select %196, %188, %158 : vector<8x64xi1>, vector<8x64xf32>
    %199 = vector.extract_strided_slice %197 {offsets = [0, 0], sizes = [8, 32], strides = [1, 1]} : vector<8x64xf32> to vector<8x32xf32>
    %c4_72 = arith.constant 4 : index
    %c0_73 = arith.constant 0 : index
    %c0_74 = arith.constant 0 : index
    %200 = vector.load %arg11[%c4_72, %c0_73, %c0_74] : memref<8x8x64xf32, #tpu.memory_space<vmem>>, vector<1x8x32xf32>
    %201 = vector.shape_cast %200 : vector<1x8x32xf32> to vector<8x32xf32>
    %202 = vector.shape_cast %199 : vector<8x32xf32> to vector<1x8x32xf32>
    tpu.vector_store %arg11[%c4_72, %c0_73, %c0_74], %202 {strides = array<i32>} : memref<8x8x64xf32, #tpu.memory_space<vmem>>, vector<1x8x32xf32>,
    %203 = vector.extract_strided_slice %197 {offsets = [0, 32], sizes = [8, 32], strides = [1, 1]} : vector<8x64xf32> to vector<8x32xf32>
    %c3_75 = arith.constant 3 : index
    %c0_76 = arith.constant 0 : index
    %c32_77 = arith.constant 32 : index
    %204 = vector.load %arg11[%c3_75, %c0_76, %c32_77] : memref<8x8x64xf32, #tpu.memory_space<vmem>>, vector<1x8x32xf32>
    %205 = vector.shape_cast %204 : vector<1x8x32xf32> to vector<8x32xf32>
    %206 = vector.shape_cast %203 : vector<8x32xf32> to vector<1x8x32xf32>
    tpu.vector_store %arg11[%c3_75, %c0_76, %c32_77], %206 {strides = array<i32>} : memref<8x8x64xf32, #tpu.memory_space<vmem>>, vector<1x8x32xf32>,
    %c5_78 = arith.constant 5 : index
    %c0_79 = arith.constant 0 : index
    %c0_80 = arith.constant 0 : index
    %207 = vector.load %arg1[%c5_78, %c0_79, %c0_80] : memref<8x8x32xf32, #tpu.memory_space<vmem>>, vector<1x8x32xf32>
    %208 = vector.shape_cast %207 : vector<1x8x32xf32> to vector<8x32xf32>
    %c2_81 = arith.constant 2 : index
    %c0_82 = arith.constant 0 : index
    %c0_83 = arith.constant 0 : index
    %209 = vector.load %arg1[%c2_81, %c0_82, %c0_83] : memref<8x8x32xf32, #tpu.memory_space<vmem>>, vector<1x8x32xf32>
    %210 = vector.shape_cast %209 : vector<1x8x32xf32> to vector<8x32xf32>
    %211 = tpu.concatenate %197, %208, %210 in 1 : vector<8x64xf32>, vector<8x32xf32>, vector<8x32xf32> -> vector<8x128xf32>
    %212 = arith.truncf %211 : vector<8x128xf32> to vector<8x128xbf16>
    %cst_84 = arith.constant dense<0.000000e+00> : vector<8x256xf32>
    %213 = tpu.matmul %212, %1, %cst_84 {dimension_numbers = #tpu.dot_dimension_numbers<[1], [0], [0], [1], [0, 0, 1, 1], [], []>} : vector<8x128xbf16>, vector<128x256xbf16>, vector<8x256xf32> -> vector<8x256xf32>
    %214 = arith.addf %213, %4 : vector<8x256xf32>
    %215 = vector.extract_strided_slice %214 {offsets = [0, 0], sizes = [8, 192], strides = [1, 1]} : vector<8x256xf32> to vector<8x192xf32>
    %216 = arith.negf %215 : vector<8x192xf32>
    %217 = math.exp %216 : vector<8x192xf32>
    %cst_85 = arith.constant 1.000000e+00 : f32
    %218 = vector.broadcast %cst_85 : f32 to vector<8x192xf32>
    %219 = arith.addf %218, %217 : vector<8x192xf32>
    %220 = arith.divf %218, %219 : vector<8x192xf32>
    %221 = vector.extract_strided_slice %214 {offsets = [0, 192], sizes = [8, 64], strides = [1, 1]} : vector<8x256xf32> to vector<8x64xf32>
    %222 = math.tanh %221 : vector<8x64xf32>
    %223 = vector.extract_strided_slice %220 {offsets = [0, 0], sizes = [8, 64], strides = [1, 1]} : vector<8x192xf32> to vector<8x64xf32>
    %224 = vector.extract_strided_slice %220 {offsets = [0, 64], sizes = [8, 64], strides = [1, 1]} : vector<8x192xf32> to vector<8x64xf32>
    %225 = vector.extract_strided_slice %220 {offsets = [0, 128], sizes = [8, 64], strides = [1, 1]} : vector<8x192xf32> to vector<8x64xf32>
    %226 = arith.mulf %224, %198 : vector<8x64xf32>
    %227 = arith.mulf %223, %222 : vector<8x64xf32>
    %228 = arith.addf %226, %227 : vector<8x64xf32>
    %229 = math.tanh %228 : vector<8x64xf32>
    %230 = arith.mulf %225, %229 : vector<8x64xf32>
    %cst_86 = arith.constant 5.000000e+00 : f32
    %231 = vector.broadcast %cst_86 : f32 to vector<1x32xf32>
    %cst_87 = arith.constant 2.000000e+00 : f32
    %232 = vector.broadcast %cst_87 : f32 to vector<1x32xf32>
    %233 = tpu.concatenate %231, %232 in 1 : vector<1x32xf32>, vector<1x32xf32> -> vector<1x64xf32>
    %234 = vector.broadcast %0 : vector<8x1xf32> to vector<8x64xf32>
    %235 = vector.broadcast %233 : vector<1x64xf32> to vector<8x64xf32>
    %236 = arith.cmpf ogt, %234, %235 : vector<8x64xf32>
    %237 = arith.select %236, %230, %197 : vector<8x64xi1>, vector<8x64xf32>
    %238 = arith.select %236, %228, %198 : vector<8x64xi1>, vector<8x64xf32>
    %239 = vector.extract_strided_slice %237 {offsets = [0, 0], sizes = [8, 32], strides = [1, 1]} : vector<8x64xf32> to vector<8x32xf32>
    %c5_88 = arith.constant 5 : index
    %c0_89 = arith.constant 0 : index
    %c0_90 = arith.constant 0 : index
    %240 = vector.load %arg11[%c5_88, %c0_89, %c0_90] : memref<8x8x64xf32, #tpu.memory_space<vmem>>, vector<1x8x32xf32>
    %241 = vector.shape_cast %240 : vector<1x8x32xf32> to vector<8x32xf32>
    %242 = vector.shape_cast %239 : vector<8x32xf32> to vector<1x8x32xf32>
    tpu.vector_store %arg11[%c5_88, %c0_89, %c0_90], %242 {strides = array<i32>} : memref<8x8x64xf32, #tpu.memory_space<vmem>>, vector<1x8x32xf32>,
    %243 = vector.extract_strided_slice %237 {offsets = [0, 32], sizes = [8, 32], strides = [1, 1]} : vector<8x64xf32> to vector<8x32xf32>
    %c2_91 = arith.constant 2 : index
    %c0_92 = arith.constant 0 : index
    %c32_93 = arith.constant 32 : index
    %244 = vector.load %arg11[%c2_91, %c0_92, %c32_93] : memref<8x8x64xf32, #tpu.memory_space<vmem>>, vector<1x8x32xf32>
    %245 = vector.shape_cast %244 : vector<1x8x32xf32> to vector<8x32xf32>
    %246 = vector.shape_cast %243 : vector<8x32xf32> to vector<1x8x32xf32>
    tpu.vector_store %arg11[%c2_91, %c0_92, %c32_93], %246 {strides = array<i32>} : memref<8x8x64xf32, #tpu.memory_space<vmem>>, vector<1x8x32xf32>,
    %c6_94 = arith.constant 6 : index
    %c0_95 = arith.constant 0 : index
    %c0_96 = arith.constant 0 : index
    %247 = vector.load %arg1[%c6_94, %c0_95, %c0_96] : memref<8x8x32xf32, #tpu.memory_space<vmem>>, vector<1x8x32xf32>
    %248 = vector.shape_cast %247 : vector<1x8x32xf32> to vector<8x32xf32>
    %c1_97 = arith.constant 1 : index
    %c0_98 = arith.constant 0 : index
    %c0_99 = arith.constant 0 : index
    %249 = vector.load %arg1[%c1_97, %c0_98, %c0_99] : memref<8x8x32xf32, #tpu.memory_space<vmem>>, vector<1x8x32xf32>
    %250 = vector.shape_cast %249 : vector<1x8x32xf32> to vector<8x32xf32>
    %251 = tpu.concatenate %237, %248, %250 in 1 : vector<8x64xf32>, vector<8x32xf32>, vector<8x32xf32> -> vector<8x128xf32>
    %252 = arith.truncf %251 : vector<8x128xf32> to vector<8x128xbf16>
    %cst_100 = arith.constant dense<0.000000e+00> : vector<8x256xf32>
    %253 = tpu.matmul %252, %1, %cst_100 {dimension_numbers = #tpu.dot_dimension_numbers<[1], [0], [0], [1], [0, 0, 1, 1], [], []>} : vector<8x128xbf16>, vector<128x256xbf16>, vector<8x256xf32> -> vector<8x256xf32>
    %254 = arith.addf %253, %4 : vector<8x256xf32>
    %255 = vector.extract_strided_slice %254 {offsets = [0, 0], sizes = [8, 192], strides = [1, 1]} : vector<8x256xf32> to vector<8x192xf32>
    %256 = arith.negf %255 : vector<8x192xf32>
    %257 = math.exp %256 : vector<8x192xf32>
    %cst_101 = arith.constant 1.000000e+00 : f32
    %258 = vector.broadcast %cst_101 : f32 to vector<8x192xf32>
    %259 = arith.addf %258, %257 : vector<8x192xf32>
    %260 = arith.divf %258, %259 : vector<8x192xf32>
    %261 = vector.extract_strided_slice %254 {offsets = [0, 192], sizes = [8, 64], strides = [1, 1]} : vector<8x256xf32> to vector<8x64xf32>
    %262 = math.tanh %261 : vector<8x64xf32>
    %263 = vector.extract_strided_slice %260 {offsets = [0, 0], sizes = [8, 64], strides = [1, 1]} : vector<8x192xf32> to vector<8x64xf32>
    %264 = vector.extract_strided_slice %260 {offsets = [0, 64], sizes = [8, 64], strides = [1, 1]} : vector<8x192xf32> to vector<8x64xf32>
    %265 = vector.extract_strided_slice %260 {offsets = [0, 128], sizes = [8, 64], strides = [1, 1]} : vector<8x192xf32> to vector<8x64xf32>
    %266 = arith.mulf %264, %238 : vector<8x64xf32>
    %267 = arith.mulf %263, %262 : vector<8x64xf32>
    %268 = arith.addf %266, %267 : vector<8x64xf32>
    %269 = math.tanh %268 : vector<8x64xf32>
    %270 = arith.mulf %265, %269 : vector<8x64xf32>
    %cst_102 = arith.constant 6.000000e+00 : f32
    %271 = vector.broadcast %cst_102 : f32 to vector<1x32xf32>
    %cst_103 = arith.constant 1.000000e+00 : f32
    %272 = vector.broadcast %cst_103 : f32 to vector<1x32xf32>
    %273 = tpu.concatenate %271, %272 in 1 : vector<1x32xf32>, vector<1x32xf32> -> vector<1x64xf32>
    %274 = vector.broadcast %0 : vector<8x1xf32> to vector<8x64xf32>
    %275 = vector.broadcast %273 : vector<1x64xf32> to vector<8x64xf32>
    %276 = arith.cmpf ogt, %274, %275 : vector<8x64xf32>
    %277 = arith.select %276, %270, %237 : vector<8x64xi1>, vector<8x64xf32>
    %278 = arith.select %276, %268, %238 : vector<8x64xi1>, vector<8x64xf32>
    %279 = vector.extract_strided_slice %277 {offsets = [0, 0], sizes = [8, 32], strides = [1, 1]} : vector<8x64xf32> to vector<8x32xf32>
    %c6_104 = arith.constant 6 : index
    %c0_105 = arith.constant 0 : index
    %c0_106 = arith.constant 0 : index
    %280 = vector.load %arg11[%c6_104, %c0_105, %c0_106] : memref<8x8x64xf32, #tpu.memory_space<vmem>>, vector<1x8x32xf32>
    %281 = vector.shape_cast %280 : vector<1x8x32xf32> to vector<8x32xf32>
    %282 = vector.shape_cast %279 : vector<8x32xf32> to vector<1x8x32xf32>
    tpu.vector_store %arg11[%c6_104, %c0_105, %c0_106], %282 {strides = array<i32>} : memref<8x8x64xf32, #tpu.memory_space<vmem>>, vector<1x8x32xf32>,
    %283 = vector.extract_strided_slice %277 {offsets = [0, 32], sizes = [8, 32], strides = [1, 1]} : vector<8x64xf32> to vector<8x32xf32>
    %c1_107 = arith.constant 1 : index
    %c0_108 = arith.constant 0 : index
    %c32_109 = arith.constant 32 : index
    %284 = vector.load %arg11[%c1_107, %c0_108, %c32_109] : memref<8x8x64xf32, #tpu.memory_space<vmem>>, vector<1x8x32xf32>
    %285 = vector.shape_cast %284 : vector<1x8x32xf32> to vector<8x32xf32>
    %286 = vector.shape_cast %283 : vector<8x32xf32> to vector<1x8x32xf32>
    tpu.vector_store %arg11[%c1_107, %c0_108, %c32_109], %286 {strides = array<i32>} : memref<8x8x64xf32, #tpu.memory_space<vmem>>, vector<1x8x32xf32>,
    %c7_110 = arith.constant 7 : index
    %c0_111 = arith.constant 0 : index
    %c0_112 = arith.constant 0 : index
    %287 = vector.load %arg1[%c7_110, %c0_111, %c0_112] : memref<8x8x32xf32, #tpu.memory_space<vmem>>, vector<1x8x32xf32>
    %288 = vector.shape_cast %287 : vector<1x8x32xf32> to vector<8x32xf32>
    %c0_113 = arith.constant 0 : index
    %c0_114 = arith.constant 0 : index
    %c0_115 = arith.constant 0 : index
    %289 = vector.load %arg1[%c0_113, %c0_114, %c0_115] : memref<8x8x32xf32, #tpu.memory_space<vmem>>, vector<1x8x32xf32>
    %290 = vector.shape_cast %289 : vector<1x8x32xf32> to vector<8x32xf32>
    %291 = tpu.concatenate %277, %288, %290 in 1 : vector<8x64xf32>, vector<8x32xf32>, vector<8x32xf32> -> vector<8x128xf32>
    %292 = arith.truncf %291 : vector<8x128xf32> to vector<8x128xbf16>
    %cst_116 = arith.constant dense<0.000000e+00> : vector<8x256xf32>
    %293 = tpu.matmul %292, %1, %cst_116 {dimension_numbers = #tpu.dot_dimension_numbers<[1], [0], [0], [1], [0, 0, 1, 1], [], []>} : vector<8x128xbf16>, vector<128x256xbf16>, vector<8x256xf32> -> vector<8x256xf32>
    %294 = arith.addf %293, %4 : vector<8x256xf32>
    %295 = vector.extract_strided_slice %294 {offsets = [0, 0], sizes = [8, 192], strides = [1, 1]} : vector<8x256xf32> to vector<8x192xf32>
    %296 = arith.negf %295 : vector<8x192xf32>
    %297 = math.exp %296 : vector<8x192xf32>
    %cst_117 = arith.constant 1.000000e+00 : f32
    %298 = vector.broadcast %cst_117 : f32 to vector<8x192xf32>
    %299 = arith.addf %298, %297 : vector<8x192xf32>
    %300 = arith.divf %298, %299 : vector<8x192xf32>
    %301 = vector.extract_strided_slice %294 {offsets = [0, 192], sizes = [8, 64], strides = [1, 1]} : vector<8x256xf32> to vector<8x64xf32>
    %302 = math.tanh %301 : vector<8x64xf32>
    %303 = vector.extract_strided_slice %300 {offsets = [0, 0], sizes = [8, 64], strides = [1, 1]} : vector<8x192xf32> to vector<8x64xf32>
    %304 = vector.extract_strided_slice %300 {offsets = [0, 64], sizes = [8, 64], strides = [1, 1]} : vector<8x192xf32> to vector<8x64xf32>
    %305 = vector.extract_strided_slice %300 {offsets = [0, 128], sizes = [8, 64], strides = [1, 1]} : vector<8x192xf32> to vector<8x64xf32>
    %306 = arith.mulf %304, %278 : vector<8x64xf32>
    %307 = arith.mulf %303, %302 : vector<8x64xf32>
    %308 = arith.addf %306, %307 : vector<8x64xf32>
    %309 = math.tanh %308 : vector<8x64xf32>
    %310 = arith.mulf %305, %309 : vector<8x64xf32>
    %cst_118 = arith.constant 7.000000e+00 : f32
    %311 = vector.broadcast %cst_118 : f32 to vector<1x32xf32>
    %cst_119 = arith.constant 0.000000e+00 : f32
    %312 = vector.broadcast %cst_119 : f32 to vector<1x32xf32>
    %313 = tpu.concatenate %311, %312 in 1 : vector<1x32xf32>, vector<1x32xf32> -> vector<1x64xf32>
    %314 = vector.broadcast %0 : vector<8x1xf32> to vector<8x64xf32>
    %315 = vector.broadcast %313 : vector<1x64xf32> to vector<8x64xf32>
    %316 = arith.cmpf ogt, %314, %315 : vector<8x64xf32>
    %317 = arith.select %316, %310, %277 : vector<8x64xi1>, vector<8x64xf32>
    %318 = vector.extract_strided_slice %317 {offsets = [0, 0], sizes = [8, 32], strides = [1, 1]} : vector<8x64xf32> to vector<8x32xf32>
    %c7_120 = arith.constant 7 : index
    %c0_121 = arith.constant 0 : index
    %c0_122 = arith.constant 0 : index
    %319 = vector.load %arg11[%c7_120, %c0_121, %c0_122] : memref<8x8x64xf32, #tpu.memory_space<vmem>>, vector<1x8x32xf32>
    %320 = vector.shape_cast %319 : vector<1x8x32xf32> to vector<8x32xf32>
    %321 = vector.shape_cast %318 : vector<8x32xf32> to vector<1x8x32xf32>
    tpu.vector_store %arg11[%c7_120, %c0_121, %c0_122], %321 {strides = array<i32>} : memref<8x8x64xf32, #tpu.memory_space<vmem>>, vector<1x8x32xf32>,
    %322 = vector.extract_strided_slice %317 {offsets = [0, 32], sizes = [8, 32], strides = [1, 1]} : vector<8x64xf32> to vector<8x32xf32>
    %c0_123 = arith.constant 0 : index
    %c0_124 = arith.constant 0 : index
    %c32_125 = arith.constant 32 : index
    %323 = vector.load %arg11[%c0_123, %c0_124, %c32_125] : memref<8x8x64xf32, #tpu.memory_space<vmem>>, vector<1x8x32xf32>
    %324 = vector.shape_cast %323 : vector<1x8x32xf32> to vector<8x32xf32>
    %325 = vector.shape_cast %322 : vector<8x32xf32> to vector<1x8x32xf32>
    tpu.vector_store %arg11[%c0_123, %c0_124, %c32_125], %325 {strides = array<i32>} : memref<8x8x64xf32, #tpu.memory_space<vmem>>, vector<1x8x32xf32>,
    %c0_126 = arith.constant 0 : index
    %c0_127 = arith.constant 0 : index
    %326 = vector.load %arg4[%c0_126, %c0_127] : memref<192x256xbf16, #tpu.memory_space<vmem>>, vector<192x256xbf16>
    %c0_128 = arith.constant 0 : index
    %c0_129 = arith.constant 0 : index
    %327 = vector.load %arg5[%c0_128, %c0_129] : memref<1x256xf32, #tpu.memory_space<vmem>>, vector<1x256xf32>
    %328 = vector.shape_cast %327 : vector<1x256xf32> to vector<1x256xf32>
    %329 = vector.broadcast %328 : vector<1x256xf32> to vector<8x256xf32>
    %cst_130 = arith.constant 0.000000e+00 : f32
    %330 = vector.broadcast %cst_130 : f32 to vector<8x64xf32>
    %cst_131 = arith.constant 0.000000e+00 : f32
    %331 = vector.broadcast %cst_131 : f32 to vector<8x64xf32>
    %c0_132 = arith.constant 0 : index
    %c0_133 = arith.constant 0 : index
    %c0_134 = arith.constant 0 : index
    %332 = vector.load %arg11[%c0_132, %c0_133, %c0_134] : memref<8x8x64xf32, #tpu.memory_space<vmem>>, vector<1x8x64xf32>
    %333 = vector.shape_cast %332 : vector<1x8x64xf32> to vector<8x64xf32>
    %c7_135 = arith.constant 7 : index
    %c0_136 = arith.constant 0 : index
    %c0_137 = arith.constant 0 : index
    %334 = vector.load %arg11[%c7_135, %c0_136, %c0_137] : memref<8x8x64xf32, #tpu.memory_space<vmem>>, vector<1x8x64xf32>
    %335 = vector.shape_cast %334 : vector<1x8x64xf32> to vector<8x64xf32>
    %336 = tpu.concatenate %330, %333, %335 in 1 : vector<8x64xf32>, vector<8x64xf32>, vector<8x64xf32> -> vector<8x192xf32>
    %337 = arith.truncf %336 : vector<8x192xf32> to vector<8x192xbf16>
    %cst_138 = arith.constant dense<0.000000e+00> : vector<8x256xf32>
    %338 = tpu.matmul %337, %326, %cst_138 {dimension_numbers = #tpu.dot_dimension_numbers<[1], [0], [0], [1], [0, 0, 1, 1], [], []>} : vector<8x192xbf16>, vector<192x256xbf16>, vector<8x256xf32> -> vector<8x256xf32>
    %339 = arith.addf %338, %329 : vector<8x256xf32>
    %340 = vector.extract_strided_slice %339 {offsets = [0, 0], sizes = [8, 192], strides = [1, 1]} : vector<8x256xf32> to vector<8x192xf32>
    %341 = arith.negf %340 : vector<8x192xf32>
    %342 = math.exp %341 : vector<8x192xf32>
    %cst_139 = arith.constant 1.000000e+00 : f32
    %343 = vector.broadcast %cst_139 : f32 to vector<8x192xf32>
    %344 = arith.addf %343, %342 : vector<8x192xf32>
    %345 = arith.divf %343, %344 : vector<8x192xf32>
    %346 = vector.extract_strided_slice %339 {offsets = [0, 192], sizes = [8, 64], strides = [1, 1]} : vector<8x256xf32> to vector<8x64xf32>
    %347 = math.tanh %346 : vector<8x64xf32>
    %348 = vector.extract_strided_slice %345 {offsets = [0, 0], sizes = [8, 64], strides = [1, 1]} : vector<8x192xf32> to vector<8x64xf32>
    %349 = vector.extract_strided_slice %345 {offsets = [0, 64], sizes = [8, 64], strides = [1, 1]} : vector<8x192xf32> to vector<8x64xf32>
    %350 = vector.extract_strided_slice %345 {offsets = [0, 128], sizes = [8, 64], strides = [1, 1]} : vector<8x192xf32> to vector<8x64xf32>
    %351 = arith.mulf %349, %331 : vector<8x64xf32>
    %352 = arith.mulf %348, %347 : vector<8x64xf32>
    %353 = arith.addf %351, %352 : vector<8x64xf32>
    %354 = math.tanh %353 : vector<8x64xf32>
    %355 = arith.mulf %350, %354 : vector<8x64xf32>
    %cst_140 = arith.constant 0.000000e+00 : f32
    %356 = vector.broadcast %cst_140 : f32 to vector<1x32xf32>
    %cst_141 = arith.constant 7.000000e+00 : f32
    %357 = vector.broadcast %cst_141 : f32 to vector<1x32xf32>
    %358 = tpu.concatenate %356, %357 in 1 : vector<1x32xf32>, vector<1x32xf32> -> vector<1x64xf32>
    %359 = vector.broadcast %0 : vector<8x1xf32> to vector<8x64xf32>
    %360 = vector.broadcast %358 : vector<1x64xf32> to vector<8x64xf32>
    %361 = arith.cmpf ogt, %359, %360 : vector<8x64xf32>
    %362 = arith.select %361, %355, %330 : vector<8x64xi1>, vector<8x64xf32>
    %363 = arith.select %361, %353, %331 : vector<8x64xi1>, vector<8x64xf32>
    %364 = vector.extract_strided_slice %362 {offsets = [0, 0], sizes = [8, 32], strides = [1, 1]} : vector<8x64xf32> to vector<8x32xf32>
    %c0_142 = arith.constant 0 : index
    %c0_143 = arith.constant 0 : index
    %c0_144 = arith.constant 0 : index
    %365 = vector.load %arg12[%c0_142, %c0_143, %c0_144] : memref<8x8x64xf32, #tpu.memory_space<vmem>>, vector<1x8x32xf32>
    %366 = vector.shape_cast %365 : vector<1x8x32xf32> to vector<8x32xf32>
    %367 = vector.shape_cast %364 : vector<8x32xf32> to vector<1x8x32xf32>
    tpu.vector_store %arg12[%c0_142, %c0_143, %c0_144], %367 {strides = array<i32>} : memref<8x8x64xf32, #tpu.memory_space<vmem>>, vector<1x8x32xf32>,
    %368 = vector.extract_strided_slice %362 {offsets = [0, 32], sizes = [8, 32], strides = [1, 1]} : vector<8x64xf32> to vector<8x32xf32>
    %c7_145 = arith.constant 7 : index
    %c0_146 = arith.constant 0 : index
    %c32_147 = arith.constant 32 : index
    %369 = vector.load %arg12[%c7_145, %c0_146, %c32_147] : memref<8x8x64xf32, #tpu.memory_space<vmem>>, vector<1x8x32xf32>
    %370 = vector.shape_cast %369 : vector<1x8x32xf32> to vector<8x32xf32>
    %371 = vector.shape_cast %368 : vector<8x32xf32> to vector<1x8x32xf32>
    tpu.vector_store %arg12[%c7_145, %c0_146, %c32_147], %371 {strides = array<i32>} : memref<8x8x64xf32, #tpu.memory_space<vmem>>, vector<1x8x32xf32>,
    %c1_148 = arith.constant 1 : index
    %c0_149 = arith.constant 0 : index
    %c0_150 = arith.constant 0 : index
    %372 = vector.load %arg11[%c1_148, %c0_149, %c0_150] : memref<8x8x64xf32, #tpu.memory_space<vmem>>, vector<1x8x64xf32>
    %373 = vector.shape_cast %372 : vector<1x8x64xf32> to vector<8x64xf32>
    %c6_151 = arith.constant 6 : index
    %c0_152 = arith.constant 0 : index
    %c0_153 = arith.constant 0 : index
    %374 = vector.load %arg11[%c6_151, %c0_152, %c0_153] : memref<8x8x64xf32, #tpu.memory_space<vmem>>, vector<1x8x64xf32>
    %375 = vector.shape_cast %374 : vector<1x8x64xf32> to vector<8x64xf32>
    %376 = tpu.concatenate %362, %373, %375 in 1 : vector<8x64xf32>, vector<8x64xf32>, vector<8x64xf32> -> vector<8x192xf32>
    %377 = arith.truncf %376 : vector<8x192xf32> to vector<8x192xbf16>
    %cst_154 = arith.constant dense<0.000000e+00> : vector<8x256xf32>
    %378 = tpu.matmul %377, %326, %cst_154 {dimension_numbers = #tpu.dot_dimension_numbers<[1], [0], [0], [1], [0, 0, 1, 1], [], []>} : vector<8x192xbf16>, vector<192x256xbf16>, vector<8x256xf32> -> vector<8x256xf32>
    %379 = arith.addf %378, %329 : vector<8x256xf32>
    %380 = vector.extract_strided_slice %379 {offsets = [0, 0], sizes = [8, 192], strides = [1, 1]} : vector<8x256xf32> to vector<8x192xf32>
    %381 = arith.negf %380 : vector<8x192xf32>
    %382 = math.exp %381 : vector<8x192xf32>
    %cst_155 = arith.constant 1.000000e+00 : f32
    %383 = vector.broadcast %cst_155 : f32 to vector<8x192xf32>
    %384 = arith.addf %383, %382 : vector<8x192xf32>
    %385 = arith.divf %383, %384 : vector<8x192xf32>
    %386 = vector.extract_strided_slice %379 {offsets = [0, 192], sizes = [8, 64], strides = [1, 1]} : vector<8x256xf32> to vector<8x64xf32>
    %387 = math.tanh %386 : vector<8x64xf32>
    %388 = vector.extract_strided_slice %385 {offsets = [0, 0], sizes = [8, 64], strides = [1, 1]} : vector<8x192xf32> to vector<8x64xf32>
    %389 = vector.extract_strided_slice %385 {offsets = [0, 64], sizes = [8, 64], strides = [1, 1]} : vector<8x192xf32> to vector<8x64xf32>
    %390 = vector.extract_strided_slice %385 {offsets = [0, 128], sizes = [8, 64], strides = [1, 1]} : vector<8x192xf32> to vector<8x64xf32>
    %391 = arith.mulf %389, %363 : vector<8x64xf32>
    %392 = arith.mulf %388, %387 : vector<8x64xf32>
    %393 = arith.addf %391, %392 : vector<8x64xf32>
    %394 = math.tanh %393 : vector<8x64xf32>
    %395 = arith.mulf %390, %394 : vector<8x64xf32>
    %cst_156 = arith.constant 1.000000e+00 : f32
    %396 = vector.broadcast %cst_156 : f32 to vector<1x32xf32>
    %cst_157 = arith.constant 6.000000e+00 : f32
    %397 = vector.broadcast %cst_157 : f32 to vector<1x32xf32>
    %398 = tpu.concatenate %396, %397 in 1 : vector<1x32xf32>, vector<1x32xf32> -> vector<1x64xf32>
    %399 = vector.broadcast %0 : vector<8x1xf32> to vector<8x64xf32>
    %400 = vector.broadcast %398 : vector<1x64xf32> to vector<8x64xf32>
    %401 = arith.cmpf ogt, %399, %400 : vector<8x64xf32>
    %402 = arith.select %401, %395, %362 : vector<8x64xi1>, vector<8x64xf32>
    %403 = arith.select %401, %393, %363 : vector<8x64xi1>, vector<8x64xf32>
    %404 = vector.extract_strided_slice %402 {offsets = [0, 0], sizes = [8, 32], strides = [1, 1]} : vector<8x64xf32> to vector<8x32xf32>
    %c1_158 = arith.constant 1 : index
    %c0_159 = arith.constant 0 : index
    %c0_160 = arith.constant 0 : index
    %405 = vector.load %arg12[%c1_158, %c0_159, %c0_160] : memref<8x8x64xf32, #tpu.memory_space<vmem>>, vector<1x8x32xf32>
    %406 = vector.shape_cast %405 : vector<1x8x32xf32> to vector<8x32xf32>
    %407 = vector.shape_cast %404 : vector<8x32xf32> to vector<1x8x32xf32>
    tpu.vector_store %arg12[%c1_158, %c0_159, %c0_160], %407 {strides = array<i32>} : memref<8x8x64xf32, #tpu.memory_space<vmem>>, vector<1x8x32xf32>,
    %408 = vector.extract_strided_slice %402 {offsets = [0, 32], sizes = [8, 32], strides = [1, 1]} : vector<8x64xf32> to vector<8x32xf32>
    %c6_161 = arith.constant 6 : index
    %c0_162 = arith.constant 0 : index
    %c32_163 = arith.constant 32 : index
    %409 = vector.load %arg12[%c6_161, %c0_162, %c32_163] : memref<8x8x64xf32, #tpu.memory_space<vmem>>, vector<1x8x32xf32>
    %410 = vector.shape_cast %409 : vector<1x8x32xf32> to vector<8x32xf32>
    %411 = vector.shape_cast %408 : vector<8x32xf32> to vector<1x8x32xf32>
    tpu.vector_store %arg12[%c6_161, %c0_162, %c32_163], %411 {strides = array<i32>} : memref<8x8x64xf32, #tpu.memory_space<vmem>>, vector<1x8x32xf32>,
    %c2_164 = arith.constant 2 : index
    %c0_165 = arith.constant 0 : index
    %c0_166 = arith.constant 0 : index
    %412 = vector.load %arg11[%c2_164, %c0_165, %c0_166] : memref<8x8x64xf32, #tpu.memory_space<vmem>>, vector<1x8x64xf32>
    %413 = vector.shape_cast %412 : vector<1x8x64xf32> to vector<8x64xf32>
    %c5_167 = arith.constant 5 : index
    %c0_168 = arith.constant 0 : index
    %c0_169 = arith.constant 0 : index
    %414 = vector.load %arg11[%c5_167, %c0_168, %c0_169] : memref<8x8x64xf32, #tpu.memory_space<vmem>>, vector<1x8x64xf32>
    %415 = vector.shape_cast %414 : vector<1x8x64xf32> to vector<8x64xf32>
    %416 = tpu.concatenate %402, %413, %415 in 1 : vector<8x64xf32>, vector<8x64xf32>, vector<8x64xf32> -> vector<8x192xf32>
    %417 = arith.truncf %416 : vector<8x192xf32> to vector<8x192xbf16>
    %cst_170 = arith.constant dense<0.000000e+00> : vector<8x256xf32>
    %418 = tpu.matmul %417, %326, %cst_170 {dimension_numbers = #tpu.dot_dimension_numbers<[1], [0], [0], [1], [0, 0, 1, 1], [], []>} : vector<8x192xbf16>, vector<192x256xbf16>, vector<8x256xf32> -> vector<8x256xf32>
    %419 = arith.addf %418, %329 : vector<8x256xf32>
    %420 = vector.extract_strided_slice %419 {offsets = [0, 0], sizes = [8, 192], strides = [1, 1]} : vector<8x256xf32> to vector<8x192xf32>
    %421 = arith.negf %420 : vector<8x192xf32>
    %422 = math.exp %421 : vector<8x192xf32>
    %cst_171 = arith.constant 1.000000e+00 : f32
    %423 = vector.broadcast %cst_171 : f32 to vector<8x192xf32>
    %424 = arith.addf %423, %422 : vector<8x192xf32>
    %425 = arith.divf %423, %424 : vector<8x192xf32>
    %426 = vector.extract_strided_slice %419 {offsets = [0, 192], sizes = [8, 64], strides = [1, 1]} : vector<8x256xf32> to vector<8x64xf32>
    %427 = math.tanh %426 : vector<8x64xf32>
    %428 = vector.extract_strided_slice %425 {offsets = [0, 0], sizes = [8, 64], strides = [1, 1]} : vector<8x192xf32> to vector<8x64xf32>
    %429 = vector.extract_strided_slice %425 {offsets = [0, 64], sizes = [8, 64], strides = [1, 1]} : vector<8x192xf32> to vector<8x64xf32>
    %430 = vector.extract_strided_slice %425 {offsets = [0, 128], sizes = [8, 64], strides = [1, 1]} : vector<8x192xf32> to vector<8x64xf32>
    %431 = arith.mulf %429, %403 : vector<8x64xf32>
    %432 = arith.mulf %428, %427 : vector<8x64xf32>
    %433 = arith.addf %431, %432 : vector<8x64xf32>
    %434 = math.tanh %433 : vector<8x64xf32>
    %435 = arith.mulf %430, %434 : vector<8x64xf32>
    %cst_172 = arith.constant 2.000000e+00 : f32
    %436 = vector.broadcast %cst_172 : f32 to vector<1x32xf32>
    %cst_173 = arith.constant 5.000000e+00 : f32
    %437 = vector.broadcast %cst_173 : f32 to vector<1x32xf32>
    %438 = tpu.concatenate %436, %437 in 1 : vector<1x32xf32>, vector<1x32xf32> -> vector<1x64xf32>
    %439 = vector.broadcast %0 : vector<8x1xf32> to vector<8x64xf32>
    %440 = vector.broadcast %438 : vector<1x64xf32> to vector<8x64xf32>
    %441 = arith.cmpf ogt, %439, %440 : vector<8x64xf32>
    %442 = arith.select %441, %435, %402 : vector<8x64xi1>, vector<8x64xf32>
    %443 = arith.select %441, %433, %403 : vector<8x64xi1>, vector<8x64xf32>
    %444 = vector.extract_strided_slice %442 {offsets = [0, 0], sizes = [8, 32], strides = [1, 1]} : vector<8x64xf32> to vector<8x32xf32>
    %c2_174 = arith.constant 2 : index
    %c0_175 = arith.constant 0 : index
    %c0_176 = arith.constant 0 : index
    %445 = vector.load %arg12[%c2_174, %c0_175, %c0_176] : memref<8x8x64xf32, #tpu.memory_space<vmem>>, vector<1x8x32xf32>
    %446 = vector.shape_cast %445 : vector<1x8x32xf32> to vector<8x32xf32>
    %447 = vector.shape_cast %444 : vector<8x32xf32> to vector<1x8x32xf32>
    tpu.vector_store %arg12[%c2_174, %c0_175, %c0_176], %447 {strides = array<i32>} : memref<8x8x64xf32, #tpu.memory_space<vmem>>, vector<1x8x32xf32>,
    %448 = vector.extract_strided_slice %442 {offsets = [0, 32], sizes = [8, 32], strides = [1, 1]} : vector<8x64xf32> to vector<8x32xf32>
    %c5_177 = arith.constant 5 : index
    %c0_178 = arith.constant 0 : index
    %c32_179 = arith.constant 32 : index
    %449 = vector.load %arg12[%c5_177, %c0_178, %c32_179] : memref<8x8x64xf32, #tpu.memory_space<vmem>>, vector<1x8x32xf32>
    %450 = vector.shape_cast %449 : vector<1x8x32xf32> to vector<8x32xf32>
    %451 = vector.shape_cast %448 : vector<8x32xf32> to vector<1x8x32xf32>
    tpu.vector_store %arg12[%c5_177, %c0_178, %c32_179], %451 {strides = array<i32>} : memref<8x8x64xf32, #tpu.memory_space<vmem>>, vector<1x8x32xf32>,
    %c3_180 = arith.constant 3 : index
    %c0_181 = arith.constant 0 : index
    %c0_182 = arith.constant 0 : index
    %452 = vector.load %arg11[%c3_180, %c0_181, %c0_182] : memref<8x8x64xf32, #tpu.memory_space<vmem>>, vector<1x8x64xf32>
    %453 = vector.shape_cast %452 : vector<1x8x64xf32> to vector<8x64xf32>
    %c4_183 = arith.constant 4 : index
    %c0_184 = arith.constant 0 : index
    %c0_185 = arith.constant 0 : index
    %454 = vector.load %arg11[%c4_183, %c0_184, %c0_185] : memref<8x8x64xf32, #tpu.memory_space<vmem>>, vector<1x8x64xf32>
    %455 = vector.shape_cast %454 : vector<1x8x64xf32> to vector<8x64xf32>
    %456 = tpu.concatenate %442, %453, %455 in 1 : vector<8x64xf32>, vector<8x64xf32>, vector<8x64xf32> -> vector<8x192xf32>
    %457 = arith.truncf %456 : vector<8x192xf32> to vector<8x192xbf16>
    %cst_186 = arith.constant dense<0.000000e+00> : vector<8x256xf32>
    %458 = tpu.matmul %457, %326, %cst_186 {dimension_numbers = #tpu.dot_dimension_numbers<[1], [0], [0], [1], [0, 0, 1, 1], [], []>} : vector<8x192xbf16>, vector<192x256xbf16>, vector<8x256xf32> -> vector<8x256xf32>
    %459 = arith.addf %458, %329 : vector<8x256xf32>
    %460 = vector.extract_strided_slice %459 {offsets = [0, 0], sizes = [8, 192], strides = [1, 1]} : vector<8x256xf32> to vector<8x192xf32>
    %461 = arith.negf %460 : vector<8x192xf32>
    %462 = math.exp %461 : vector<8x192xf32>
    %cst_187 = arith.constant 1.000000e+00 : f32
    %463 = vector.broadcast %cst_187 : f32 to vector<8x192xf32>
    %464 = arith.addf %463, %462 : vector<8x192xf32>
    %465 = arith.divf %463, %464 : vector<8x192xf32>
    %466 = vector.extract_strided_slice %459 {offsets = [0, 192], sizes = [8, 64], strides = [1, 1]} : vector<8x256xf32> to vector<8x64xf32>
    %467 = math.tanh %466 : vector<8x64xf32>
    %468 = vector.extract_strided_slice %465 {offsets = [0, 0], sizes = [8, 64], strides = [1, 1]} : vector<8x192xf32> to vector<8x64xf32>
    %469 = vector.extract_strided_slice %465 {offsets = [0, 64], sizes = [8, 64], strides = [1, 1]} : vector<8x192xf32> to vector<8x64xf32>
    %470 = vector.extract_strided_slice %465 {offsets = [0, 128], sizes = [8, 64], strides = [1, 1]} : vector<8x192xf32> to vector<8x64xf32>
    %471 = arith.mulf %469, %443 : vector<8x64xf32>
    %472 = arith.mulf %468, %467 : vector<8x64xf32>
    %473 = arith.addf %471, %472 : vector<8x64xf32>
    %474 = math.tanh %473 : vector<8x64xf32>
    %475 = arith.mulf %470, %474 : vector<8x64xf32>
    %cst_188 = arith.constant 3.000000e+00 : f32
    %476 = vector.broadcast %cst_188 : f32 to vector<1x32xf32>
    %cst_189 = arith.constant 4.000000e+00 : f32
    %477 = vector.broadcast %cst_189 : f32 to vector<1x32xf32>
    %478 = tpu.concatenate %476, %477 in 1 : vector<1x32xf32>, vector<1x32xf32> -> vector<1x64xf32>
    %479 = vector.broadcast %0 : vector<8x1xf32> to vector<8x64xf32>
    %480 = vector.broadcast %478 : vector<1x64xf32> to vector<8x64xf32>
    %481 = arith.cmpf ogt, %479, %480 : vector<8x64xf32>
    %482 = arith.select %481, %475, %442 : vector<8x64xi1>, vector<8x64xf32>
    %483 = arith.select %481, %473, %443 : vector<8x64xi1>, vector<8x64xf32>
    %484 = vector.extract_strided_slice %482 {offsets = [0, 0], sizes = [8, 32], strides = [1, 1]} : vector<8x64xf32> to vector<8x32xf32>
    %c3_190 = arith.constant 3 : index
    %c0_191 = arith.constant 0 : index
    %c0_192 = arith.constant 0 : index
    %485 = vector.load %arg12[%c3_190, %c0_191, %c0_192] : memref<8x8x64xf32, #tpu.memory_space<vmem>>, vector<1x8x32xf32>
    %486 = vector.shape_cast %485 : vector<1x8x32xf32> to vector<8x32xf32>
    %487 = vector.shape_cast %484 : vector<8x32xf32> to vector<1x8x32xf32>
    tpu.vector_store %arg12[%c3_190, %c0_191, %c0_192], %487 {strides = array<i32>} : memref<8x8x64xf32, #tpu.memory_space<vmem>>, vector<1x8x32xf32>,
    %488 = vector.extract_strided_slice %482 {offsets = [0, 32], sizes = [8, 32], strides = [1, 1]} : vector<8x64xf32> to vector<8x32xf32>
    %c4_193 = arith.constant 4 : index
    %c0_194 = arith.constant 0 : index
    %c32_195 = arith.constant 32 : index
    %489 = vector.load %arg12[%c4_193, %c0_194, %c32_195] : memref<8x8x64xf32, #tpu.memory_space<vmem>>, vector<1x8x32xf32>
    %490 = vector.shape_cast %489 : vector<1x8x32xf32> to vector<8x32xf32>
    %491 = vector.shape_cast %488 : vector<8x32xf32> to vector<1x8x32xf32>
    tpu.vector_store %arg12[%c4_193, %c0_194, %c32_195], %491 {strides = array<i32>} : memref<8x8x64xf32, #tpu.memory_space<vmem>>, vector<1x8x32xf32>,
    %c4_196 = arith.constant 4 : index
    %c0_197 = arith.constant 0 : index
    %c0_198 = arith.constant 0 : index
    %492 = vector.load %arg11[%c4_196, %c0_197, %c0_198] : memref<8x8x64xf32, #tpu.memory_space<vmem>>, vector<1x8x64xf32>
    %493 = vector.shape_cast %492 : vector<1x8x64xf32> to vector<8x64xf32>
    %c3_199 = arith.constant 3 : index
    %c0_200 = arith.constant 0 : index
    %c0_201 = arith.constant 0 : index
    %494 = vector.load %arg11[%c3_199, %c0_200, %c0_201] : memref<8x8x64xf32, #tpu.memory_space<vmem>>, vector<1x8x64xf32>
    %495 = vector.shape_cast %494 : vector<1x8x64xf32> to vector<8x64xf32>
    %496 = tpu.concatenate %482, %493, %495 in 1 : vector<8x64xf32>, vector<8x64xf32>, vector<8x64xf32> -> vector<8x192xf32>
    %497 = arith.truncf %496 : vector<8x192xf32> to vector<8x192xbf16>
    %cst_202 = arith.constant dense<0.000000e+00> : vector<8x256xf32>
    %498 = tpu.matmul %497, %326, %cst_202 {dimension_numbers = #tpu.dot_dimension_numbers<[1], [0], [0], [1], [0, 0, 1, 1], [], []>} : vector<8x192xbf16>, vector<192x256xbf16>, vector<8x256xf32> -> vector<8x256xf32>
    %499 = arith.addf %498, %329 : vector<8x256xf32>
    %500 = vector.extract_strided_slice %499 {offsets = [0, 0], sizes = [8, 192], strides = [1, 1]} : vector<8x256xf32> to vector<8x192xf32>
    %501 = arith.negf %500 : vector<8x192xf32>
    %502 = math.exp %501 : vector<8x192xf32>
    %cst_203 = arith.constant 1.000000e+00 : f32
    %503 = vector.broadcast %cst_203 : f32 to vector<8x192xf32>
    %504 = arith.addf %503, %502 : vector<8x192xf32>
    %505 = arith.divf %503, %504 : vector<8x192xf32>
    %506 = vector.extract_strided_slice %499 {offsets = [0, 192], sizes = [8, 64], strides = [1, 1]} : vector<8x256xf32> to vector<8x64xf32>
    %507 = math.tanh %506 : vector<8x64xf32>
    %508 = vector.extract_strided_slice %505 {offsets = [0, 0], sizes = [8, 64], strides = [1, 1]} : vector<8x192xf32> to vector<8x64xf32>
    %509 = vector.extract_strided_slice %505 {offsets = [0, 64], sizes = [8, 64], strides = [1, 1]} : vector<8x192xf32> to vector<8x64xf32>
    %510 = vector.extract_strided_slice %505 {offsets = [0, 128], sizes = [8, 64], strides = [1, 1]} : vector<8x192xf32> to vector<8x64xf32>
    %511 = arith.mulf %509, %483 : vector<8x64xf32>
    %512 = arith.mulf %508, %507 : vector<8x64xf32>
    %513 = arith.addf %511, %512 : vector<8x64xf32>
    %514 = math.tanh %513 : vector<8x64xf32>
    %515 = arith.mulf %510, %514 : vector<8x64xf32>
    %cst_204 = arith.constant 4.000000e+00 : f32
    %516 = vector.broadcast %cst_204 : f32 to vector<1x32xf32>
    %cst_205 = arith.constant 3.000000e+00 : f32
    %517 = vector.broadcast %cst_205 : f32 to vector<1x32xf32>
    %518 = tpu.concatenate %516, %517 in 1 : vector<1x32xf32>, vector<1x32xf32> -> vector<1x64xf32>
    %519 = vector.broadcast %0 : vector<8x1xf32> to vector<8x64xf32>
    %520 = vector.broadcast %518 : vector<1x64xf32> to vector<8x64xf32>
    %521 = arith.cmpf ogt, %519, %520 : vector<8x64xf32>
    %522 = arith.select %521, %515, %482 : vector<8x64xi1>, vector<8x64xf32>
    %523 = arith.select %521, %513, %483 : vector<8x64xi1>, vector<8x64xf32>
    %524 = vector.extract_strided_slice %522 {offsets = [0, 0], sizes = [8, 32], strides = [1, 1]} : vector<8x64xf32> to vector<8x32xf32>
    %c4_206 = arith.constant 4 : index
    %c0_207 = arith.constant 0 : index
    %c0_208 = arith.constant 0 : index
    %525 = vector.load %arg12[%c4_206, %c0_207, %c0_208] : memref<8x8x64xf32, #tpu.memory_space<vmem>>, vector<1x8x32xf32>
    %526 = vector.shape_cast %525 : vector<1x8x32xf32> to vector<8x32xf32>
    %527 = vector.shape_cast %524 : vector<8x32xf32> to vector<1x8x32xf32>
    tpu.vector_store %arg12[%c4_206, %c0_207, %c0_208], %527 {strides = array<i32>} : memref<8x8x64xf32, #tpu.memory_space<vmem>>, vector<1x8x32xf32>,
    %528 = vector.extract_strided_slice %522 {offsets = [0, 32], sizes = [8, 32], strides = [1, 1]} : vector<8x64xf32> to vector<8x32xf32>
    %c3_209 = arith.constant 3 : index
    %c0_210 = arith.constant 0 : index
    %c32_211 = arith.constant 32 : index
    %529 = vector.load %arg12[%c3_209, %c0_210, %c32_211] : memref<8x8x64xf32, #tpu.memory_space<vmem>>, vector<1x8x32xf32>
    %530 = vector.shape_cast %529 : vector<1x8x32xf32> to vector<8x32xf32>
    %531 = vector.shape_cast %528 : vector<8x32xf32> to vector<1x8x32xf32>
    tpu.vector_store %arg12[%c3_209, %c0_210, %c32_211], %531 {strides = array<i32>} : memref<8x8x64xf32, #tpu.memory_space<vmem>>, vector<1x8x32xf32>,
    %c5_212 = arith.constant 5 : index
    %c0_213 = arith.constant 0 : index
    %c0_214 = arith.constant 0 : index
    %532 = vector.load %arg11[%c5_212, %c0_213, %c0_214] : memref<8x8x64xf32, #tpu.memory_space<vmem>>, vector<1x8x64xf32>
    %533 = vector.shape_cast %532 : vector<1x8x64xf32> to vector<8x64xf32>
    %c2_215 = arith.constant 2 : index
    %c0_216 = arith.constant 0 : index
    %c0_217 = arith.constant 0 : index
    %534 = vector.load %arg11[%c2_215, %c0_216, %c0_217] : memref<8x8x64xf32, #tpu.memory_space<vmem>>, vector<1x8x64xf32>
    %535 = vector.shape_cast %534 : vector<1x8x64xf32> to vector<8x64xf32>
    %536 = tpu.concatenate %522, %533, %535 in 1 : vector<8x64xf32>, vector<8x64xf32>, vector<8x64xf32> -> vector<8x192xf32>
    %537 = arith.truncf %536 : vector<8x192xf32> to vector<8x192xbf16>
    %cst_218 = arith.constant dense<0.000000e+00> : vector<8x256xf32>
    %538 = tpu.matmul %537, %326, %cst_218 {dimension_numbers = #tpu.dot_dimension_numbers<[1], [0], [0], [1], [0, 0, 1, 1], [], []>} : vector<8x192xbf16>, vector<192x256xbf16>, vector<8x256xf32> -> vector<8x256xf32>
    %539 = arith.addf %538, %329 : vector<8x256xf32>
    %540 = vector.extract_strided_slice %539 {offsets = [0, 0], sizes = [8, 192], strides = [1, 1]} : vector<8x256xf32> to vector<8x192xf32>
    %541 = arith.negf %540 : vector<8x192xf32>
    %542 = math.exp %541 : vector<8x192xf32>
    %cst_219 = arith.constant 1.000000e+00 : f32
    %543 = vector.broadcast %cst_219 : f32 to vector<8x192xf32>
    %544 = arith.addf %543, %542 : vector<8x192xf32>
    %545 = arith.divf %543, %544 : vector<8x192xf32>
    %546 = vector.extract_strided_slice %539 {offsets = [0, 192], sizes = [8, 64], strides = [1, 1]} : vector<8x256xf32> to vector<8x64xf32>
    %547 = math.tanh %546 : vector<8x64xf32>
    %548 = vector.extract_strided_slice %545 {offsets = [0, 0], sizes = [8, 64], strides = [1, 1]} : vector<8x192xf32> to vector<8x64xf32>
    %549 = vector.extract_strided_slice %545 {offsets = [0, 64], sizes = [8, 64], strides = [1, 1]} : vector<8x192xf32> to vector<8x64xf32>
    %550 = vector.extract_strided_slice %545 {offsets = [0, 128], sizes = [8, 64], strides = [1, 1]} : vector<8x192xf32> to vector<8x64xf32>
    %551 = arith.mulf %549, %523 : vector<8x64xf32>
    %552 = arith.mulf %548, %547 : vector<8x64xf32>
    %553 = arith.addf %551, %552 : vector<8x64xf32>
    %554 = math.tanh %553 : vector<8x64xf32>
    %555 = arith.mulf %550, %554 : vector<8x64xf32>
    %cst_220 = arith.constant 5.000000e+00 : f32
    %556 = vector.broadcast %cst_220 : f32 to vector<1x32xf32>
    %cst_221 = arith.constant 2.000000e+00 : f32
    %557 = vector.broadcast %cst_221 : f32 to vector<1x32xf32>
    %558 = tpu.concatenate %556, %557 in 1 : vector<1x32xf32>, vector<1x32xf32> -> vector<1x64xf32>
    %559 = vector.broadcast %0 : vector<8x1xf32> to vector<8x64xf32>
    %560 = vector.broadcast %558 : vector<1x64xf32> to vector<8x64xf32>
    %561 = arith.cmpf ogt, %559, %560 : vector<8x64xf32>
    %562 = arith.select %561, %555, %522 : vector<8x64xi1>, vector<8x64xf32>
    %563 = arith.select %561, %553, %523 : vector<8x64xi1>, vector<8x64xf32>
    %564 = vector.extract_strided_slice %562 {offsets = [0, 0], sizes = [8, 32], strides = [1, 1]} : vector<8x64xf32> to vector<8x32xf32>
    %c5_222 = arith.constant 5 : index
    %c0_223 = arith.constant 0 : index
    %c0_224 = arith.constant 0 : index
    %565 = vector.load %arg12[%c5_222, %c0_223, %c0_224] : memref<8x8x64xf32, #tpu.memory_space<vmem>>, vector<1x8x32xf32>
    %566 = vector.shape_cast %565 : vector<1x8x32xf32> to vector<8x32xf32>
    %567 = vector.shape_cast %564 : vector<8x32xf32> to vector<1x8x32xf32>
    tpu.vector_store %arg12[%c5_222, %c0_223, %c0_224], %567 {strides = array<i32>} : memref<8x8x64xf32, #tpu.memory_space<vmem>>, vector<1x8x32xf32>,
    %568 = vector.extract_strided_slice %562 {offsets = [0, 32], sizes = [8, 32], strides = [1, 1]} : vector<8x64xf32> to vector<8x32xf32>
    %c2_225 = arith.constant 2 : index
    %c0_226 = arith.constant 0 : index
    %c32_227 = arith.constant 32 : index
    %569 = vector.load %arg12[%c2_225, %c0_226, %c32_227] : memref<8x8x64xf32, #tpu.memory_space<vmem>>, vector<1x8x32xf32>
    %570 = vector.shape_cast %569 : vector<1x8x32xf32> to vector<8x32xf32>
    %571 = vector.shape_cast %568 : vector<8x32xf32> to vector<1x8x32xf32>
    tpu.vector_store %arg12[%c2_225, %c0_226, %c32_227], %571 {strides = array<i32>} : memref<8x8x64xf32, #tpu.memory_space<vmem>>, vector<1x8x32xf32>,
    %c6_228 = arith.constant 6 : index
    %c0_229 = arith.constant 0 : index
    %c0_230 = arith.constant 0 : index
    %572 = vector.load %arg11[%c6_228, %c0_229, %c0_230] : memref<8x8x64xf32, #tpu.memory_space<vmem>>, vector<1x8x64xf32>
    %573 = vector.shape_cast %572 : vector<1x8x64xf32> to vector<8x64xf32>
    %c1_231 = arith.constant 1 : index
    %c0_232 = arith.constant 0 : index
    %c0_233 = arith.constant 0 : index
    %574 = vector.load %arg11[%c1_231, %c0_232, %c0_233] : memref<8x8x64xf32, #tpu.memory_space<vmem>>, vector<1x8x64xf32>
    %575 = vector.shape_cast %574 : vector<1x8x64xf32> to vector<8x64xf32>
    %576 = tpu.concatenate %562, %573, %575 in 1 : vector<8x64xf32>, vector<8x64xf32>, vector<8x64xf32> -> vector<8x192xf32>
    %577 = arith.truncf %576 : vector<8x192xf32> to vector<8x192xbf16>
    %cst_234 = arith.constant dense<0.000000e+00> : vector<8x256xf32>
    %578 = tpu.matmul %577, %326, %cst_234 {dimension_numbers = #tpu.dot_dimension_numbers<[1], [0], [0], [1], [0, 0, 1, 1], [], []>} : vector<8x192xbf16>, vector<192x256xbf16>, vector<8x256xf32> -> vector<8x256xf32>
    %579 = arith.addf %578, %329 : vector<8x256xf32>
    %580 = vector.extract_strided_slice %579 {offsets = [0, 0], sizes = [8, 192], strides = [1, 1]} : vector<8x256xf32> to vector<8x192xf32>
    %581 = arith.negf %580 : vector<8x192xf32>
    %582 = math.exp %581 : vector<8x192xf32>
    %cst_235 = arith.constant 1.000000e+00 : f32
    %583 = vector.broadcast %cst_235 : f32 to vector<8x192xf32>
    %584 = arith.addf %583, %582 : vector<8x192xf32>
    %585 = arith.divf %583, %584 : vector<8x192xf32>
    %586 = vector.extract_strided_slice %579 {offsets = [0, 192], sizes = [8, 64], strides = [1, 1]} : vector<8x256xf32> to vector<8x64xf32>
    %587 = math.tanh %586 : vector<8x64xf32>
    %588 = vector.extract_strided_slice %585 {offsets = [0, 0], sizes = [8, 64], strides = [1, 1]} : vector<8x192xf32> to vector<8x64xf32>
    %589 = vector.extract_strided_slice %585 {offsets = [0, 64], sizes = [8, 64], strides = [1, 1]} : vector<8x192xf32> to vector<8x64xf32>
    %590 = vector.extract_strided_slice %585 {offsets = [0, 128], sizes = [8, 64], strides = [1, 1]} : vector<8x192xf32> to vector<8x64xf32>
    %591 = arith.mulf %589, %563 : vector<8x64xf32>
    %592 = arith.mulf %588, %587 : vector<8x64xf32>
    %593 = arith.addf %591, %592 : vector<8x64xf32>
    %594 = math.tanh %593 : vector<8x64xf32>
    %595 = arith.mulf %590, %594 : vector<8x64xf32>
    %cst_236 = arith.constant 6.000000e+00 : f32
    %596 = vector.broadcast %cst_236 : f32 to vector<1x32xf32>
    %cst_237 = arith.constant 1.000000e+00 : f32
    %597 = vector.broadcast %cst_237 : f32 to vector<1x32xf32>
    %598 = tpu.concatenate %596, %597 in 1 : vector<1x32xf32>, vector<1x32xf32> -> vector<1x64xf32>
    %599 = vector.broadcast %0 : vector<8x1xf32> to vector<8x64xf32>
    %600 = vector.broadcast %598 : vector<1x64xf32> to vector<8x64xf32>
    %601 = arith.cmpf ogt, %599, %600 : vector<8x64xf32>
    %602 = arith.select %601, %595, %562 : vector<8x64xi1>, vector<8x64xf32>
    %603 = arith.select %601, %593, %563 : vector<8x64xi1>, vector<8x64xf32>
    %604 = vector.extract_strided_slice %602 {offsets = [0, 0], sizes = [8, 32], strides = [1, 1]} : vector<8x64xf32> to vector<8x32xf32>
    %c6_238 = arith.constant 6 : index
    %c0_239 = arith.constant 0 : index
    %c0_240 = arith.constant 0 : index
    %605 = vector.load %arg12[%c6_238, %c0_239, %c0_240] : memref<8x8x64xf32, #tpu.memory_space<vmem>>, vector<1x8x32xf32>
    %606 = vector.shape_cast %605 : vector<1x8x32xf32> to vector<8x32xf32>
    %607 = vector.shape_cast %604 : vector<8x32xf32> to vector<1x8x32xf32>
    tpu.vector_store %arg12[%c6_238, %c0_239, %c0_240], %607 {strides = array<i32>} : memref<8x8x64xf32, #tpu.memory_space<vmem>>, vector<1x8x32xf32>,
    %608 = vector.extract_strided_slice %602 {offsets = [0, 32], sizes = [8, 32], strides = [1, 1]} : vector<8x64xf32> to vector<8x32xf32>
    %c1_241 = arith.constant 1 : index
    %c0_242 = arith.constant 0 : index
    %c32_243 = arith.constant 32 : index
    %609 = vector.load %arg12[%c1_241, %c0_242, %c32_243] : memref<8x8x64xf32, #tpu.memory_space<vmem>>, vector<1x8x32xf32>
    %610 = vector.shape_cast %609 : vector<1x8x32xf32> to vector<8x32xf32>
    %611 = vector.shape_cast %608 : vector<8x32xf32> to vector<1x8x32xf32>
    tpu.vector_store %arg12[%c1_241, %c0_242, %c32_243], %611 {strides = array<i32>} : memref<8x8x64xf32, #tpu.memory_space<vmem>>, vector<1x8x32xf32>,
    %c7_244 = arith.constant 7 : index
    %c0_245 = arith.constant 0 : index
    %c0_246 = arith.constant 0 : index
    %612 = vector.load %arg11[%c7_244, %c0_245, %c0_246] : memref<8x8x64xf32, #tpu.memory_space<vmem>>, vector<1x8x64xf32>
    %613 = vector.shape_cast %612 : vector<1x8x64xf32> to vector<8x64xf32>
    %c0_247 = arith.constant 0 : index
    %c0_248 = arith.constant 0 : index
    %c0_249 = arith.constant 0 : index
    %614 = vector.load %arg11[%c0_247, %c0_248, %c0_249] : memref<8x8x64xf32, #tpu.memory_space<vmem>>, vector<1x8x64xf32>
    %615 = vector.shape_cast %614 : vector<1x8x64xf32> to vector<8x64xf32>
    %616 = tpu.concatenate %602, %613, %615 in 1 : vector<8x64xf32>, vector<8x64xf32>, vector<8x64xf32> -> vector<8x192xf32>
    %617 = arith.truncf %616 : vector<8x192xf32> to vector<8x192xbf16>
    %cst_250 = arith.constant dense<0.000000e+00> : vector<8x256xf32>
    %618 = tpu.matmul %617, %326, %cst_250 {dimension_numbers = #tpu.dot_dimension_numbers<[1], [0], [0], [1], [0, 0, 1, 1], [], []>} : vector<8x192xbf16>, vector<192x256xbf16>, vector<8x256xf32> -> vector<8x256xf32>
    %619 = arith.addf %618, %329 : vector<8x256xf32>
    %620 = vector.extract_strided_slice %619 {offsets = [0, 0], sizes = [8, 192], strides = [1, 1]} : vector<8x256xf32> to vector<8x192xf32>
    %621 = arith.negf %620 : vector<8x192xf32>
    %622 = math.exp %621 : vector<8x192xf32>
    %cst_251 = arith.constant 1.000000e+00 : f32
    %623 = vector.broadcast %cst_251 : f32 to vector<8x192xf32>
    %624 = arith.addf %623, %622 : vector<8x192xf32>
    %625 = arith.divf %623, %624 : vector<8x192xf32>
    %626 = vector.extract_strided_slice %619 {offsets = [0, 192], sizes = [8, 64], strides = [1, 1]} : vector<8x256xf32> to vector<8x64xf32>
    %627 = math.tanh %626 : vector<8x64xf32>
    %628 = vector.extract_strided_slice %625 {offsets = [0, 0], sizes = [8, 64], strides = [1, 1]} : vector<8x192xf32> to vector<8x64xf32>
    %629 = vector.extract_strided_slice %625 {offsets = [0, 64], sizes = [8, 64], strides = [1, 1]} : vector<8x192xf32> to vector<8x64xf32>
    %630 = vector.extract_strided_slice %625 {offsets = [0, 128], sizes = [8, 64], strides = [1, 1]} : vector<8x192xf32> to vector<8x64xf32>
    %631 = arith.mulf %629, %603 : vector<8x64xf32>
    %632 = arith.mulf %628, %627 : vector<8x64xf32>
    %633 = arith.addf %631, %632 : vector<8x64xf32>
    %634 = math.tanh %633 : vector<8x64xf32>
    %635 = arith.mulf %630, %634 : vector<8x64xf32>
    %cst_252 = arith.constant 7.000000e+00 : f32
    %636 = vector.broadcast %cst_252 : f32 to vector<1x32xf32>
    %cst_253 = arith.constant 0.000000e+00 : f32
    %637 = vector.broadcast %cst_253 : f32 to vector<1x32xf32>
    %638 = tpu.concatenate %636, %637 in 1 : vector<1x32xf32>, vector<1x32xf32> -> vector<1x64xf32>
    %639 = vector.broadcast %0 : vector<8x1xf32> to vector<8x64xf32>
    %640 = vector.broadcast %638 : vector<1x64xf32> to vector<8x64xf32>
    %641 = arith.cmpf ogt, %639, %640 : vector<8x64xf32>
    %642 = arith.select %641, %635, %602 : vector<8x64xi1>, vector<8x64xf32>
    %643 = vector.extract_strided_slice %642 {offsets = [0, 0], sizes = [8, 32], strides = [1, 1]} : vector<8x64xf32> to vector<8x32xf32>
    %c7_254 = arith.constant 7 : index
    %c0_255 = arith.constant 0 : index
    %c0_256 = arith.constant 0 : index
    %644 = vector.load %arg12[%c7_254, %c0_255, %c0_256] : memref<8x8x64xf32, #tpu.memory_space<vmem>>, vector<1x8x32xf32>
    %645 = vector.shape_cast %644 : vector<1x8x32xf32> to vector<8x32xf32>
    %646 = vector.shape_cast %643 : vector<8x32xf32> to vector<1x8x32xf32>
    tpu.vector_store %arg12[%c7_254, %c0_255, %c0_256], %646 {strides = array<i32>} : memref<8x8x64xf32, #tpu.memory_space<vmem>>, vector<1x8x32xf32>,
    %647 = vector.extract_strided_slice %642 {offsets = [0, 32], sizes = [8, 32], strides = [1, 1]} : vector<8x64xf32> to vector<8x32xf32>
    %c0_257 = arith.constant 0 : index
    %c0_258 = arith.constant 0 : index
    %c32_259 = arith.constant 32 : index
    %648 = vector.load %arg12[%c0_257, %c0_258, %c32_259] : memref<8x8x64xf32, #tpu.memory_space<vmem>>, vector<1x8x32xf32>
    %649 = vector.shape_cast %648 : vector<1x8x32xf32> to vector<8x32xf32>
    %650 = vector.shape_cast %647 : vector<8x32xf32> to vector<1x8x32xf32>
    tpu.vector_store %arg12[%c0_257, %c0_258, %c32_259], %650 {strides = array<i32>} : memref<8x8x64xf32, #tpu.memory_space<vmem>>, vector<1x8x32xf32>,
    %c0_260 = arith.constant 0 : index
    %c0_261 = arith.constant 0 : index
    %651 = vector.load %arg6[%c0_260, %c0_261] : memref<192x256xbf16, #tpu.memory_space<vmem>>, vector<192x256xbf16>
    %c0_262 = arith.constant 0 : index
    %c0_263 = arith.constant 0 : index
    %652 = vector.load %arg7[%c0_262, %c0_263] : memref<1x256xf32, #tpu.memory_space<vmem>>, vector<1x256xf32>
    %653 = vector.shape_cast %652 : vector<1x256xf32> to vector<1x256xf32>
    %654 = vector.broadcast %653 : vector<1x256xf32> to vector<8x256xf32>
    %cst_264 = arith.constant 0.000000e+00 : f32
    %655 = vector.broadcast %cst_264 : f32 to vector<8x64xf32>
    %cst_265 = arith.constant 0.000000e+00 : f32
    %656 = vector.broadcast %cst_265 : f32 to vector<8x64xf32>
    %c0_266 = arith.constant 0 : index
    %c0_267 = arith.constant 0 : index
    %c0_268 = arith.constant 0 : index
    %657 = vector.load %arg12[%c0_266, %c0_267, %c0_268] : memref<8x8x64xf32, #tpu.memory_space<vmem>>, vector<1x8x64xf32>
    %658 = vector.shape_cast %657 : vector<1x8x64xf32> to vector<8x64xf32>
    %c7_269 = arith.constant 7 : index
    %c0_270 = arith.constant 0 : index
    %c0_271 = arith.constant 0 : index
    %659 = vector.load %arg12[%c7_269, %c0_270, %c0_271] : memref<8x8x64xf32, #tpu.memory_space<vmem>>, vector<1x8x64xf32>
    %660 = vector.shape_cast %659 : vector<1x8x64xf32> to vector<8x64xf32>
    %661 = tpu.concatenate %655, %658, %660 in 1 : vector<8x64xf32>, vector<8x64xf32>, vector<8x64xf32> -> vector<8x192xf32>
    %662 = arith.truncf %661 : vector<8x192xf32> to vector<8x192xbf16>
    %cst_272 = arith.constant dense<0.000000e+00> : vector<8x256xf32>
    %663 = tpu.matmul %662, %651, %cst_272 {dimension_numbers = #tpu.dot_dimension_numbers<[1], [0], [0], [1], [0, 0, 1, 1], [], []>} : vector<8x192xbf16>, vector<192x256xbf16>, vector<8x256xf32> -> vector<8x256xf32>
    %664 = arith.addf %663, %654 : vector<8x256xf32>
    %665 = vector.extract_strided_slice %664 {offsets = [0, 0], sizes = [8, 192], strides = [1, 1]} : vector<8x256xf32> to vector<8x192xf32>
    %666 = arith.negf %665 : vector<8x192xf32>
    %667 = math.exp %666 : vector<8x192xf32>
    %cst_273 = arith.constant 1.000000e+00 : f32
    %668 = vector.broadcast %cst_273 : f32 to vector<8x192xf32>
    %669 = arith.addf %668, %667 : vector<8x192xf32>
    %670 = arith.divf %668, %669 : vector<8x192xf32>
    %671 = vector.extract_strided_slice %664 {offsets = [0, 192], sizes = [8, 64], strides = [1, 1]} : vector<8x256xf32> to vector<8x64xf32>
    %672 = math.tanh %671 : vector<8x64xf32>
    %673 = vector.extract_strided_slice %670 {offsets = [0, 0], sizes = [8, 64], strides = [1, 1]} : vector<8x192xf32> to vector<8x64xf32>
    %674 = vector.extract_strided_slice %670 {offsets = [0, 64], sizes = [8, 64], strides = [1, 1]} : vector<8x192xf32> to vector<8x64xf32>
    %675 = vector.extract_strided_slice %670 {offsets = [0, 128], sizes = [8, 64], strides = [1, 1]} : vector<8x192xf32> to vector<8x64xf32>
    %676 = arith.mulf %674, %656 : vector<8x64xf32>
    %677 = arith.mulf %673, %672 : vector<8x64xf32>
    %678 = arith.addf %676, %677 : vector<8x64xf32>
    %679 = math.tanh %678 : vector<8x64xf32>
    %680 = arith.mulf %675, %679 : vector<8x64xf32>
    %cst_274 = arith.constant 0.000000e+00 : f32
    %681 = vector.broadcast %cst_274 : f32 to vector<1x32xf32>
    %cst_275 = arith.constant 7.000000e+00 : f32
    %682 = vector.broadcast %cst_275 : f32 to vector<1x32xf32>
    %683 = tpu.concatenate %681, %682 in 1 : vector<1x32xf32>, vector<1x32xf32> -> vector<1x64xf32>
    %684 = vector.broadcast %0 : vector<8x1xf32> to vector<8x64xf32>
    %685 = vector.broadcast %683 : vector<1x64xf32> to vector<8x64xf32>
    %686 = arith.cmpf ogt, %684, %685 : vector<8x64xf32>
    %687 = arith.select %686, %680, %655 : vector<8x64xi1>, vector<8x64xf32>
    %688 = arith.select %686, %678, %656 : vector<8x64xi1>, vector<8x64xf32>
    %c1_276 = arith.constant 1 : index
    %c0_277 = arith.constant 0 : index
    %c0_278 = arith.constant 0 : index
    %689 = vector.load %arg12[%c1_276, %c0_277, %c0_278] : memref<8x8x64xf32, #tpu.memory_space<vmem>>, vector<1x8x64xf32>
    %690 = vector.shape_cast %689 : vector<1x8x64xf32> to vector<8x64xf32>
    %c6_279 = arith.constant 6 : index
    %c0_280 = arith.constant 0 : index
    %c0_281 = arith.constant 0 : index
    %691 = vector.load %arg12[%c6_279, %c0_280, %c0_281] : memref<8x8x64xf32, #tpu.memory_space<vmem>>, vector<1x8x64xf32>
    %692 = vector.shape_cast %691 : vector<1x8x64xf32> to vector<8x64xf32>
    %693 = tpu.concatenate %687, %690, %692 in 1 : vector<8x64xf32>, vector<8x64xf32>, vector<8x64xf32> -> vector<8x192xf32>
    %694 = arith.truncf %693 : vector<8x192xf32> to vector<8x192xbf16>
    %cst_282 = arith.constant dense<0.000000e+00> : vector<8x256xf32>
    %695 = tpu.matmul %694, %651, %cst_282 {dimension_numbers = #tpu.dot_dimension_numbers<[1], [0], [0], [1], [0, 0, 1, 1], [], []>} : vector<8x192xbf16>, vector<192x256xbf16>, vector<8x256xf32> -> vector<8x256xf32>
    %696 = arith.addf %695, %654 : vector<8x256xf32>
    %697 = vector.extract_strided_slice %696 {offsets = [0, 0], sizes = [8, 192], strides = [1, 1]} : vector<8x256xf32> to vector<8x192xf32>
    %698 = arith.negf %697 : vector<8x192xf32>
    %699 = math.exp %698 : vector<8x192xf32>
    %cst_283 = arith.constant 1.000000e+00 : f32
    %700 = vector.broadcast %cst_283 : f32 to vector<8x192xf32>
    %701 = arith.addf %700, %699 : vector<8x192xf32>
    %702 = arith.divf %700, %701 : vector<8x192xf32>
    %703 = vector.extract_strided_slice %696 {offsets = [0, 192], sizes = [8, 64], strides = [1, 1]} : vector<8x256xf32> to vector<8x64xf32>
    %704 = math.tanh %703 : vector<8x64xf32>
    %705 = vector.extract_strided_slice %702 {offsets = [0, 0], sizes = [8, 64], strides = [1, 1]} : vector<8x192xf32> to vector<8x64xf32>
    %706 = vector.extract_strided_slice %702 {offsets = [0, 64], sizes = [8, 64], strides = [1, 1]} : vector<8x192xf32> to vector<8x64xf32>
    %707 = vector.extract_strided_slice %702 {offsets = [0, 128], sizes = [8, 64], strides = [1, 1]} : vector<8x192xf32> to vector<8x64xf32>
    %708 = arith.mulf %706, %688 : vector<8x64xf32>
    %709 = arith.mulf %705, %704 : vector<8x64xf32>
    %710 = arith.addf %708, %709 : vector<8x64xf32>
    %711 = math.tanh %710 : vector<8x64xf32>
    %712 = arith.mulf %707, %711 : vector<8x64xf32>
    %cst_284 = arith.constant 1.000000e+00 : f32
    %713 = vector.broadcast %cst_284 : f32 to vector<1x32xf32>
    %cst_285 = arith.constant 6.000000e+00 : f32
    %714 = vector.broadcast %cst_285 : f32 to vector<1x32xf32>
    %715 = tpu.concatenate %713, %714 in 1 : vector<1x32xf32>, vector<1x32xf32> -> vector<1x64xf32>
    %716 = vector.broadcast %0 : vector<8x1xf32> to vector<8x64xf32>
    %717 = vector.broadcast %715 : vector<1x64xf32> to vector<8x64xf32>
    %718 = arith.cmpf ogt, %716, %717 : vector<8x64xf32>
    %719 = arith.select %718, %712, %687 : vector<8x64xi1>, vector<8x64xf32>
    %720 = arith.select %718, %710, %688 : vector<8x64xi1>, vector<8x64xf32>
    %c2_286 = arith.constant 2 : index
    %c0_287 = arith.constant 0 : index
    %c0_288 = arith.constant 0 : index
    %721 = vector.load %arg12[%c2_286, %c0_287, %c0_288] : memref<8x8x64xf32, #tpu.memory_space<vmem>>, vector<1x8x64xf32>
    %722 = vector.shape_cast %721 : vector<1x8x64xf32> to vector<8x64xf32>
    %c5_289 = arith.constant 5 : index
    %c0_290 = arith.constant 0 : index
    %c0_291 = arith.constant 0 : index
    %723 = vector.load %arg12[%c5_289, %c0_290, %c0_291] : memref<8x8x64xf32, #tpu.memory_space<vmem>>, vector<1x8x64xf32>
    %724 = vector.shape_cast %723 : vector<1x8x64xf32> to vector<8x64xf32>
    %725 = tpu.concatenate %719, %722, %724 in 1 : vector<8x64xf32>, vector<8x64xf32>, vector<8x64xf32> -> vector<8x192xf32>
    %726 = arith.truncf %725 : vector<8x192xf32> to vector<8x192xbf16>
    %cst_292 = arith.constant dense<0.000000e+00> : vector<8x256xf32>
    %727 = tpu.matmul %726, %651, %cst_292 {dimension_numbers = #tpu.dot_dimension_numbers<[1], [0], [0], [1], [0, 0, 1, 1], [], []>} : vector<8x192xbf16>, vector<192x256xbf16>, vector<8x256xf32> -> vector<8x256xf32>
    %728 = arith.addf %727, %654 : vector<8x256xf32>
    %729 = vector.extract_strided_slice %728 {offsets = [0, 0], sizes = [8, 192], strides = [1, 1]} : vector<8x256xf32> to vector<8x192xf32>
    %730 = arith.negf %729 : vector<8x192xf32>
    %731 = math.exp %730 : vector<8x192xf32>
    %cst_293 = arith.constant 1.000000e+00 : f32
    %732 = vector.broadcast %cst_293 : f32 to vector<8x192xf32>
    %733 = arith.addf %732, %731 : vector<8x192xf32>
    %734 = arith.divf %732, %733 : vector<8x192xf32>
    %735 = vector.extract_strided_slice %728 {offsets = [0, 192], sizes = [8, 64], strides = [1, 1]} : vector<8x256xf32> to vector<8x64xf32>
    %736 = math.tanh %735 : vector<8x64xf32>
    %737 = vector.extract_strided_slice %734 {offsets = [0, 0], sizes = [8, 64], strides = [1, 1]} : vector<8x192xf32> to vector<8x64xf32>
    %738 = vector.extract_strided_slice %734 {offsets = [0, 64], sizes = [8, 64], strides = [1, 1]} : vector<8x192xf32> to vector<8x64xf32>
    %739 = vector.extract_strided_slice %734 {offsets = [0, 128], sizes = [8, 64], strides = [1, 1]} : vector<8x192xf32> to vector<8x64xf32>
    %740 = arith.mulf %738, %720 : vector<8x64xf32>
    %741 = arith.mulf %737, %736 : vector<8x64xf32>
    %742 = arith.addf %740, %741 : vector<8x64xf32>
    %743 = math.tanh %742 : vector<8x64xf32>
    %744 = arith.mulf %739, %743 : vector<8x64xf32>
    %cst_294 = arith.constant 2.000000e+00 : f32
    %745 = vector.broadcast %cst_294 : f32 to vector<1x32xf32>
    %cst_295 = arith.constant 5.000000e+00 : f32
    %746 = vector.broadcast %cst_295 : f32 to vector<1x32xf32>
    %747 = tpu.concatenate %745, %746 in 1 : vector<1x32xf32>, vector<1x32xf32> -> vector<1x64xf32>
    %748 = vector.broadcast %0 : vector<8x1xf32> to vector<8x64xf32>
    %749 = vector.broadcast %747 : vector<1x64xf32> to vector<8x64xf32>
    %750 = arith.cmpf ogt, %748, %749 : vector<8x64xf32>
    %751 = arith.select %750, %744, %719 : vector<8x64xi1>, vector<8x64xf32>
    %752 = arith.select %750, %742, %720 : vector<8x64xi1>, vector<8x64xf32>
    %c3_296 = arith.constant 3 : index
    %c0_297 = arith.constant 0 : index
    %c0_298 = arith.constant 0 : index
    %753 = vector.load %arg12[%c3_296, %c0_297, %c0_298] : memref<8x8x64xf32, #tpu.memory_space<vmem>>, vector<1x8x64xf32>
    %754 = vector.shape_cast %753 : vector<1x8x64xf32> to vector<8x64xf32>
    %c4_299 = arith.constant 4 : index
    %c0_300 = arith.constant 0 : index
    %c0_301 = arith.constant 0 : index
    %755 = vector.load %arg12[%c4_299, %c0_300, %c0_301] : memref<8x8x64xf32, #tpu.memory_space<vmem>>, vector<1x8x64xf32>
    %756 = vector.shape_cast %755 : vector<1x8x64xf32> to vector<8x64xf32>
    %757 = tpu.concatenate %751, %754, %756 in 1 : vector<8x64xf32>, vector<8x64xf32>, vector<8x64xf32> -> vector<8x192xf32>
    %758 = arith.truncf %757 : vector<8x192xf32> to vector<8x192xbf16>
    %cst_302 = arith.constant dense<0.000000e+00> : vector<8x256xf32>
    %759 = tpu.matmul %758, %651, %cst_302 {dimension_numbers = #tpu.dot_dimension_numbers<[1], [0], [0], [1], [0, 0, 1, 1], [], []>} : vector<8x192xbf16>, vector<192x256xbf16>, vector<8x256xf32> -> vector<8x256xf32>
    %760 = arith.addf %759, %654 : vector<8x256xf32>
    %761 = vector.extract_strided_slice %760 {offsets = [0, 0], sizes = [8, 192], strides = [1, 1]} : vector<8x256xf32> to vector<8x192xf32>
    %762 = arith.negf %761 : vector<8x192xf32>
    %763 = math.exp %762 : vector<8x192xf32>
    %cst_303 = arith.constant 1.000000e+00 : f32
    %764 = vector.broadcast %cst_303 : f32 to vector<8x192xf32>
    %765 = arith.addf %764, %763 : vector<8x192xf32>
    %766 = arith.divf %764, %765 : vector<8x192xf32>
    %767 = vector.extract_strided_slice %760 {offsets = [0, 192], sizes = [8, 64], strides = [1, 1]} : vector<8x256xf32> to vector<8x64xf32>
    %768 = math.tanh %767 : vector<8x64xf32>
    %769 = vector.extract_strided_slice %766 {offsets = [0, 0], sizes = [8, 64], strides = [1, 1]} : vector<8x192xf32> to vector<8x64xf32>
    %770 = vector.extract_strided_slice %766 {offsets = [0, 64], sizes = [8, 64], strides = [1, 1]} : vector<8x192xf32> to vector<8x64xf32>
    %771 = vector.extract_strided_slice %766 {offsets = [0, 128], sizes = [8, 64], strides = [1, 1]} : vector<8x192xf32> to vector<8x64xf32>
    %772 = arith.mulf %770, %752 : vector<8x64xf32>
    %773 = arith.mulf %769, %768 : vector<8x64xf32>
    %774 = arith.addf %772, %773 : vector<8x64xf32>
    %775 = math.tanh %774 : vector<8x64xf32>
    %776 = arith.mulf %771, %775 : vector<8x64xf32>
    %cst_304 = arith.constant 3.000000e+00 : f32
    %777 = vector.broadcast %cst_304 : f32 to vector<1x32xf32>
    %cst_305 = arith.constant 4.000000e+00 : f32
    %778 = vector.broadcast %cst_305 : f32 to vector<1x32xf32>
    %779 = tpu.concatenate %777, %778 in 1 : vector<1x32xf32>, vector<1x32xf32> -> vector<1x64xf32>
    %780 = vector.broadcast %0 : vector<8x1xf32> to vector<8x64xf32>
    %781 = vector.broadcast %779 : vector<1x64xf32> to vector<8x64xf32>
    %782 = arith.cmpf ogt, %780, %781 : vector<8x64xf32>
    %783 = arith.select %782, %776, %751 : vector<8x64xi1>, vector<8x64xf32>
    %784 = arith.select %782, %774, %752 : vector<8x64xi1>, vector<8x64xf32>
    %c4_306 = arith.constant 4 : index
    %c0_307 = arith.constant 0 : index
    %c0_308 = arith.constant 0 : index
    %785 = vector.load %arg12[%c4_306, %c0_307, %c0_308] : memref<8x8x64xf32, #tpu.memory_space<vmem>>, vector<1x8x64xf32>
    %786 = vector.shape_cast %785 : vector<1x8x64xf32> to vector<8x64xf32>
    %c3_309 = arith.constant 3 : index
    %c0_310 = arith.constant 0 : index
    %c0_311 = arith.constant 0 : index
    %787 = vector.load %arg12[%c3_309, %c0_310, %c0_311] : memref<8x8x64xf32, #tpu.memory_space<vmem>>, vector<1x8x64xf32>
    %788 = vector.shape_cast %787 : vector<1x8x64xf32> to vector<8x64xf32>
    %789 = tpu.concatenate %783, %786, %788 in 1 : vector<8x64xf32>, vector<8x64xf32>, vector<8x64xf32> -> vector<8x192xf32>
    %790 = arith.truncf %789 : vector<8x192xf32> to vector<8x192xbf16>
    %cst_312 = arith.constant dense<0.000000e+00> : vector<8x256xf32>
    %791 = tpu.matmul %790, %651, %cst_312 {dimension_numbers = #tpu.dot_dimension_numbers<[1], [0], [0], [1], [0, 0, 1, 1], [], []>} : vector<8x192xbf16>, vector<192x256xbf16>, vector<8x256xf32> -> vector<8x256xf32>
    %792 = arith.addf %791, %654 : vector<8x256xf32>
    %793 = vector.extract_strided_slice %792 {offsets = [0, 0], sizes = [8, 192], strides = [1, 1]} : vector<8x256xf32> to vector<8x192xf32>
    %794 = arith.negf %793 : vector<8x192xf32>
    %795 = math.exp %794 : vector<8x192xf32>
    %cst_313 = arith.constant 1.000000e+00 : f32
    %796 = vector.broadcast %cst_313 : f32 to vector<8x192xf32>
    %797 = arith.addf %796, %795 : vector<8x192xf32>
    %798 = arith.divf %796, %797 : vector<8x192xf32>
    %799 = vector.extract_strided_slice %792 {offsets = [0, 192], sizes = [8, 64], strides = [1, 1]} : vector<8x256xf32> to vector<8x64xf32>
    %800 = math.tanh %799 : vector<8x64xf32>
    %801 = vector.extract_strided_slice %798 {offsets = [0, 0], sizes = [8, 64], strides = [1, 1]} : vector<8x192xf32> to vector<8x64xf32>
    %802 = vector.extract_strided_slice %798 {offsets = [0, 64], sizes = [8, 64], strides = [1, 1]} : vector<8x192xf32> to vector<8x64xf32>
    %803 = vector.extract_strided_slice %798 {offsets = [0, 128], sizes = [8, 64], strides = [1, 1]} : vector<8x192xf32> to vector<8x64xf32>
    %804 = arith.mulf %802, %784 : vector<8x64xf32>
    %805 = arith.mulf %801, %800 : vector<8x64xf32>
    %806 = arith.addf %804, %805 : vector<8x64xf32>
    %807 = math.tanh %806 : vector<8x64xf32>
    %808 = arith.mulf %803, %807 : vector<8x64xf32>
    %cst_314 = arith.constant 4.000000e+00 : f32
    %809 = vector.broadcast %cst_314 : f32 to vector<1x32xf32>
    %cst_315 = arith.constant 3.000000e+00 : f32
    %810 = vector.broadcast %cst_315 : f32 to vector<1x32xf32>
    %811 = tpu.concatenate %809, %810 in 1 : vector<1x32xf32>, vector<1x32xf32> -> vector<1x64xf32>
    %812 = vector.broadcast %0 : vector<8x1xf32> to vector<8x64xf32>
    %813 = vector.broadcast %811 : vector<1x64xf32> to vector<8x64xf32>
    %814 = arith.cmpf ogt, %812, %813 : vector<8x64xf32>
    %815 = arith.select %814, %808, %783 : vector<8x64xi1>, vector<8x64xf32>
    %816 = arith.select %814, %806, %784 : vector<8x64xi1>, vector<8x64xf32>
    %c5_316 = arith.constant 5 : index
    %c0_317 = arith.constant 0 : index
    %c0_318 = arith.constant 0 : index
    %817 = vector.load %arg12[%c5_316, %c0_317, %c0_318] : memref<8x8x64xf32, #tpu.memory_space<vmem>>, vector<1x8x64xf32>
    %818 = vector.shape_cast %817 : vector<1x8x64xf32> to vector<8x64xf32>
    %c2_319 = arith.constant 2 : index
    %c0_320 = arith.constant 0 : index
    %c0_321 = arith.constant 0 : index
    %819 = vector.load %arg12[%c2_319, %c0_320, %c0_321] : memref<8x8x64xf32, #tpu.memory_space<vmem>>, vector<1x8x64xf32>
    %820 = vector.shape_cast %819 : vector<1x8x64xf32> to vector<8x64xf32>
    %821 = tpu.concatenate %815, %818, %820 in 1 : vector<8x64xf32>, vector<8x64xf32>, vector<8x64xf32> -> vector<8x192xf32>
    %822 = arith.truncf %821 : vector<8x192xf32> to vector<8x192xbf16>
    %cst_322 = arith.constant dense<0.000000e+00> : vector<8x256xf32>
    %823 = tpu.matmul %822, %651, %cst_322 {dimension_numbers = #tpu.dot_dimension_numbers<[1], [0], [0], [1], [0, 0, 1, 1], [], []>} : vector<8x192xbf16>, vector<192x256xbf16>, vector<8x256xf32> -> vector<8x256xf32>
    %824 = arith.addf %823, %654 : vector<8x256xf32>
    %825 = vector.extract_strided_slice %824 {offsets = [0, 0], sizes = [8, 192], strides = [1, 1]} : vector<8x256xf32> to vector<8x192xf32>
    %826 = arith.negf %825 : vector<8x192xf32>
    %827 = math.exp %826 : vector<8x192xf32>
    %cst_323 = arith.constant 1.000000e+00 : f32
    %828 = vector.broadcast %cst_323 : f32 to vector<8x192xf32>
    %829 = arith.addf %828, %827 : vector<8x192xf32>
    %830 = arith.divf %828, %829 : vector<8x192xf32>
    %831 = vector.extract_strided_slice %824 {offsets = [0, 192], sizes = [8, 64], strides = [1, 1]} : vector<8x256xf32> to vector<8x64xf32>
    %832 = math.tanh %831 : vector<8x64xf32>
    %833 = vector.extract_strided_slice %830 {offsets = [0, 0], sizes = [8, 64], strides = [1, 1]} : vector<8x192xf32> to vector<8x64xf32>
    %834 = vector.extract_strided_slice %830 {offsets = [0, 64], sizes = [8, 64], strides = [1, 1]} : vector<8x192xf32> to vector<8x64xf32>
    %835 = vector.extract_strided_slice %830 {offsets = [0, 128], sizes = [8, 64], strides = [1, 1]} : vector<8x192xf32> to vector<8x64xf32>
    %836 = arith.mulf %834, %816 : vector<8x64xf32>
    %837 = arith.mulf %833, %832 : vector<8x64xf32>
    %838 = arith.addf %836, %837 : vector<8x64xf32>
    %839 = math.tanh %838 : vector<8x64xf32>
    %840 = arith.mulf %835, %839 : vector<8x64xf32>
    %cst_324 = arith.constant 5.000000e+00 : f32
    %841 = vector.broadcast %cst_324 : f32 to vector<1x32xf32>
    %cst_325 = arith.constant 2.000000e+00 : f32
    %842 = vector.broadcast %cst_325 : f32 to vector<1x32xf32>
    %843 = tpu.concatenate %841, %842 in 1 : vector<1x32xf32>, vector<1x32xf32> -> vector<1x64xf32>
    %844 = vector.broadcast %0 : vector<8x1xf32> to vector<8x64xf32>
    %845 = vector.broadcast %843 : vector<1x64xf32> to vector<8x64xf32>
    %846 = arith.cmpf ogt, %844, %845 : vector<8x64xf32>
    %847 = arith.select %846, %840, %815 : vector<8x64xi1>, vector<8x64xf32>
    %848 = arith.select %846, %838, %816 : vector<8x64xi1>, vector<8x64xf32>
    %c6_326 = arith.constant 6 : index
    %c0_327 = arith.constant 0 : index
    %c0_328 = arith.constant 0 : index
    %849 = vector.load %arg12[%c6_326, %c0_327, %c0_328] : memref<8x8x64xf32, #tpu.memory_space<vmem>>, vector<1x8x64xf32>
    %850 = vector.shape_cast %849 : vector<1x8x64xf32> to vector<8x64xf32>
    %c1_329 = arith.constant 1 : index
    %c0_330 = arith.constant 0 : index
    %c0_331 = arith.constant 0 : index
    %851 = vector.load %arg12[%c1_329, %c0_330, %c0_331] : memref<8x8x64xf32, #tpu.memory_space<vmem>>, vector<1x8x64xf32>
    %852 = vector.shape_cast %851 : vector<1x8x64xf32> to vector<8x64xf32>
    %853 = tpu.concatenate %847, %850, %852 in 1 : vector<8x64xf32>, vector<8x64xf32>, vector<8x64xf32> -> vector<8x192xf32>
    %854 = arith.truncf %853 : vector<8x192xf32> to vector<8x192xbf16>
    %cst_332 = arith.constant dense<0.000000e+00> : vector<8x256xf32>
    %855 = tpu.matmul %854, %651, %cst_332 {dimension_numbers = #tpu.dot_dimension_numbers<[1], [0], [0], [1], [0, 0, 1, 1], [], []>} : vector<8x192xbf16>, vector<192x256xbf16>, vector<8x256xf32> -> vector<8x256xf32>
    %856 = arith.addf %855, %654 : vector<8x256xf32>
    %857 = vector.extract_strided_slice %856 {offsets = [0, 0], sizes = [8, 192], strides = [1, 1]} : vector<8x256xf32> to vector<8x192xf32>
    %858 = arith.negf %857 : vector<8x192xf32>
    %859 = math.exp %858 : vector<8x192xf32>
    %cst_333 = arith.constant 1.000000e+00 : f32
    %860 = vector.broadcast %cst_333 : f32 to vector<8x192xf32>
    %861 = arith.addf %860, %859 : vector<8x192xf32>
    %862 = arith.divf %860, %861 : vector<8x192xf32>
    %863 = vector.extract_strided_slice %856 {offsets = [0, 192], sizes = [8, 64], strides = [1, 1]} : vector<8x256xf32> to vector<8x64xf32>
    %864 = math.tanh %863 : vector<8x64xf32>
    %865 = vector.extract_strided_slice %862 {offsets = [0, 0], sizes = [8, 64], strides = [1, 1]} : vector<8x192xf32> to vector<8x64xf32>
    %866 = vector.extract_strided_slice %862 {offsets = [0, 64], sizes = [8, 64], strides = [1, 1]} : vector<8x192xf32> to vector<8x64xf32>
    %867 = vector.extract_strided_slice %862 {offsets = [0, 128], sizes = [8, 64], strides = [1, 1]} : vector<8x192xf32> to vector<8x64xf32>
    %868 = arith.mulf %866, %848 : vector<8x64xf32>
    %869 = arith.mulf %865, %864 : vector<8x64xf32>
    %870 = arith.addf %868, %869 : vector<8x64xf32>
    %871 = math.tanh %870 : vector<8x64xf32>
    %872 = arith.mulf %867, %871 : vector<8x64xf32>
    %cst_334 = arith.constant 6.000000e+00 : f32
    %873 = vector.broadcast %cst_334 : f32 to vector<1x32xf32>
    %cst_335 = arith.constant 1.000000e+00 : f32
    %874 = vector.broadcast %cst_335 : f32 to vector<1x32xf32>
    %875 = tpu.concatenate %873, %874 in 1 : vector<1x32xf32>, vector<1x32xf32> -> vector<1x64xf32>
    %876 = vector.broadcast %0 : vector<8x1xf32> to vector<8x64xf32>
    %877 = vector.broadcast %875 : vector<1x64xf32> to vector<8x64xf32>
    %878 = arith.cmpf ogt, %876, %877 : vector<8x64xf32>
    %879 = arith.select %878, %872, %847 : vector<8x64xi1>, vector<8x64xf32>
    %880 = arith.select %878, %870, %848 : vector<8x64xi1>, vector<8x64xf32>
    %c7_336 = arith.constant 7 : index
    %c0_337 = arith.constant 0 : index
    %c0_338 = arith.constant 0 : index
    %881 = vector.load %arg12[%c7_336, %c0_337, %c0_338] : memref<8x8x64xf32, #tpu.memory_space<vmem>>, vector<1x8x64xf32>
    %882 = vector.shape_cast %881 : vector<1x8x64xf32> to vector<8x64xf32>
    %c0_339 = arith.constant 0 : index
    %c0_340 = arith.constant 0 : index
    %c0_341 = arith.constant 0 : index
    %883 = vector.load %arg12[%c0_339, %c0_340, %c0_341] : memref<8x8x64xf32, #tpu.memory_space<vmem>>, vector<1x8x64xf32>
    %884 = vector.shape_cast %883 : vector<1x8x64xf32> to vector<8x64xf32>
    %885 = tpu.concatenate %879, %882, %884 in 1 : vector<8x64xf32>, vector<8x64xf32>, vector<8x64xf32> -> vector<8x192xf32>
    %886 = arith.truncf %885 : vector<8x192xf32> to vector<8x192xbf16>
    %cst_342 = arith.constant dense<0.000000e+00> : vector<8x256xf32>
    %887 = tpu.matmul %886, %651, %cst_342 {dimension_numbers = #tpu.dot_dimension_numbers<[1], [0], [0], [1], [0, 0, 1, 1], [], []>} : vector<8x192xbf16>, vector<192x256xbf16>, vector<8x256xf32> -> vector<8x256xf32>
    %888 = arith.addf %887, %654 : vector<8x256xf32>
    %889 = vector.extract_strided_slice %888 {offsets = [0, 0], sizes = [8, 192], strides = [1, 1]} : vector<8x256xf32> to vector<8x192xf32>
    %890 = arith.negf %889 : vector<8x192xf32>
    %891 = math.exp %890 : vector<8x192xf32>
    %cst_343 = arith.constant 1.000000e+00 : f32
    %892 = vector.broadcast %cst_343 : f32 to vector<8x192xf32>
    %893 = arith.addf %892, %891 : vector<8x192xf32>
    %894 = arith.divf %892, %893 : vector<8x192xf32>
    %895 = vector.extract_strided_slice %888 {offsets = [0, 192], sizes = [8, 64], strides = [1, 1]} : vector<8x256xf32> to vector<8x64xf32>
    %896 = math.tanh %895 : vector<8x64xf32>
    %897 = vector.extract_strided_slice %894 {offsets = [0, 0], sizes = [8, 64], strides = [1, 1]} : vector<8x192xf32> to vector<8x64xf32>
    %898 = vector.extract_strided_slice %894 {offsets = [0, 64], sizes = [8, 64], strides = [1, 1]} : vector<8x192xf32> to vector<8x64xf32>
    %899 = vector.extract_strided_slice %894 {offsets = [0, 128], sizes = [8, 64], strides = [1, 1]} : vector<8x192xf32> to vector<8x64xf32>
    %900 = arith.mulf %898, %880 : vector<8x64xf32>
    %901 = arith.mulf %897, %896 : vector<8x64xf32>
    %902 = arith.addf %900, %901 : vector<8x64xf32>
    %903 = math.tanh %902 : vector<8x64xf32>
    %904 = arith.mulf %899, %903 : vector<8x64xf32>
    %cst_344 = arith.constant 7.000000e+00 : f32
    %905 = vector.broadcast %cst_344 : f32 to vector<1x32xf32>
    %cst_345 = arith.constant 0.000000e+00 : f32
    %906 = vector.broadcast %cst_345 : f32 to vector<1x32xf32>
    %907 = tpu.concatenate %905, %906 in 1 : vector<1x32xf32>, vector<1x32xf32> -> vector<1x64xf32>
    %908 = vector.broadcast %0 : vector<8x1xf32> to vector<8x64xf32>
    %909 = vector.broadcast %907 : vector<1x64xf32> to vector<8x64xf32>
    %910 = arith.cmpf ogt, %908, %909 : vector<8x64xf32>
    %911 = arith.select %910, %904, %879 : vector<8x64xi1>, vector<8x64xf32>
    %c0_346 = arith.constant 0 : index
    %c0_347 = arith.constant 0 : index
    %912 = vector.load %arg8[%c0_346, %c0_347] : memref<64x6xf32, #tpu.memory_space<vmem>>, vector<64x6xf32>
    %cst_348 = arith.constant dense<0.000000e+00> : vector<8x6xf32>
    %913 = tpu.matmul %911, %912, %cst_348 {dimension_numbers = #tpu.dot_dimension_numbers<[1], [0], [0], [1], [0, 0, 1, 1], [], []>} : vector<8x64xf32>, vector<64x6xf32>, vector<8x6xf32> -> vector<8x6xf32>
    %c0_349 = arith.constant 0 : index
    %c0_350 = arith.constant 0 : index
    %914 = vector.load %arg9[%c0_349, %c0_350] : memref<1x6xf32, #tpu.memory_space<vmem>>, vector<1x6xf32>
    %915 = vector.broadcast %914 : vector<1x6xf32> to vector<8x6xf32>
    %916 = arith.addf %913, %915 : vector<8x6xf32>
    %c0_351 = arith.constant 0 : index
    %c0_352 = arith.constant 0 : index
    %917 = vector.load %arg10[%c0_351, %c0_352] : memref<8x6xf32, #tpu.memory_space<vmem>>, vector<8x6xf32>
    tpu.vector_store %arg10[%c0_351, %c0_352], %916 {strides = array<i32>} : memref<8x6xf32, #tpu.memory_space<vmem>>, vector<8x6xf32>,
    return
  }
}

</mosaic_0001>

<bundles_post_ra>
// kernel: forward_pallas.1
= control target key start
LH: loop header
LB: loop body
LE: loop exit
PB: predicated region body
PF: predicated region fallthrough
CT: control target
= control target key end

     0   :  { %s4231_s17 = smov 64   ;;  %s6201_s0 = inlined_call_operand.vmem [shape: f32[8,1], index: 0, kind: input, shape index: {}]   ;;  %s6202_s1 = inlined_call_operand.vmem [shape: f32[8,8,32], index: 1, kind: input, shape index: {}]   ;;  %s6203_s2 = inlined_call_operand.vmem [shape: bf16[128,256], index: 2, kind: input, shape index: {}]   ;;  %s6204_s3 = inlined_call_operand.vmem [shape: f32[1,256], index: 3, kind: input, shape index: {}]   ;;  %s6205_s4 = inlined_call_operand.vmem [shape: bf16[192,256], index: 4, kind: input, shape index: {}]   ;;  %s6206_s5 = inlined_call_operand.vmem [shape: f32[1,256], index: 5, kind: input, shape index: {}]   ;;  %s6207_s6 = inlined_call_operand.vmem [shape: bf16[192,256], index: 6, kind: input, shape index: {}]   ;;  %s6208_s7 = inlined_call_operand.vmem [shape: f32[1,256], index: 7, kind: input, shape index: {}]   ;;  %s6209_s8 = inlined_call_operand.vmem [shape: f32[64,6], index: 8, kind: input, shape index: {}]   ;;  %s6210_s9 = inlined_call_operand.vmem [shape: f32[1,6], index: 9, kind: input, shape index: {}]   ;;  %s6211_s10 = inlined_call_operand.hbm [shape: f32[8,6], index: 10, kind: output, shape index: {}]  }
   0x1   :  { %v60_v0 = vld [vmem:[%s6202_s1] sm:$0xff]  ;;  %v3523_v1 = vld [vmem:[%s6203_s2 + $0x70] sm:$0xf]  ;;  %v3850_v2 = vld [vmem:[%s6203_s2 + $0x74] sm:$0xf0] }
   0x2   :  { %64 = vrot.lane.b32.xlu0 %v60_v0, %s4231_s17  ;;  %v3849_v3 = vld [vmem:[%s6203_s2 + $0x74] sm:$0xf]  ;;  %v3525_v4 = vld [vmem:[%s6203_s2 + $0x78] sm:$0xf0]  ;;  %v4314_v5 = vor.u32 %v3850_v2, %v3523_v1  ;;  %v3515_v7 = vld [vmem:[%s6203_s2 + $0x60] sm:$0xf] }
   0x3   :  { %v4316_v6 = vor.u32 %v3849_v3, %v3525_v4  ;;  %v3848_v8 = vld [vmem:[%s6203_s2 + $0x64] sm:$0xf0]  ;;  %v3847_v9 = vld [vmem:[%s6203_s2 + $0x64] sm:$0xf]  ;;  %v3517_v10 = vld [vmem:[%s6203_s2 + $0x68] sm:$0xf0] }
   0x4   :  { %156 = vmatpush.bf16.msra.mxu0 %v4314_v5  ;;  %v4332_v11 = vor.u32 %v3848_v8, %v3515_v7  ;;  %v4334_v12 = vor.u32 %v3847_v9, %v3517_v10  ;;  %v3507_v13 = vld [vmem:[%s6203_s2 + $0x50] sm:$0xf]  ;;  %v3846_v14 = vld [vmem:[%s6203_s2 + $0x54] sm:$0xf0]  ;;  %v3845_v15 = vld [vmem:[%s6203_s2 + $0x54] sm:$0xf]  ;;  %272 = vmatpush.bf16.msra.mxu2 %v4314_v5 }
   0x5   :  { %169 = vmatpush.bf16.msra.mxu1 %v4316_v6  ;;  %v3509_v16 = vld [vmem:[%s6203_s2 + $0x58] sm:$0xf0]  ;;  %285 = vmatpush.bf16.msra.mxu3 %v4316_v6  ;;  %v4355_v18 = vor.u32 %v3846_v14, %v3507_v13  ;;  %v3499_v20 = vld [vmem:[%s6203_s2 + $0x40] sm:$0xf] }
   0x6   :  { %v3464_v17 = vld [vmem:[%s6202_s1 + $0x38] sm:$0xff]  ;;  %v4357_v19 = vor.u32 %v3845_v15, %v3509_v16 }
   0x8   :  { %157 = vmatpush.bf16.msra.mxu0 %v4332_v11 }
   0x9   :  { %170 = vmatpush.bf16.msra.mxu1 %v4334_v12 }
   0xa   :  { %15 = vsyncpa [#allocation5], 0  ;;  %s4232_s25 = smov 96   ;;  %v3844_v21 = vld [vmem:[%s6203_s2 + $0x44] sm:$0xf0]  ;;  %273 = vmatpush.bf16.msra.mxu2 %v4332_v11  ;;  %286 = vmatpush.bf16.msra.mxu3 %v4334_v12  ;;  %vm71_vm0 = vcmask 523264  }
   0xb   :  { %68 = vrot.lane.b32.xlu0 %v3464_v17, %s4232_s25  ;;  %v3843_v22 = vld [vmem:[%s6203_s2 + $0x44] sm:$0xf]  ;;  %v3501_v23 = vld [vmem:[%s6203_s2 + $0x48] sm:$0xf0]  ;;  %v4376_v24 = vor.u32 %v3844_v21, %v3499_v20  ;;  %v3491_v26 = vld [vmem:[%s6203_s2 + $0x30] sm:$0xf] }
   0xc   :  { %158 = vmatpush.bf16.msra.mxu0 %v4355_v18  ;;  %v4378_v25 = vor.u32 %v3843_v22, %v3501_v23  ;;  %v3842_v27 = vld [vmem:[%s6203_s2 + $0x34] sm:$0xf0]  ;;  %v3841_v28 = vld [vmem:[%s6203_s2 + $0x34] sm:$0xf]  ;;  %v3493_v29 = vld [vmem:[%s6203_s2 + $0x38] sm:$0xf0] }
   0xd   :  { %171 = vmatpush.bf16.msra.mxu1 %v4357_v19  ;;  %v4396_v30 = vor.u32 %v3842_v27, %v3491_v26  ;;  %v4398_v31 = vor.u32 %v3841_v28, %v3493_v29  ;;  %v3483_v32 = vld [vmem:[%s6203_s2 + $0x20] sm:$0xf]  ;;  %v3840_v33 = vld [vmem:[%s6203_s2 + $0x24] sm:$0xf0]  ;;  %v3839_v34 = vld [vmem:[%s6203_s2 + $0x24] sm:$0xf] }
   0xe   :  { %274 = vmatpush.bf16.msra.mxu2 %v4355_v18  ;;  %287 = vmatpush.bf16.msra.mxu3 %v4357_v19  ;;  %v4415_v35 = vor.u32 %v3840_v33, %v3483_v32  ;;  %v3485_v36 = vld [vmem:[%s6203_s2 + $0x28] sm:$0xf0]  ;;  %v3475_v38 = vld [vmem:[%s6203_s2 + $0x10] sm:$0xf]  ;;  %v3838_v39 = vld [vmem:[%s6203_s2 + $0x14] sm:$0xf0] }
   0xf   :  { %v4420_v37 = vor.u32 %v3839_v34, %v3485_v36  ;;  %v3837_v40 = vld [vmem:[%s6203_s2 + $0x14] sm:$0xf]  ;;  %v4434_v41 = vor.u32 %v3838_v39, %v3475_v38  ;;  %v3477_v42 = vld [vmem:[%s6203_s2 + $0x18] sm:$0xf0]  ;;  %v3467_v44 = vld [vmem:[%s6203_s2] sm:$0xf] }
  0x10   :  { %159 = vmatpush.bf16.msra.mxu0 %v4376_v24  ;;  %v4440_v43 = vor.u32 %v3837_v40, %v3477_v42  ;;  %v3836_v45 = vld [vmem:[%s6203_s2 + $0x4] sm:$0xf0]  ;;  %v3835_v46 = vld [vmem:[%s6203_s2 + $0x4] sm:$0xf]  ;;  %v3469_v48 = vld [vmem:[%s6203_s2 + $0x8] sm:$0xf0] }
  0x11   :  { %172 = vmatpush.bf16.msra.mxu1 %v4378_v25  ;;  %v4455_v47 = vor.u32 %v3836_v45, %v3467_v44  ;;  %v4460_v49 = vor.u32 %v3835_v46, %v3469_v48  ;;  %vm73_vm1 = vcmask 785408   ;;  %v54_v55 = vld [vmem:[%s6204_s3] sm:$0x3]  ;;  %v4529_v4 = vld [vmem:[%s6202_s1 + $0x8] sm:$0xff]  ;;  %v4537_v23 = vld [vmem:[%s6202_s1 + $0x30] sm:$0xff]  ;;  %v4233_v26 = vmov 0  }
  0x12   :  { %275 = vmatpush.bf16.msra.mxu2 %v4376_v24  ;;  %288 = vmatpush.bf16.msra.mxu3 %v4378_v25  ;;  %v4519_v56 = vperm.slane %v54_v55, 1  ;;  %v4523_v63 = vperm.slane %v54_v55, 0  ;;  %v37_v33 = vld [vmem:[%s6201_s0] sm:$0xff]  ;;  %vm238_vm6 = vcmask 261120   ;;  %vm255_vm12 = vcmask 523520   ;;  %s4242_s19 = smov [#allocation4]  }
  0x13   :  { %262 = vrot.lane.b32.xlu0 %v4529_v4, %s4231_s17  ;;  %3911 = vset.pattern.permute.xlu2 %v4233_v26  ;;  %s3453_s20 = sshll.u32 %s4242_s19, 4  ;;  %s3455_s23 = sshll.u32 %s6211_s10, 4  ;;  %s3454_s20 = int_to_ptr.vmem [resolvable:$true] %s3453_s20  ;;  %s3456_s23 = int_to_ptr.hbm [resolvable:$true] %s3455_s23 }
  0x14   :  { %160 = vmatpush.bf16.msra.mxu0 %v4396_v30  ;;  %3912 = vset.pattern.permute.xlu0 %v4233_v26 }
  0x15   :  { %173 = vmatpush.bf16.msra.mxu1 %v4398_v31 }
  0x16   :  { %276 = vmatpush.bf16.msra.mxu2 %v4396_v30  ;;  %289 = vmatpush.bf16.msra.mxu3 %v4398_v31 }
  0x18   :  { %161 = vmatpush.bf16.msra.mxu0 %v4415_v35 }
  0x19   :  { %174 = vmatpush.bf16.msra.mxu1 %v4420_v37 }
  0x1a   :  { %277 = vmatpush.bf16.msra.mxu2 %v4415_v35  ;;  %290 = vmatpush.bf16.msra.mxu3 %v4420_v37 }
  0x1c   :  { %162 = vmatpush.bf16.msra.mxu0 %v4434_v41 }
  0x1d   :  { %175 = vmatpush.bf16.msra.mxu1 %v4440_v43 }
  0x1e   :  { %278 = vmatpush.bf16.msra.mxu2 %v4434_v41  ;;  %291 = vmatpush.bf16.msra.mxu3 %v4440_v43 }
  0x20   :  { %163 = vmatpush.bf16.msra.mxu0 %v4455_v47 }
  0x21   :  { %176 = vmatpush.bf16.msra.mxu1 %v4460_v49 }
  0x22   :  { %279 = vmatpush.bf16.msra.mxu2 %v4455_v47  ;;  %292 = vmatpush.bf16.msra.mxu3 %v4460_v49 }
  0x24   :  { %386 = vmatpush.bf16.msrb.mxu0 %v4314_v5 }
  0x25   :  { %399 = vmatpush.bf16.msrb.mxu1 %v4316_v6 }
  0x26   :  { %500 = vmatpush.bf16.msrb.mxu2 %v4314_v5  ;;  %513 = vmatpush.bf16.msrb.mxu3 %v4316_v6 }
  0x28   :  { %387 = vmatpush.bf16.msrb.mxu0 %v4332_v11 }
  0x29   :  { %400 = vmatpush.bf16.msrb.mxu1 %v4334_v12 }
  0x2a   :  { %501 = vmatpush.bf16.msrb.mxu2 %v4332_v11  ;;  %514 = vmatpush.bf16.msrb.mxu3 %v4334_v12 }
  0x2c   :  { %388 = vmatpush.bf16.msrb.mxu0 %v4355_v18 }
  0x2d   :  { %401 = vmatpush.bf16.msrb.mxu1 %v4357_v19 }
  0x2e   :  { %502 = vmatpush.bf16.msrb.mxu2 %v4355_v18  ;;  %515 = vmatpush.bf16.msrb.mxu3 %v4357_v19 }
  0x30   :  { %389 = vmatpush.bf16.msrb.mxu0 %v4376_v24 }
  0x31   :  { %402 = vmatpush.bf16.msrb.mxu1 %v4378_v25 }
  0x32   :  { %503 = vmatpush.bf16.msrb.mxu2 %v4376_v24  ;;  %516 = vmatpush.bf16.msrb.mxu3 %v4378_v25 }
  0x34   :  { %390 = vmatpush.bf16.msrb.mxu0 %v4396_v30 }
  0x35   :  { %403 = vmatpush.bf16.msrb.mxu1 %v4398_v31 }
  0x36   :  { %504 = vmatpush.bf16.msrb.mxu2 %v4396_v30  ;;  %517 = vmatpush.bf16.msrb.mxu3 %v4398_v31 }
  0x38   :  { %391 = vmatpush.bf16.msrb.mxu0 %v4415_v35 }
  0x39   :  { %404 = vmatpush.bf16.msrb.mxu1 %v4420_v37 }
  0x3a   :  { %505 = vmatpush.bf16.msrb.mxu2 %v4415_v35  ;;  %518 = vmatpush.bf16.msrb.mxu3 %v4420_v37 }
  0x3c   :  { %392 = vmatpush.bf16.msrb.mxu0 %v4434_v41 }
  0x3d   :  { %405 = vmatpush.bf16.msrb.mxu1 %v4440_v43 }
  0x3e   :  { %506 = vmatpush.bf16.msrb.mxu2 %v4434_v41  ;;  %519 = vmatpush.bf16.msrb.mxu3 %v4440_v43 }
  0x40   :  { %393 = vmatpush.bf16.msrb.mxu0 %v4455_v47 }
  0x41   :  { %406 = vmatpush.bf16.msrb.mxu1 %v4460_v49 }
  0x42   :  { %507 = vmatpush.bf16.msrb.mxu2 %v4455_v47  ;;  %520 = vmatpush.bf16.msrb.mxu3 %v4460_v49 }
  0x74   :  { %v65_v50 = vpop.permute.xlu0 %64 }
  0x75   :  { %v72_v51 = vsel %vm71_vm0, 0.0, %v65_v50 }
  0x7d   :  { %v69_v52 = vpop.permute.xlu0 %68 }
  0x7e   :  { %v74_v53 = vsel %vm73_vm1, %v72_v51, %v69_v52  ;;  %v4234_v51 = vmov 7.0  }
  0x7f   :  { %v75_v54 = vpack.c.bf16 %v74_v53, %v74_v53  ;;  %v239_v52 = vsel %vm238_vm6, 0.0, %v4234_v51 }
  0x80   :  { %v245_v55 = vperm.slane %v239_v52, 0 }
  0x81   :  { %164 = vmatmul.bf16.vlgmr.msra.gmra.mxu0 %v75_v54  ;;  %177 = vmatmul.bf16.vlgmr.msra.gmra.mxu1 %v75_v54 }
  0x82   :  { %612 = vmatpush.bf16.msra.mxu0 %v4314_v5  ;;  %625 = vmatpush.bf16.msra.mxu1 %v4316_v6 }
  0x86   :  { %613 = vmatpush.bf16.msra.mxu0 %v4332_v11  ;;  %626 = vmatpush.bf16.msra.mxu1 %v4334_v12 }
  0x8a   :  { %614 = vmatpush.bf16.msra.mxu0 %v4355_v18  ;;  %627 = vmatpush.bf16.msra.mxu1 %v4357_v19 }
  0x8e   :  { %615 = vmatpush.bf16.msra.mxu0 %v4376_v24  ;;  %628 = vmatpush.bf16.msra.mxu1 %v4378_v25 }
  0x92   :  { %616 = vmatpush.bf16.msra.mxu0 %v4396_v30  ;;  %629 = vmatpush.bf16.msra.mxu1 %v4398_v31 }
  0x96   :  { %617 = vmatpush.bf16.msra.mxu0 %v4415_v35  ;;  %630 = vmatpush.bf16.msra.mxu1 %v4420_v37 }
  0x9a   :  { %618 = vmatpush.bf16.msra.mxu0 %v4434_v41  ;;  %631 = vmatpush.bf16.msra.mxu1 %v4440_v43 }
  0x9e   :  { %619 = vmatpush.bf16.msra.mxu0 %v4455_v47  ;;  %632 = vmatpush.bf16.msra.mxu1 %v4460_v49 }
  0xfe   :  { %v165_v57 = vpop.f32.mrf.mxu0  ;;  %v178_v58 = vpop.f32.mrf.mxu1 }
  0xff   :  { %v179_v59 = vadd.f32 %v178_v58, %v4519_v56  ;;  %v166_v0 = vadd.f32 %v165_v57, %v4523_v63 }
 0x101   :  { %3914 = vtanh.f32 %v179_v59  ;;  %v3529_v1 = vmul.f32 -1.442695, %v166_v0  ;;  %v3530_v34 = vmul.f32 -1.442695, %v179_v59 }
 0x103   :  { %3916 = vpow2.f32 %v3529_v1 }
 0x106   :  { %v167_v60 = vpop.f32.mrf.mxu0  ;;  %v180_v61 = vpop.f32.mrf.mxu1 }
 0x107   :  { %v3915_v62 = vpop.eup %3914  ;;  %v263_v60 = vpop.permute.xlu0 %262 }
 0x108   :  { %223 = vrot.lane.b32.xlu1 %v3915_v62, %s4231_s17 }
 0x109   :  { %v3917_v2 = vpop.eup %3916 }
 0x10a   :  { %v188_v3 = vadd.f32 1.0, %v3917_v2 }
 0x10c   :  { %3918 = vrcp.f32 %v188_v3  ;;  %v201_v14 = vand.u32 2147483648, %v188_v3  ;;  %vm195_vm3 = vweird.f32 %v188_v3  ;;  %v199_v15 = vand.u32 2147483647, %v188_v3 }
 0x10e   :  { %v202_v17 = vor.u32 1.1754944e-38, %v201_v14  ;;  %vm200_vm5 = vcmp.eq.f32.partialorder %v199_v15, 8.507059e+37 }
 0x112   :  { %v3919_v7 = vpop.eup %3918 }
 0x113   :  { %v191_v8 = vmul.f32 %v3919_v7, %v188_v3  ;;  %vm196_vm2 = vweird.f32 %v3919_v7 }
 0x114   :  { %vm197_vm4 = vmor %vm195_vm3, %vm196_vm2 }
 0x115   :  { %v192_v9 = vsub.f32 1.0, %v191_v8 }
 0x117   :  { %v193_v10 = vmul.f32 %v3919_v7, %v192_v9 }
 0x119   :  { %v194_v13 = vadd.f32 %v3919_v7, %v193_v10 }
 0x11b   :  { %v198_v16 = vsel %vm197_vm4, %v3919_v7, %v194_v13 }
 0x11c   :  { %v203_v20 = vsel %vm200_vm5, %v202_v17, %v198_v16 }
 0x11d   :  { %v221_v27 = vmul.f32 0.0, %v203_v20 }
 0x17a   :  { %v224_v21 = vpop.permute.xlu1 %223 }
 0x17b   :  { %v226_v22 = vmul.f32 %v224_v21, %v203_v20 }
 0x17d   :  { %228 = vrot.lane.b32.xlu1 %v226_v22, %s4231_s17 }
 0x185   :  { %266 = vrot.lane.b32.xlu1 %v4537_v23, %s4232_s25 }
 0x1ef   :  { %v229_v28 = vpop.permute.xlu1 %228 }
 0x1f0   :  { %v231_v29 = vadd.f32 %v229_v28, %v221_v27 }
 0x1f2   :  { %3920 = vtanh.f32 %v231_v29 }
 0x1f3   :  { %3922 = vpow2.f32 %v3530_v34 }
 0x1f7   :  { %v267_v62 = vpop.permute.xlu1 %266 }
 0x1f8   :  { %v3921_v32 = vpop.eup %3920 }
 0x1f9   :  { %234 = vrot.lane.b32.xlu2 %v3921_v32, %s4231_s17  ;;  %v3923_v36 = vpop.eup %3922 }
 0x1fa   :  { %v189_v38 = vadd.f32 1.0, %v3923_v36 }
 0x1fc   :  { %3924 = vrcp.f32 %v189_v38  ;;  %v216_v48 = vand.u32 2147483648, %v189_v38  ;;  %vm210_vm8 = vweird.f32 %v189_v38  ;;  %v214_v50 = vand.u32 2147483647, %v189_v38 }
 0x1fe   :  { %v217_v54 = vor.u32 1.1754944e-38, %v216_v48  ;;  %vm215_vm10 = vcmp.eq.f32.partialorder %v214_v50, 8.507059e+37 }
 0x201   :  { %242 = vperm.xlu2 %3911, %v37_v33  }
 0x202   :  { %v3925_v39 = vpop.eup %3924 }
 0x203   :  { %v206_v40 = vmul.f32 %v3925_v39, %v189_v38  ;;  %vm211_vm7 = vweird.f32 %v3925_v39 }
 0x204   :  { %vm212_vm9 = vmor %vm210_vm8, %vm211_vm7 }
 0x205   :  { %v207_v42 = vsub.f32 1.0, %v206_v40 }
 0x207   :  { %v208_v44 = vmul.f32 %v3925_v39, %v207_v42 }
 0x209   :  { %249 = vrot.lane.b32.xlu2 %v231_v29, %s4231_s17  ;;  %v209_v46 = vadd.f32 %v3925_v39, %v208_v44  ;;  %v4594_v44 = vld [vmem:[%s6202_s1 + $0x10] sm:$0xff] }
 0x20b   :  { %v213_v53 = vsel %vm212_vm9, %v3925_v39, %v209_v46 }
 0x20c   :  { %v218_v57 = vsel %vm215_vm10, %v217_v54, %v213_v53 }
 0x253   :  { %v235_v45 = vpop.permute.xlu2 %234 }
 0x254   :  { %v237_v58 = vmul.f32 %v235_v45, %v218_v57  ;;  %v4601_v45 = vld [vmem:[%s6202_s1 + $0x28] sm:$0xff] }
 0x25b   :  { %v4547_v59 = vpop.permute.xlu2 %242 }
 0x25c   :  { %vm4550_vm11 = vcmp.gt.f32.partialorder %v4547_v59, %v245_v55 }
 0x25d   :  { %v4556_v0 = vsel %vm4550_vm11, %v237_v58, 0.0 }
 0x25e   :  { %v269_v1 = vsel %vm71_vm0, %v4556_v0, %v263_v60  ;;  %253 = vst.msk [vmem:[#allocation2] sm:$0xff] %vm238_vm6, %v4556_v0 }
 0x25f   :  { %v270_v2 = vsel %vm73_vm1, %v269_v1, %v267_v62  ;;  %256 = vst.msk [vmem:[#allocation2 + $0x38] sm:$0xff] %vm255_vm12, %v4556_v0 }
 0x260   :  { %v271_v3 = vpack.c.bf16 %v270_v2, %v270_v2 }
 0x262   :  { %280 = vmatmul.bf16.vlgmr.msra.gmra.mxu2 %v271_v3  ;;  %293 = vmatmul.bf16.vlgmr.msra.gmra.mxu3 %v271_v3 }
 0x263   :  { %v250_v7 = vpop.permute.xlu2 %249  ;;  %722 = vmatpush.bf16.msra.mxu2 %v4314_v5  ;;  %735 = vmatpush.bf16.msra.mxu3 %v4316_v6 }
 0x264   :  { %v4569_v8 = vsel %vm4550_vm11, %v250_v7, 0.0  ;;  %v4235_v7 = vmov 6.0  }
 0x265   :  { %338 = vrot.lane.b32.xlu1 %v4569_v8, %s4231_s17 }
 0x267   :  { %723 = vmatpush.bf16.msra.mxu2 %v4332_v11  ;;  %736 = vmatpush.bf16.msra.mxu3 %v4334_v12 }
 0x26b   :  { %724 = vmatpush.bf16.msra.mxu2 %v4355_v18  ;;  %737 = vmatpush.bf16.msra.mxu3 %v4357_v19 }
 0x26d   :  { %376 = vrot.lane.b32.xlu1 %v4594_v44, %s4231_s17 }
 0x26f   :  { %725 = vmatpush.bf16.msra.mxu2 %v4376_v24  ;;  %738 = vmatpush.bf16.msra.mxu3 %v4378_v25 }
 0x273   :  { %726 = vmatpush.bf16.msra.mxu2 %v4396_v30  ;;  %739 = vmatpush.bf16.msra.mxu3 %v4398_v31 }
 0x277   :  { %727 = vmatpush.bf16.msra.mxu2 %v4415_v35  ;;  %740 = vmatpush.bf16.msra.mxu3 %v4420_v37 }
 0x27b   :  { %728 = vmatpush.bf16.msra.mxu2 %v4434_v41  ;;  %741 = vmatpush.bf16.msra.mxu3 %v4440_v43 }
 0x27f   :  { %729 = vmatpush.bf16.msra.mxu2 %v4455_v47  ;;  %742 = vmatpush.bf16.msra.mxu3 %v4460_v49 }
 0x2d7   :  { %v339_v46 = vpop.permute.xlu1 %338 }
 0x2e5   :  { %v281_v9 = vpop.f32.mrf.mxu2  ;;  %v294_v10 = vpop.f32.mrf.mxu3 }
 0x2e6   :  { %v295_v13 = vadd.f32 %v294_v10, %v4519_v56  ;;  %v282_v17 = vadd.f32 %v281_v9, %v4523_v63  ;;  %v358_v9 = vsel %vm238_vm6, 1.0, %v4235_v7  ;;  %v4659_v7 = vld [vmem:[%s6202_s1 + $0x18] sm:$0xff] }
 0x2e8   :  { %3926 = vtanh.f32 %v295_v13  ;;  %v3533_v20 = vmul.f32 -1.442695, %v282_v17  ;;  %v3534_v53 = vmul.f32 -1.442695, %v295_v13  ;;  %v359_v13 = vperm.slane %v358_v9, 0 }
 0x2ea   :  { %3928 = vpow2.f32 %v3533_v20  ;;  %v377_v20 = vpop.permute.xlu1 %376  ;;  %vm4609_vm8 = vcmp.gt.f32.partialorder %v4547_v59, %v359_v13 }
 0x2ed   :  { %v283_v14 = vpop.f32.mrf.mxu2  ;;  %v296_v15 = vpop.f32.mrf.mxu3 }
 0x2ee   :  { %v3927_v16 = vpop.eup %3926 }
 0x2ef   :  { %343 = vrot.lane.b32.xlu0 %v3927_v16, %s4231_s17 }
 0x2f0   :  { %v3929_v21 = vpop.eup %3928 }
 0x2f1   :  { %v304_v22 = vadd.f32 1.0, %v3929_v21 }
 0x2f3   :  { %3930 = vrcp.f32 %v304_v22  ;;  %v317_v33 = vand.u32 2147483648, %v304_v22  ;;  %vm311_vm14 = vweird.f32 %v304_v22  ;;  %v315_v34 = vand.u32 2147483647, %v304_v22 }
 0x2f5   :  { %v318_v38 = vor.u32 1.1754944e-38, %v317_v33  ;;  %vm316_vm2 = vcmp.eq.f32.partialorder %v315_v34, 8.507059e+37 }
 0x2f9   :  { %v3931_v26 = vpop.eup %3930 }
 0x2fa   :  { %v307_v27 = vmul.f32 %v3931_v26, %v304_v22  ;;  %vm312_vm13 = vweird.f32 %v3931_v26 }
 0x2fb   :  { %vm313_vm15 = vmor %vm311_vm14, %vm312_vm13 }
 0x2fc   :  { %v308_v28 = vsub.f32 1.0, %v307_v27 }
 0x2fe   :  { %v309_v29 = vmul.f32 %v3931_v26, %v308_v28 }
 0x300   :  { %v310_v32 = vadd.f32 %v3931_v26, %v309_v29 }
 0x302   :  { %v314_v36 = vsel %vm313_vm15, %v3931_v26, %v310_v32 }
 0x303   :  { %v319_v40 = vsel %vm316_vm2, %v318_v38, %v314_v36 }
 0x304   :  { %v341_v48 = vmul.f32 %v339_v46, %v319_v40 }
 0x361   :  { %v344_v39 = vpop.permute.xlu0 %343 }
 0x362   :  { %v346_v42 = vmul.f32 %v344_v39, %v319_v40 }
 0x364   :  { %348 = vrot.lane.b32.xlu2 %v346_v42, %s4231_s17 }
 0x36c   :  { %380 = vrot.lane.b32.xlu2 %v4601_v45, %s4232_s25 }
 0x3be   :  { %v349_v50 = vpop.permute.xlu2 %348 }
 0x3bf   :  { %v351_v51 = vadd.f32 %v349_v50, %v341_v48 }
 0x3c1   :  { %3932 = vtanh.f32 %v351_v51 }
 0x3c2   :  { %3934 = vpow2.f32 %v3534_v53 }
 0x3c6   :  { %v381_v22 = vpop.permute.xlu2 %380 }
 0x3c7   :  { %v3933_v52 = vpop.eup %3932 }
 0x3c8   :  { %354 = vrot.lane.b32.xlu0 %v3933_v52, %s4231_s17  ;;  %v3935_v54 = vpop.eup %3934 }
 0x3c9   :  { %v305_v55 = vadd.f32 1.0, %v3935_v54 }
 0x3cb   :  { %3936 = vrcp.f32 %v305_v55  ;;  %v332_v2 = vand.u32 2147483648, %v305_v55  ;;  %vm326_vm4 = vweird.f32 %v305_v55  ;;  %v330_v3 = vand.u32 2147483647, %v305_v55 }
 0x3cd   :  { %v333_v14 = vor.u32 1.1754944e-38, %v332_v2  ;;  %vm331_vm7 = vcmp.eq.f32.partialorder %v330_v3, 8.507059e+37  ;;  %v3540_v3 = vld [vmem:[%s6202_s1 + $0x20] sm:$0xff] }
 0x3d0   :  { %363 = vrot.lane.b32.xlu0 %v351_v51, %s4231_s17 }
 0x3d1   :  { %v3937_v57 = vpop.eup %3936 }
 0x3d2   :  { %v322_v58 = vmul.f32 %v3937_v57, %v305_v55  ;;  %vm327_vm3 = vweird.f32 %v3937_v57 }
 0x3d3   :  { %vm328_vm5 = vmor %vm326_vm4, %vm327_vm3 }
 0x3d4   :  { %v323_v60 = vsub.f32 1.0, %v322_v58 }
 0x3d6   :  { %v324_v62 = vmul.f32 %v3937_v57, %v323_v60 }
 0x3d8   :  { %v325_v1 = vadd.f32 %v3937_v57, %v324_v62 }
 0x3da   :  { %v329_v10 = vsel %vm328_vm5, %v3937_v57, %v325_v1 }
 0x3db   :  { %v334_v15 = vsel %vm331_vm7, %v333_v14, %v329_v10 }
 0x43a   :  { %v355_v16 = vpop.permute.xlu0 %354 }
 0x43b   :  { %v357_v17 = vmul.f32 %v355_v16, %v334_v15 }
 0x43d   :  { %v4616_v26 = vsel %vm4609_vm8, %v357_v17, %v4556_v0 }
 0x43e   :  { %368 = vst.msk [vmem:[#allocation2 + $0x8] sm:$0xff] %vm238_vm6, %v4616_v26  ;;  %v383_v27 = vsel %vm71_vm0, %v4616_v26, %v377_v20 }
 0x43f   :  { %370 = vst.msk [vmem:[#allocation2 + $0x30] sm:$0xff] %vm255_vm12, %v4616_v26  ;;  %v384_v28 = vsel %vm73_vm1, %v383_v27, %v381_v22 }
 0x440   :  { %v385_v29 = vpack.c.bf16 %v384_v28, %v384_v28 }
 0x442   :  { %v364_v32 = vpop.permute.xlu0 %363  ;;  %394 = vmatmul.bf16.vlgmr.msrb.gmra.mxu0 %v385_v29  ;;  %407 = vmatmul.bf16.vlgmr.msrb.gmra.mxu1 %v385_v29 }
 0x443   :  { %v4628_v0 = vsel %vm4609_vm8, %v364_v32, %v4569_v8  ;;  %832 = vmatpush.bf16.msrb.mxu0 %v4314_v5  ;;  %845 = vmatpush.bf16.msrb.mxu1 %v4316_v6 }
 0x444   :  { %452 = vrot.lane.b32.xlu2 %v4628_v0, %s4231_s17 }
 0x447   :  { %833 = vmatpush.bf16.msrb.mxu0 %v4332_v11  ;;  %846 = vmatpush.bf16.msrb.mxu1 %v4334_v12 }
 0x44b   :  { %834 = vmatpush.bf16.msrb.mxu0 %v4355_v18  ;;  %847 = vmatpush.bf16.msrb.mxu1 %v4357_v19 }
 0x44c   :  { %490 = vrot.lane.b32.xlu2 %v4659_v7, %s4231_s17 }
 0x44f   :  { %835 = vmatpush.bf16.msrb.mxu0 %v4376_v24  ;;  %848 = vmatpush.bf16.msrb.mxu1 %v4378_v25 }
 0x453   :  { %836 = vmatpush.bf16.msrb.mxu0 %v4396_v30  ;;  %849 = vmatpush.bf16.msrb.mxu1 %v4398_v31 }
 0x457   :  { %837 = vmatpush.bf16.msrb.mxu0 %v4415_v35  ;;  %850 = vmatpush.bf16.msrb.mxu1 %v4420_v37 }
 0x45b   :  { %838 = vmatpush.bf16.msrb.mxu0 %v4434_v41  ;;  %851 = vmatpush.bf16.msrb.mxu1 %v4440_v43 }
 0x45f   :  { %839 = vmatpush.bf16.msrb.mxu0 %v4455_v47  ;;  %852 = vmatpush.bf16.msrb.mxu1 %v4460_v49 }
 0x49e   :  { %v453_v9 = vpop.permute.xlu2 %452 }
 0x4bf   :  { %v395_v8 = vpop.f32.mrf.mxu0  ;;  %v408_v33 = vpop.f32.mrf.mxu1 }
 0x4c0   :  { %v409_v34 = vadd.f32 %v408_v33, %v4519_v56  ;;  %v396_v40 = vadd.f32 %v395_v8, %v4523_v63 }
 0x4c2   :  { %3938 = vtanh.f32 %v409_v34  ;;  %v3537_v42 = vmul.f32 -1.442695, %v396_v40  ;;  %v3538_v16 = vmul.f32 -1.442695, %v409_v34 }
 0x4c4   :  { %3940 = vpow2.f32 %v3537_v42 }
 0x4c7   :  { %v397_v36 = vpop.f32.mrf.mxu0  ;;  %v410_v38 = vpop.f32.mrf.mxu1 }
 0x4c8   :  { %v3939_v39 = vpop.eup %3938  ;;  %v4236_v36 = vmov 5.0  }
 0x4c9   :  { %457 = vrot.lane.b32.xlu1 %v3939_v39, %s4231_s17  ;;  %v472_v38 = vsel %vm238_vm6, 2.0, %v4236_v36 }
 0x4ca   :  { %v3941_v46 = vpop.eup %3940  ;;  %v473_v34 = vperm.slane %v472_v38, 0 }
 0x4cb   :  { %v418_v48 = vadd.f32 1.0, %v3941_v46 }
 0x4cc   :  { %vm4667_vm5 = vcmp.gt.f32.partialorder %v4547_v59, %v473_v34 }
 0x4cd   :  { %3942 = vrcp.f32 %v418_v48  ;;  %v431_v55 = vand.u32 2147483648, %v418_v48  ;;  %vm425_vm10 = vweird.f32 %v418_v48  ;;  %v429_v57 = vand.u32 2147483647, %v418_v48 }
 0x4cf   :  { %v432_v60 = vor.u32 1.1754944e-38, %v431_v55  ;;  %vm430_vm14 = vcmp.eq.f32.partialorder %v429_v57, 8.507059e+37 }
 0x4d3   :  { %v3943_v50 = vpop.eup %3942 }
 0x4d4   :  { %v421_v51 = vmul.f32 %v3943_v50, %v418_v48  ;;  %vm426_vm9 = vweird.f32 %v3943_v50 }
 0x4d5   :  { %vm427_vm13 = vmor %vm425_vm10, %vm426_vm9 }
 0x4d6   :  { %v422_v52 = vsub.f32 1.0, %v421_v51 }
 0x4d8   :  { %v423_v53 = vmul.f32 %v3943_v50, %v422_v52 }
 0x4da   :  { %v424_v54 = vadd.f32 %v3943_v50, %v423_v53 }
 0x4dc   :  { %v428_v58 = vsel %vm427_vm13, %v3943_v50, %v424_v54  ;;  %v491_v50 = vpop.permute.xlu2 %490 }
 0x4dd   :  { %v433_v1 = vsel %vm430_vm14, %v432_v60, %v428_v58 }
 0x4de   :  { %v455_v10 = vmul.f32 %v453_v9, %v433_v1 }
 0x53b   :  { %v458_v62 = vpop.permute.xlu1 %457 }
 0x53c   :  { %v460_v2 = vmul.f32 %v458_v62, %v433_v1 }
 0x53e   :  { %462 = vrot.lane.b32.xlu0 %v460_v2, %s4231_s17 }
 0x546   :  { %494 = vrot.lane.b32.xlu0 %v3540_v3, %s4232_s25 }
 0x5b0   :  { %v463_v14 = vpop.permute.xlu0 %462 }
 0x5b1   :  { %v465_v13 = vadd.f32 %v463_v14, %v455_v10 }
 0x5b3   :  { %3944 = vtanh.f32 %v465_v13 }
 0x5b4   :  { %3946 = vpow2.f32 %v3538_v16 }
 0x5b8   :  { %v495_v52 = vpop.permute.xlu0 %494 }
 0x5b9   :  { %v3945_v15 = vpop.eup %3944 }
 0x5ba   :  { %468 = vrot.lane.b32.xlu1 %v3945_v15, %s4231_s17  ;;  %v3947_v17 = vpop.eup %3946 }
 0x5bb   :  { %v419_v20 = vadd.f32 1.0, %v3947_v17 }
 0x5bd   :  { %3948 = vrcp.f32 %v419_v20  ;;  %v446_v8 = vand.u32 2147483648, %v419_v20  ;;  %vm440_vm2 = vweird.f32 %v419_v20  ;;  %v444_v33 = vand.u32 2147483647, %v419_v20 }
 0x5bf   :  { %v447_v40 = vor.u32 1.1754944e-38, %v446_v8  ;;  %vm445_vm4 = vcmp.eq.f32.partialorder %v444_v33, 8.507059e+37  ;;  %v4237_v33 = vmov 4.0  }
 0x5c0   :  { %v586_v36 = vsel %vm238_vm6, 3.0, %v4237_v33 }
 0x5c2   :  { %477 = vrot.lane.b32.xlu1 %v465_v13, %s4231_s17 }
 0x5c3   :  { %v3949_v22 = vpop.eup %3948 }
 0x5c4   :  { %v436_v27 = vmul.f32 %v3949_v22, %v419_v20  ;;  %vm441_vm15 = vweird.f32 %v3949_v22 }
 0x5c5   :  { %vm442_vm3 = vmor %vm440_vm2, %vm441_vm15 }
 0x5c6   :  { %v437_v28 = vsub.f32 1.0, %v436_v27 }
 0x5c8   :  { %v438_v29 = vmul.f32 %v3949_v22, %v437_v28 }
 0x5ca   :  { %v439_v32 = vadd.f32 %v3949_v22, %v438_v29 }
 0x5cc   :  { %v443_v39 = vsel %vm442_vm3, %v3949_v22, %v439_v32 }
 0x5cd   :  { %v448_v42 = vsel %vm445_vm4, %v447_v40, %v443_v39  ;;  %v587_v40 = vperm.slane %v586_v36, 0 }
 0x5cf   :  { %vm4717_vm4 = vcmp.gt.f32.partialorder %v4547_v59, %v587_v40 }
 0x62c   :  { %v469_v46 = vpop.permute.xlu1 %468 }
 0x62d   :  { %v471_v48 = vmul.f32 %v469_v46, %v448_v42 }
 0x62f   :  { %v4674_v53 = vsel %vm4667_vm5, %v471_v48, %v4616_v26 }
 0x630   :  { %482 = vst.msk [vmem:[#allocation2 + $0x10] sm:$0xff] %vm238_vm6, %v4674_v53  ;;  %v497_v54 = vsel %vm71_vm0, %v4674_v53, %v491_v50 }
 0x631   :  { %484 = vst.msk [vmem:[#allocation2 + $0x28] sm:$0xff] %vm255_vm12, %v4674_v53  ;;  %v498_v55 = vsel %vm73_vm1, %v497_v54, %v495_v52 }
 0x632   :  { %v499_v57 = vpack.c.bf16 %v498_v55, %v498_v55 }
 0x634   :  { %v478_v58 = vpop.permute.xlu1 %477  ;;  %508 = vmatmul.bf16.vlgmr.msrb.gmra.mxu2 %v499_v57  ;;  %521 = vmatmul.bf16.vlgmr.msrb.gmra.mxu3 %v499_v57 }
 0x635   :  { %v4686_v26 = vsel %vm4667_vm5, %v478_v58, %v4628_v0  ;;  %942 = vmatpush.bf16.msrb.mxu2 %v4314_v5  ;;  %955 = vmatpush.bf16.msrb.mxu3 %v4316_v6 }
 0x636   :  { %566 = vrot.lane.b32.xlu0 %v4686_v26, %s4231_s17 }
 0x639   :  { %943 = vmatpush.bf16.msrb.mxu2 %v4332_v11  ;;  %956 = vmatpush.bf16.msrb.mxu3 %v4334_v12 }
 0x63d   :  { %944 = vmatpush.bf16.msrb.mxu2 %v4355_v18  ;;  %957 = vmatpush.bf16.msrb.mxu3 %v4357_v19 }
 0x63e   :  { %602 = vrot.lane.b32.xlu0 %v3540_v3, %s4231_s17 }
 0x641   :  { %945 = vmatpush.bf16.msrb.mxu2 %v4376_v24  ;;  %958 = vmatpush.bf16.msrb.mxu3 %v4378_v25 }
 0x645   :  { %946 = vmatpush.bf16.msrb.mxu2 %v4396_v30  ;;  %959 = vmatpush.bf16.msrb.mxu3 %v4398_v31 }
 0x649   :  { %947 = vmatpush.bf16.msrb.mxu2 %v4415_v35  ;;  %960 = vmatpush.bf16.msrb.mxu3 %v4420_v37 }
 0x64d   :  { %948 = vmatpush.bf16.msrb.mxu2 %v4434_v41  ;;  %961 = vmatpush.bf16.msrb.mxu3 %v4440_v43 }
 0x651   :  { %949 = vmatpush.bf16.msrb.mxu2 %v4455_v47  ;;  %962 = vmatpush.bf16.msrb.mxu3 %v4460_v49 }
 0x6a8   :  { %v567_v9 = vpop.permute.xlu0 %566 }
 0x6b0   :  { %v603_v48 = vpop.permute.xlu0 %602 }
 0x6b7   :  { %v509_v5 = vpop.f32.mrf.mxu2  ;;  %v522_v6 = vpop.f32.mrf.mxu3 }
 0x6b8   :  { %v523_v11 = vadd.f32 %v522_v6, %v4519_v56  ;;  %v510_v24 = vadd.f32 %v509_v5, %v4523_v63 }
 0x6ba   :  { %3950 = vtanh.f32 %v523_v11  ;;  %v3541_v25 = vmul.f32 -1.442695, %v510_v24  ;;  %v3542_v16 = vmul.f32 -1.442695, %v523_v11 }
 0x6bc   :  { %3952 = vpow2.f32 %v3541_v25 }
 0x6bf   :  { %v511_v12 = vpop.f32.mrf.mxu2  ;;  %v524_v18 = vpop.f32.mrf.mxu3 }
 0x6c0   :  { %v3951_v19 = vpop.eup %3950 }
 0x6c1   :  { %571 = vrot.lane.b32.xlu2 %v3951_v19, %s4231_s17 }
 0x6c2   :  { %v3953_v30 = vpop.eup %3952 }
 0x6c3   :  { %v532_v31 = vadd.f32 1.0, %v3953_v30 }
 0x6c5   :  { %3954 = vrcp.f32 %v532_v31  ;;  %v545_v49 = vand.u32 2147483648, %v532_v31  ;;  %vm539_vm9 = vweird.f32 %v532_v31  ;;  %v543_v0 = vand.u32 2147483647, %v532_v31 }
 0x6c7   :  { %v546_v62 = vor.u32 1.1754944e-38, %v545_v49  ;;  %vm544_vm13 = vcmp.eq.f32.partialorder %v543_v0, 8.507059e+37 }
 0x6cb   :  { %v3955_v35 = vpop.eup %3954 }
 0x6cc   :  { %v535_v37 = vmul.f32 %v3955_v35, %v532_v31  ;;  %vm540_vm7 = vweird.f32 %v3955_v35 }
 0x6cd   :  { %vm541_vm10 = vmor %vm539_vm9, %vm540_vm7 }
 0x6ce   :  { %v536_v41 = vsub.f32 1.0, %v535_v37 }
 0x6d0   :  { %v537_v43 = vmul.f32 %v3955_v35, %v536_v41 }
 0x6d2   :  { %v538_v47 = vadd.f32 %v3955_v35, %v537_v43 }
 0x6d4   :  { %v542_v60 = vsel %vm541_vm10, %v3955_v35, %v538_v47 }
 0x6d5   :  { %v547_v2 = vsel %vm544_vm13, %v546_v62, %v542_v60 }
 0x6d6   :  { %v569_v10 = vmul.f32 %v567_v9, %v547_v2 }
 0x71b   :  { %v572_v1 = vpop.permute.xlu2 %571 }
 0x71c   :  { %v574_v3 = vmul.f32 %v572_v1, %v547_v2 }
 0x71e   :  { %576 = vrot.lane.b32.xlu1 %v574_v3, %s4231_s17 }
 0x726   :  { %606 = vrot.lane.b32.xlu1 %v4659_v7, %s4232_s25 }
 0x790   :  { %v577_v14 = vpop.permute.xlu1 %576 }
 0x791   :  { %v579_v13 = vadd.f32 %v577_v14, %v569_v10 }
 0x793   :  { %3956 = vtanh.f32 %v579_v13 }
 0x794   :  { %3958 = vpow2.f32 %v3542_v16 }
 0x798   :  { %v607_v52 = vpop.permute.xlu1 %606 }
 0x799   :  { %v3957_v15 = vpop.eup %3956 }
 0x79a   :  { %582 = vrot.lane.b32.xlu2 %v3957_v15, %s4231_s17  ;;  %v3959_v17 = vpop.eup %3958 }
 0x79b   :  { %v533_v20 = vadd.f32 1.0, %v3959_v17 }
 0x79d   :  { %3960 = vrcp.f32 %v533_v20  ;;  %v560_v32 = vand.u32 2147483648, %v533_v20  ;;  %vm554_vm15 = vweird.f32 %v533_v20  ;;  %v558_v8 = vand.u32 2147483647, %v533_v20 }
 0x79f   :  { %v561_v39 = vor.u32 1.1754944e-38, %v560_v32  ;;  %vm559_vm3 = vcmp.eq.f32.partialorder %v558_v8, 8.507059e+37  ;;  %v4238_v32 = vmov 3.0  }
 0x7a0   :  { %v698_v8 = vsel %vm238_vm6, 4.0, %v4238_v32 }
 0x7a2   :  { %591 = vrot.lane.b32.xlu2 %v579_v13, %s4231_s17 }
 0x7a3   :  { %v3961_v22 = vpop.eup %3960 }
 0x7a4   :  { %v550_v27 = vmul.f32 %v3961_v22, %v533_v20  ;;  %vm555_vm14 = vweird.f32 %v3961_v22 }
 0x7a5   :  { %vm556_vm2 = vmor %vm554_vm15, %vm555_vm14 }
 0x7a6   :  { %v551_v28 = vsub.f32 1.0, %v550_v27 }
 0x7a8   :  { %v552_v29 = vmul.f32 %v3961_v22, %v551_v28 }
 0x7aa   :  { %v553_v7 = vadd.f32 %v3961_v22, %v552_v29 }
 0x7ac   :  { %v557_v38 = vsel %vm556_vm2, %v3961_v22, %v553_v7 }
 0x7ad   :  { %v562_v34 = vsel %vm559_vm3, %v561_v39, %v557_v38  ;;  %v699_v38 = vperm.slane %v698_v8, 0 }
 0x7f4   :  { %v583_v42 = vpop.permute.xlu2 %582 }
 0x7f5   :  { %v585_v46 = vmul.f32 %v583_v42, %v562_v34 }
 0x7f7   :  { %v4724_v54 = vsel %vm4717_vm4, %v585_v46, %v4674_v53 }
 0x7f8   :  { %596 = vst.msk [vmem:[#allocation2 + $0x18] sm:$0xff] %vm238_vm6, %v4724_v54  ;;  %v609_v55 = vsel %vm71_vm0, %v4724_v54, %v603_v48 }
 0x7f9   :  { %598 = vst.msk [vmem:[#allocation2 + $0x20] sm:$0xff] %vm255_vm12, %v4724_v54  ;;  %v610_v57 = vsel %vm73_vm1, %v609_v55, %v607_v52 }
 0x7fa   :  { %v611_v58 = vpack.c.bf16 %v610_v57, %v610_v57 }
 0x7fc   :  { %620 = vmatmul.bf16.vlgmr.msra.gmra.mxu0 %v611_v58  ;;  %633 = vmatmul.bf16.vlgmr.msra.gmra.mxu1 %v611_v58  ;;  %v592_v5 = vpop.permute.xlu2 %591 }
 0x7fd   :  { %v4736_v53 = vsel %vm4717_vm4, %v592_v5, %v4686_v26 }
 0x7fe   :  { %678 = vrot.lane.b32.xlu1 %v4736_v53, %s4231_s17 }
 0x806   :  { %712 = vrot.lane.b32.xlu1 %v4601_v45, %s4231_s17 }
 0x870   :  { %v679_v3 = vpop.permute.xlu1 %678 }
 0x878   :  { %v713_v42 = vpop.permute.xlu1 %712 }
 0x879   :  { %v621_v6 = vpop.f32.mrf.mxu0  ;;  %v634_v11 = vpop.f32.mrf.mxu1 }
 0x87a   :  { %v635_v12 = vadd.f32 %v634_v11, %v4519_v56  ;;  %v622_v25 = vadd.f32 %v621_v6, %v4523_v63 }
 0x87c   :  { %3962 = vtanh.f32 %v635_v12  ;;  %v3545_v26 = vmul.f32 -1.442695, %v622_v25  ;;  %v3546_v15 = vmul.f32 -1.442695, %v635_v12 }
 0x87e   :  { %3964 = vpow2.f32 %v3545_v26 }
 0x881   :  { %v623_v18 = vpop.f32.mrf.mxu0  ;;  %v636_v19 = vpop.f32.mrf.mxu1 }
 0x882   :  { %v3963_v24 = vpop.eup %3962 }
 0x883   :  { %683 = vrot.lane.b32.xlu0 %v3963_v24, %s4231_s17 }
 0x884   :  { %v3965_v30 = vpop.eup %3964 }
 0x885   :  { %v644_v31 = vadd.f32 1.0, %v3965_v30 }
 0x887   :  { %3966 = vrcp.f32 %v644_v31  ;;  %v657_v47 = vand.u32 2147483648, %v644_v31  ;;  %vm651_vm9 = vweird.f32 %v644_v31  ;;  %v655_v49 = vand.u32 2147483647, %v644_v31 }
 0x889   :  { %v658_v60 = vor.u32 1.1754944e-38, %v657_v47  ;;  %vm656_vm13 = vcmp.eq.f32.partialorder %v655_v49, 8.507059e+37 }
 0x88d   :  { %v3967_v35 = vpop.eup %3966 }
 0x88e   :  { %v647_v37 = vmul.f32 %v3967_v35, %v644_v31  ;;  %vm652_vm7 = vweird.f32 %v3967_v35 }
 0x88f   :  { %vm653_vm10 = vmor %vm651_vm9, %vm652_vm7  ;;  %vm4752_vm7 = vcmp.gt.f32.partialorder %v4547_v59, %v699_v38 }
 0x890   :  { %v648_v45 = vsub.f32 1.0, %v647_v37 }
 0x892   :  { %v649_v41 = vmul.f32 %v3967_v35, %v648_v45 }
 0x894   :  { %v650_v43 = vadd.f32 %v3967_v35, %v649_v41 }
 0x896   :  { %v654_v0 = vsel %vm653_vm10, %v3967_v35, %v650_v43 }
 0x897   :  { %v659_v1 = vsel %vm656_vm13, %v658_v60, %v654_v0 }
 0x898   :  { %v681_v9 = vmul.f32 %v679_v3, %v659_v1 }
 0x8f5   :  { %v684_v62 = vpop.permute.xlu0 %683 }
 0x8f6   :  { %v686_v2 = vmul.f32 %v684_v62, %v659_v1 }
 0x8f8   :  { %688 = vrot.lane.b32.xlu2 %v686_v2, %s4231_s17 }
 0x900   :  { %716 = vrot.lane.b32.xlu2 %v4594_v44, %s4232_s25 }
 0x952   :  { %v689_v10 = vpop.permute.xlu2 %688 }
 0x953   :  { %v691_v14 = vadd.f32 %v689_v10, %v681_v9 }
 0x955   :  { %3968 = vtanh.f32 %v691_v14 }
 0x956   :  { %3970 = vpow2.f32 %v3546_v15 }
 0x95a   :  { %v717_v48 = vpop.permute.xlu2 %716 }
 0x95b   :  { %v3969_v13 = vpop.eup %3968 }
 0x95c   :  { %694 = vrot.lane.b32.xlu0 %v3969_v13, %s4231_s17  ;;  %v3971_v16 = vpop.eup %3970 }
 0x95d   :  { %v645_v17 = vadd.f32 1.0, %v3971_v16 }
 0x95f   :  { %3972 = vrcp.f32 %v645_v17  ;;  %v672_v29 = vand.u32 2147483648, %v645_v17  ;;  %vm666_vm15 = vweird.f32 %v645_v17  ;;  %v670_v7 = vand.u32 2147483647, %v645_v17 }
 0x961   :  { %v673_v36 = vor.u32 1.1754944e-38, %v672_v29  ;;  %vm671_vm3 = vcmp.eq.f32.partialorder %v670_v7, 8.507059e+37 }
 0x964   :  { %703 = vrot.lane.b32.xlu0 %v691_v14, %s4231_s17 }
 0x965   :  { %v3973_v20 = vpop.eup %3972 }
 0x966   :  { %v662_v22 = vmul.f32 %v3973_v20, %v645_v17  ;;  %vm667_vm14 = vweird.f32 %v3973_v20 }
 0x967   :  { %vm668_vm2 = vmor %vm666_vm15, %vm667_vm14 }
 0x968   :  { %v663_v27 = vsub.f32 1.0, %v662_v22 }
 0x96a   :  { %v664_v28 = vmul.f32 %v3973_v20, %v663_v27 }
 0x96c   :  { %v665_v44 = vadd.f32 %v3973_v20, %v664_v28 }
 0x96e   :  { %v669_v33 = vsel %vm668_vm2, %v3973_v20, %v665_v44  ;;  %v4239_v44 = vmov 2.0  }
 0x96f   :  { %v674_v39 = vsel %vm671_vm3, %v673_v36, %v669_v33  ;;  %v808_v29 = vsel %vm238_vm6, 5.0, %v4239_v44  ;;  %v4240_v44 = vmov 1.0  }
 0x970   :  { %v809_v8 = vperm.slane %v808_v29, 0  ;;  %v918_v29 = vsel %vm238_vm6, 6.0, %v4240_v44  ;;  %v3642_v44 = vld [vmem:[%s6205_s4 + $0xa8] sm:$0xf0] }
 0x9ce   :  { %v695_v40 = vpop.permute.xlu0 %694 }
 0x9cf   :  { %v697_v34 = vmul.f32 %v695_v40, %v674_v39 }
 0x9d1   :  { %v4759_v52 = vsel %vm4752_vm7, %v697_v34, %v4724_v54 }
 0x9d2   :  { %707 = vst.msk [vmem:[#allocation2 + $0x20] sm:$0xff] %vm238_vm6, %v4759_v52  ;;  %v719_v55 = vsel %vm71_vm0, %v4759_v52, %v713_v42 }
 0x9d3   :  { %708 = vst.msk [vmem:[#allocation2 + $0x18] sm:$0xff] %vm255_vm12, %v4759_v52  ;;  %v720_v57 = vsel %vm73_vm1, %v719_v55, %v717_v48 }
 0x9d4   :  { %v721_v58 = vpack.c.bf16 %v720_v57, %v720_v57 }
 0x9d6   :  { %v704_v5 = vpop.permute.xlu0 %703  ;;  %730 = vmatmul.bf16.vlgmr.msra.gmra.mxu2 %v721_v58  ;;  %743 = vmatmul.bf16.vlgmr.msra.gmra.mxu3 %v721_v58 }
 0x9d7   :  { %v4771_v54 = vsel %vm4752_vm7, %v704_v5, %v4736_v53 }
 0x9d8   :  { %788 = vrot.lane.b32.xlu2 %v4771_v54, %s4231_s17 }
 0x9e0   :  { %822 = vrot.lane.b32.xlu2 %v4537_v23, %s4231_s17 }
 0xa32   :  { %v789_v1 = vpop.permute.xlu2 %788 }
 0xa3a   :  { %v823_v39 = vpop.permute.xlu2 %822 }
 0xa59   :  { %v731_v6 = vpop.f32.mrf.mxu2  ;;  %v744_v11 = vpop.f32.mrf.mxu3 }
 0xa5a   :  { %v745_v12 = vadd.f32 %v744_v11, %v4519_v56  ;;  %v732_v25 = vadd.f32 %v731_v6, %v4523_v63 }
 0xa5c   :  { %3974 = vtanh.f32 %v745_v12  ;;  %v3549_v53 = vmul.f32 -1.442695, %v732_v25  ;;  %v3550_v14 = vmul.f32 -1.442695, %v745_v12 }
 0xa5e   :  { %3976 = vpow2.f32 %v3549_v53 }
 0xa61   :  { %v733_v18 = vpop.f32.mrf.mxu2  ;;  %v746_v19 = vpop.f32.mrf.mxu3 }
 0xa62   :  { %v3975_v24 = vpop.eup %3974 }
 0xa63   :  { %793 = vrot.lane.b32.xlu1 %v3975_v24, %s4231_s17 }
 0xa64   :  { %v3977_v26 = vpop.eup %3976 }
 0xa65   :  { %v754_v30 = vadd.f32 1.0, %v3977_v26  ;;  %v3555_v26 = vld [vmem:[%s6202_s1 + $0x38] sm:$0xff] }
 0xa67   :  { %3978 = vrcp.f32 %v754_v30  ;;  %v767_v41 = vand.u32 2147483648, %v754_v30  ;;  %vm761_vm10 = vweird.f32 %v754_v30  ;;  %v765_v43 = vand.u32 2147483647, %v754_v30 }
 0xa69   :  { %v768_v49 = vor.u32 1.1754944e-38, %v767_v41  ;;  %vm766_vm14 = vcmp.eq.f32.partialorder %v765_v43, 8.507059e+37 }
 0xa6d   :  { %v3979_v31 = vpop.eup %3978 }
 0xa6e   :  { %v757_v35 = vmul.f32 %v3979_v31, %v754_v30  ;;  %vm762_vm9 = vweird.f32 %v3979_v31 }
 0xa6f   :  { %vm763_vm13 = vmor %vm761_vm10, %vm762_vm9  ;;  %vm4787_vm10 = vcmp.gt.f32.partialorder %v4547_v59, %v809_v8  ;;  %v919_v8 = vperm.slane %v918_v29, 0 }
 0xa70   :  { %v758_v23 = vsub.f32 1.0, %v757_v35 }
 0xa72   :  { %v759_v37 = vmul.f32 %v3979_v31, %v758_v23 }
 0xa74   :  { %v760_v45 = vadd.f32 %v3979_v31, %v759_v37 }
 0xa76   :  { %v764_v47 = vsel %vm763_vm13, %v3979_v31, %v760_v45 }
 0xa77   :  { %v769_v60 = vsel %vm766_vm14, %v768_v49, %v764_v47 }
 0xa78   :  { %v791_v2 = vmul.f32 %v789_v1, %v769_v60 }
 0xad5   :  { %v794_v0 = vpop.permute.xlu1 %793 }
 0xad6   :  { %v796_v62 = vmul.f32 %v794_v0, %v769_v60 }
 0xad8   :  { %798 = vrot.lane.b32.xlu0 %v796_v62, %s4231_s17  ;;  %v930_v62 = vld [vmem:[%s6202_s1] sm:$0xff] }
 0xae0   :  { %826 = vrot.lane.b32.xlu0 %v4529_v4, %s4232_s25 }
 0xb4a   :  { %v799_v3 = vpop.permute.xlu0 %798 }
 0xb4b   :  { %v801_v9 = vadd.f32 %v799_v3, %v791_v2 }
 0xb4d   :  { %3980 = vtanh.f32 %v801_v9 }
 0xb4e   :  { %3982 = vpow2.f32 %v3550_v14 }
 0xb52   :  { %v827_v34 = vpop.permute.xlu0 %826 }
 0xb53   :  { %v3981_v10 = vpop.eup %3980 }
 0xb54   :  { %804 = vrot.lane.b32.xlu1 %v3981_v10, %s4231_s17  ;;  %v3983_v13 = vpop.eup %3982 }
 0xb55   :  { %v755_v15 = vadd.f32 1.0, %v3983_v13 }
 0xb57   :  { %3984 = vrcp.f32 %v755_v15  ;;  %v782_v27 = vand.u32 2147483648, %v755_v15  ;;  %vm776_vm2 = vweird.f32 %v755_v15  ;;  %v780_v28 = vand.u32 2147483647, %v755_v15 }
 0xb59   :  { %v783_v32 = vor.u32 1.1754944e-38, %v782_v27  ;;  %vm781_vm9 = vcmp.eq.f32.partialorder %v780_v28, 8.507059e+37 }
 0xb5c   :  { %813 = vrot.lane.b32.xlu1 %v801_v9, %s4231_s17 }
 0xb5d   :  { %v3985_v16 = vpop.eup %3984 }
 0xb5e   :  { %v772_v17 = vmul.f32 %v3985_v16, %v755_v15  ;;  %vm777_vm15 = vweird.f32 %v3985_v16 }
 0xb5f   :  { %vm778_vm3 = vmor %vm776_vm2, %vm777_vm15 }
 0xb60   :  { %v773_v20 = vsub.f32 1.0, %v772_v17 }
 0xb62   :  { %v774_v22 = vmul.f32 %v3985_v16, %v773_v20 }
 0xb64   :  { %v775_v4 = vadd.f32 %v3985_v16, %v774_v22 }
 0xb66   :  { %v779_v7 = vsel %vm778_vm3, %v3985_v16, %v775_v4 }
 0xb67   :  { %v784_v33 = vsel %vm781_vm9, %v783_v32, %v779_v7 }
 0xbc6   :  { %v805_v36 = vpop.permute.xlu1 %804 }
 0xbc7   :  { %v807_v38 = vmul.f32 %v805_v36, %v784_v33 }
 0xbc9   :  { %v4794_v42 = vsel %vm4787_vm10, %v807_v38, %v4759_v52 }
 0xbca   :  { %817 = vst.msk [vmem:[#allocation2 + $0x28] sm:$0xff] %vm238_vm6, %v4794_v42  ;;  %v829_v48 = vsel %vm71_vm0, %v4794_v42, %v823_v39 }
 0xbcb   :  { %818 = vst.msk [vmem:[#allocation2 + $0x10] sm:$0xff] %vm255_vm12, %v4794_v42  ;;  %v830_v55 = vsel %vm73_vm1, %v829_v48, %v827_v34 }
 0xbcc   :  { %v831_v57 = vpack.c.bf16 %v830_v55, %v830_v55 }
 0xbce   :  { %v814_v58 = vpop.permute.xlu1 %813  ;;  %840 = vmatmul.bf16.vlgmr.msrb.gmra.mxu0 %v831_v57  ;;  %853 = vmatmul.bf16.vlgmr.msrb.gmra.mxu1 %v831_v57 }
 0xbcf   :  { %v4806_v52 = vsel %vm4787_vm10, %v814_v58, %v4771_v54 }
 0xbd0   :  { %898 = vrot.lane.b32.xlu0 %v4806_v52, %s4231_s17 }
 0xbd8   :  { %932 = vrot.lane.b32.xlu0 %v3555_v26, %s4231_s17 }
 0xc42   :  { %v899_v1 = vpop.permute.xlu0 %898 }
 0xc4a   :  { %v933_v39 = vpop.permute.xlu0 %932 }
 0xc4b   :  { %v841_v5 = vpop.f32.mrf.mxu0  ;;  %v854_v6 = vpop.f32.mrf.mxu1 }
 0xc4c   :  { %v855_v11 = vadd.f32 %v854_v6, %v4519_v56  ;;  %v842_v24 = vadd.f32 %v841_v5, %v4523_v63 }
 0xc4e   :  { %3986 = vtanh.f32 %v855_v11  ;;  %v3553_v25 = vmul.f32 -1.442695, %v842_v24  ;;  %v3554_v14 = vmul.f32 -1.442695, %v855_v11 }
 0xc50   :  { %3988 = vpow2.f32 %v3553_v25 }
 0xc53   :  { %v843_v12 = vpop.f32.mrf.mxu0  ;;  %v856_v18 = vpop.f32.mrf.mxu1 }
 0xc54   :  { %v3987_v19 = vpop.eup %3986 }
 0xc55   :  { %903 = vrot.lane.b32.xlu2 %v3987_v19, %s4231_s17 }
 0xc56   :  { %v3989_v53 = vpop.eup %3988 }
 0xc57   :  { %v864_v54 = vadd.f32 1.0, %v3989_v53 }
 0xc59   :  { %3990 = vrcp.f32 %v864_v54  ;;  %v877_v45 = vand.u32 2147483648, %v864_v54  ;;  %vm871_vm14 = vweird.f32 %v864_v54  ;;  %v875_v41 = vand.u32 2147483647, %v864_v54 }
 0xc5b   :  { %v878_v47 = vor.u32 1.1754944e-38, %v877_v45  ;;  %vm876_vm2 = vcmp.eq.f32.partialorder %v875_v41, 8.507059e+37 }
 0xc5f   :  { %v3991_v30 = vpop.eup %3990 }
 0xc60   :  { %v867_v31 = vmul.f32 %v3991_v30, %v864_v54  ;;  %vm872_vm13 = vweird.f32 %v3991_v30 }
 0xc61   :  { %vm873_vm15 = vmor %vm871_vm14, %vm872_vm13 }
 0xc62   :  { %v868_v35 = vsub.f32 1.0, %v867_v31 }
 0xc64   :  { %v869_v23 = vmul.f32 %v3991_v30, %v868_v35 }
 0xc66   :  { %v870_v37 = vadd.f32 %v3991_v30, %v869_v23 }
 0xc68   :  { %v874_v43 = vsel %vm873_vm15, %v3991_v30, %v870_v37  ;;  %vm4826_vm15 = vcmp.gt.f32.partialorder %v4547_v59, %v919_v8  ;;  %v3869_v8 = vld [vmem:[%s6205_s4 + $0x94] sm:$0xf] }
 0xc69   :  { %v879_v0 = vsel %vm876_vm2, %v878_v47, %v874_v43 }
 0xc6a   :  { %v901_v2 = vmul.f32 %v899_v1, %v879_v0 }
 0xcaf   :  { %v904_v49 = vpop.permute.xlu2 %903 }
 0xcb0   :  { %v906_v60 = vmul.f32 %v904_v49, %v879_v0  ;;  %v3648_v0 = vld [vmem:[%s6205_s4 + $0xb0] sm:$0xf] }
 0xcb2   :  { %908 = vrot.lane.b32.xlu1 %v906_v60, %s4231_s17  ;;  %v3874_v60 = vld [vmem:[%s6205_s4 + $0xb4] sm:$0xf0] }
 0xcb3   :  { %v4859_v1 = vor.u32 %v3874_v60, %v3648_v0  ;;  %v3610_v0 = vld [vmem:[%s6205_s4 + $0x68] sm:$0xf0] }
 0xcb5   :  { %1213 = vmatpush.bf16.msra.mxu1 %v4859_v1 }
 0xcba   :  { %936 = vrot.lane.b32.xlu1 %v930_v62, %s4232_s25  ;;  %v3873_v62 = vld [vmem:[%s6205_s4 + $0xb4] sm:$0xf] }
 0xd24   :  { %v909_v3 = vpop.permute.xlu1 %908 }
 0xd25   :  { %v911_v9 = vadd.f32 %v909_v3, %v901_v2  ;;  %v3650_v2 = vld [vmem:[%s6205_s4 + $0xb8] sm:$0xf0] }
 0xd26   :  { %v4864_v3 = vor.u32 %v3873_v62, %v3650_v2 }
 0xd27   :  { %3992 = vtanh.f32 %v911_v9 }
 0xd28   :  { %3994 = vpow2.f32 %v3554_v14  ;;  %1239 = vmatpush.bf16.msra.mxu3 %v4864_v3 }
 0xd2c   :  { %v937_v48 = vpop.permute.xlu1 %936 }
 0xd2d   :  { %v3993_v10 = vpop.eup %3992 }
 0xd2e   :  { %914 = vrot.lane.b32.xlu2 %v3993_v10, %s4231_s17  ;;  %v3995_v13 = vpop.eup %3994 }
 0xd2f   :  { %v865_v15 = vadd.f32 1.0, %v3995_v13 }
 0xd31   :  { %3996 = vrcp.f32 %v865_v15  ;;  %v892_v27 = vand.u32 2147483648, %v865_v15  ;;  %vm886_vm9 = vweird.f32 %v865_v15  ;;  %v890_v28 = vand.u32 2147483647, %v865_v15 }
 0xd33   :  { %v893_v32 = vor.u32 1.1754944e-38, %v892_v27  ;;  %vm891_vm14 = vcmp.eq.f32.partialorder %v890_v28, 8.507059e+37  ;;  %v3871_v27 = vld [vmem:[%s6205_s4 + $0xa4] sm:$0xf] }
 0xd34   :  { %v4883_v29 = vor.u32 %v3871_v27, %v3642_v44  ;;  %v3584_v44 = vld [vmem:[%s6205_s4 + $0x30] sm:$0xf] }
 0xd36   :  { %923 = vrot.lane.b32.xlu2 %v911_v9, %s4231_s17  ;;  %1240 = vmatpush.bf16.msra.mxu3 %v4883_v29 }
 0xd37   :  { %v3997_v16 = vpop.eup %3996 }
 0xd38   :  { %v882_v17 = vmul.f32 %v3997_v16, %v865_v15  ;;  %vm887_vm3 = vweird.f32 %v3997_v16 }
 0xd39   :  { %vm888_vm13 = vmor %vm886_vm9, %vm887_vm3 }
 0xd3a   :  { %v883_v20 = vsub.f32 1.0, %v882_v17 }
 0xd3c   :  { %v884_v22 = vmul.f32 %v3997_v16, %v883_v20 }
 0xd3e   :  { %v885_v4 = vadd.f32 %v3997_v16, %v884_v22  ;;  %v3640_v22 = vld [vmem:[%s6205_s4 + $0xa0] sm:$0xf] }
 0xd40   :  { %v889_v7 = vsel %vm888_vm13, %v3997_v16, %v885_v4  ;;  %v3872_v4 = vld [vmem:[%s6205_s4 + $0xa4] sm:$0xf0] }
 0xd41   :  { %v894_v33 = vsel %vm891_vm14, %v893_v32, %v889_v7  ;;  %v4878_v28 = vor.u32 %v3872_v4, %v3640_v22  ;;  %v3632_v7 = vld [vmem:[%s6205_s4 + $0x90] sm:$0xf]  ;;  %v3870_v32 = vld [vmem:[%s6205_s4 + $0x94] sm:$0xf0]  ;;  %v3859_v22 = vld [vmem:[%s6205_s4 + $0x44] sm:$0xf] }
 0xd42   :  { %v3594_v4 = vld [vmem:[%s6205_s4 + $0x48] sm:$0xf0] }
 0xd43   :  { %1214 = vmatpush.bf16.msra.mxu1 %v4878_v28 }
 0xd88   :  { %v915_v36 = vpop.permute.xlu2 %914 }
 0xd89   :  { %v917_v38 = vmul.f32 %v915_v36, %v894_v33  ;;  %v4896_v33 = vor.u32 %v3870_v32, %v3632_v7  ;;  %v3634_v36 = vld [vmem:[%s6205_s4 + $0x98] sm:$0xf0]  ;;  %v3858_v7 = vld [vmem:[%s6205_s4 + $0x34] sm:$0xf0] }
 0xd8b   :  { %v4833_v55 = vsel %vm4826_vm15, %v917_v38, %v4794_v42  ;;  %v3624_v38 = vld [vmem:[%s6205_s4 + $0x80] sm:$0xf]  ;;  %1215 = vmatpush.bf16.msra.mxu1 %v4896_v33 }
 0xd8c   :  { %927 = vst.msk [vmem:[#allocation2 + $0x30] sm:$0xff] %vm238_vm6, %v4833_v55  ;;  %v939_v57 = vsel %vm71_vm0, %v4833_v55, %v933_v39  ;;  %v3868_v39 = vld [vmem:[%s6205_s4 + $0x84] sm:$0xf0] }
 0xd8d   :  { %928 = vst.msk [vmem:[#allocation2 + $0x8] sm:$0xff] %vm255_vm12, %v4833_v55  ;;  %v940_v58 = vsel %vm73_vm1, %v939_v57, %v937_v48  ;;  %v4907_v48 = vor.u32 %v3869_v8, %v3634_v36  ;;  %v3867_v57 = vld [vmem:[%s6205_s4 + $0x84] sm:$0xf]  ;;  %v5015_v8 = vor.u32 %v3859_v22, %v3594_v4  ;;  %v1058_v4 = vld [vmem:[%s6206_s5] sm:$0x3] }
 0xd8e   :  { %v941_v5 = vpack.c.bf16 %v940_v58, %v940_v58  ;;  %v3626_v58 = vld [vmem:[%s6205_s4 + $0x88] sm:$0xf0] }
 0xd8f   :  { %1241 = vmatpush.bf16.msra.mxu3 %v4907_v48 }
 0xd90   :  { %950 = vmatmul.bf16.vlgmr.msrb.gmra.mxu2 %v941_v5  ;;  %963 = vmatmul.bf16.vlgmr.msrb.gmra.mxu3 %v941_v5  ;;  %v924_v6 = vpop.permute.xlu2 %923  ;;  %v4916_v5 = vor.u32 %v3868_v39, %v3624_v38  ;;  %v3857_v39 = vld [vmem:[%s6205_s4 + $0x34] sm:$0xf] }
 0xd91   :  { %v926_v42 = vsel %vm4826_vm15, %v924_v6, %v4806_v52 }
 0xd92   :  { %1008 = vrot.lane.b32.xlu1 %v926_v42, %s4231_s17  ;;  %v4919_v42 = vor.u32 %v3867_v57, %v3626_v58  ;;  %1216 = vmatpush.bf16.msra.mxu1 %v4916_v5  ;;  %v3586_v57 = vld [vmem:[%s6205_s4 + $0x38] sm:$0xf0]  ;;  %v5025_v58 = vor.u32 %v3858_v7, %v3584_v44  ;;  %v5157_v44 = vperm.slane %v1058_v4, 1 }
 0xd94   :  { %1242 = vmatpush.bf16.msra.mxu3 %v4919_v42 }
 0xd98   :  { %1342 = vmatpush.bf16.msrb.mxu3 %v4859_v1 }
 0xd9c   :  { %1343 = vmatpush.bf16.msrb.mxu3 %v4878_v28 }
 0xda0   :  { %1344 = vmatpush.bf16.msrb.mxu3 %v4896_v33 }
 0xda4   :  { %1345 = vmatpush.bf16.msrb.mxu3 %v4916_v5 }
 0xe04   :  { %v1009_v9 = vpop.permute.xlu1 %1008 }
 0xe13   :  { %v951_v11 = vpop.f32.mrf.mxu2  ;;  %v964_v12 = vpop.f32.mrf.mxu3 }
 0xe14   :  { %v965_v18 = vadd.f32 %v964_v12, %v4519_v56  ;;  %v952_v53 = vadd.f32 %v951_v11, %v4523_v63 }
 0xe16   :  { %3998 = vtanh.f32 %v965_v18  ;;  %v3556_v54 = vmul.f32 -1.442695, %v952_v53  ;;  %v3557_v16 = vmul.f32 -1.442695, %v965_v18  ;;  %v4241_v53 = vmov 0.0  }
 0xe18   :  { %4000 = vpow2.f32 %v3556_v54  ;;  %v1028_v54 = vsel %vm238_vm6, 7.0, %v4241_v53  ;;  %v3854_v53 = vld [vmem:[%s6205_s4 + $0x14] sm:$0xf0] }
 0xe1b   :  { %v953_v19 = vpop.f32.mrf.mxu2  ;;  %v966_v24 = vpop.f32.mrf.mxu3 }
 0xe1c   :  { %v3999_v25 = vpop.eup %3998 }
 0xe1d   :  { %1013 = vrot.lane.b32.xlu0 %v3999_v25, %s4231_s17 }
 0xe1e   :  { %v4001_v26 = vpop.eup %4000 }
 0xe1f   :  { %v974_v30 = vadd.f32 1.0, %v4001_v26 }
 0xe21   :  { %4002 = vrcp.f32 %v974_v30  ;;  %v987_v56 = vand.u32 2147483648, %v974_v30  ;;  %vm981_vm2 = vweird.f32 %v974_v30  ;;  %v985_v45 = vand.u32 2147483647, %v974_v30 }
 0xe23   :  { %v988_v43 = vor.u32 1.1754944e-38, %v987_v56  ;;  %vm986_vm9 = vcmp.eq.f32.partialorder %v985_v45, 8.507059e+37  ;;  %v3618_v56 = vld [vmem:[%s6205_s4 + $0x78] sm:$0xf0]  ;;  %v3608_v45 = vld [vmem:[%s6205_s4 + $0x60] sm:$0xf] }
 0xe27   :  { %v4003_v52 = vpop.eup %4002 }
 0xe28   :  { %v977_v31 = vmul.f32 %v4003_v52, %v974_v30  ;;  %vm982_vm1 = vweird.f32 %v4003_v52 }
 0xe29   :  { %vm983_vm3 = vmor %vm981_vm2, %vm982_vm1 }
 0xe2a   :  { %v978_v35 = vsub.f32 1.0, %v977_v31  ;;  %v3616_v31 = vld [vmem:[%s6205_s4 + $0x70] sm:$0xf] }
 0xe2c   :  { %v979_v23 = vmul.f32 %v4003_v52, %v978_v35  ;;  %v3866_v35 = vld [vmem:[%s6205_s4 + $0x74] sm:$0xf0] }
 0xe2e   :  { %v980_v37 = vadd.f32 %v4003_v52, %v979_v23  ;;  %v3865_v23 = vld [vmem:[%s6205_s4 + $0x74] sm:$0xf] }
 0xe30   :  { %v984_v41 = vsel %vm983_vm3, %v4003_v52, %v980_v37  ;;  %v1029_v52 = vperm.slane %v1028_v54, 0  ;;  %v4937_v37 = vor.u32 %v3866_v35, %v3616_v31  ;;  %v3560_v31 = vld [vmem:[%s6205_s4] sm:$0xf]  ;;  %v3852_v35 = vld [vmem:[%s6205_s4 + $0x4] sm:$0xf0] }
 0xe31   :  { %v989_v63 = vsel %vm986_vm9, %v988_v43, %v984_v41  ;;  %v3864_v41 = vld [vmem:[%s6205_s4 + $0x64] sm:$0xf0]  ;;  %vm3654_vm9 = vmneg %vm71_vm0 }
 0xe32   :  { %v1011_v10 = vmul.f32 %v1009_v9, %v989_v63  ;;  %1196 = vmatpush.bf16.msra.mxu0 %v4937_v37  ;;  %v4957_v62 = vor.u32 %v3864_v41, %v3608_v45  ;;  %1325 = vmatpush.bf16.msrb.mxu1 %v4937_v37  ;;  %vm4961_vm3 = vcmp.gt.f32.partialorder %v4547_v59, %v1029_v52  ;;  %v3861_v59 = vld [vmem:[%s6205_s4 + $0x54] sm:$0xf]  ;;  %v3562_v45 = vld [vmem:[%s6205_s4 + $0x8] sm:$0xf0] }
 0xe33   :  { %v1314_v41 = vld [vmem:[#allocation2 + $0x30] sm:$0xff] }
 0xe36   :  { %1197 = vmatpush.bf16.msra.mxu0 %v4957_v62  ;;  %1326 = vmatpush.bf16.msrb.mxu1 %v4957_v62 }
 0xe8f   :  { %v1014_v47 = vpop.permute.xlu0 %1013 }
 0xe90   :  { %v1016_v49 = vmul.f32 %v1014_v47, %v989_v63  ;;  %v4948_v63 = vor.u32 %v3865_v23, %v3618_v56  ;;  %v3851_v56 = vld [vmem:[%s6205_s4 + $0x4] sm:$0xf] }
 0xe92   :  { %1018 = vrot.lane.b32.xlu2 %v1016_v49, %s4231_s17  ;;  %v3863_v49 = vld [vmem:[%s6205_s4 + $0x64] sm:$0xf]  ;;  %1222 = vmatpush.bf16.msra.mxu2 %v4948_v63 }
 0xe93   :  { %v4966_v9 = vor.u32 %v3863_v49, %v3610_v0  ;;  %v1321_v49 = vpack.c.bf16 %v1314_v41, %v1314_v41 }
 0xe96   :  { %1223 = vmatpush.bf16.msra.mxu2 %v4966_v9 }
 0xeec   :  { %v1019_v14 = vpop.permute.xlu2 %1018 }
 0xeed   :  { %v1021_v13 = vadd.f32 %v1019_v14, %v1011_v10  ;;  %v3600_v10 = vld [vmem:[%s6205_s4 + $0x50] sm:$0xf]  ;;  %v3862_v14 = vld [vmem:[%s6205_s4 + $0x54] sm:$0xf0] }
 0xeef   :  { %4004 = vtanh.f32 %v1021_v13 }
 0xef0   :  { %4006 = vpow2.f32 %v3557_v16  ;;  %v4986_v16 = vor.u32 %v3862_v14, %v3600_v10 }
 0xef2   :  { %1198 = vmatpush.bf16.msra.mxu0 %v4986_v16  ;;  %1327 = vmatpush.bf16.msrb.mxu1 %v4986_v16 }
 0xef5   :  { %v4005_v15 = vpop.eup %4004 }
 0xef6   :  { %1024 = vrot.lane.b32.xlu0 %v4005_v15, %s4231_s17  ;;  %v4007_v17 = vpop.eup %4006  ;;  %v3602_v15 = vld [vmem:[%s6205_s4 + $0x58] sm:$0xf0] }
 0xef7   :  { %v975_v20 = vadd.f32 1.0, %v4007_v17  ;;  %v3592_v17 = vld [vmem:[%s6205_s4 + $0x40] sm:$0xf] }
 0xef9   :  { %4008 = vrcp.f32 %v975_v20  ;;  %v1000_v24 = vand.u32 2147483647, %v975_v20  ;;  %v1002_v25 = vand.u32 2147483648, %v975_v20  ;;  %vm996_vm14 = vweird.f32 %v975_v20 }
 0xefb   :  { %vm1001_vm2 = vcmp.eq.f32.partialorder %v1000_v24, 8.507059e+37  ;;  %v1003_v30 = vor.u32 1.1754944e-38, %v1002_v25  ;;  %v3568_v25 = vld [vmem:[%s6205_s4 + $0x10] sm:$0xf] }
 0xefc   :  { %v5067_v52 = vor.u32 %v3854_v53, %v3568_v25 }
 0xeff   :  { %v4009_v6 = vpop.eup %4008 }
 0xf00   :  { %v992_v11 = vmul.f32 %v4009_v6, %v975_v20  ;;  %vm997_vm13 = vweird.f32 %v4009_v6  ;;  %v3860_v20 = vld [vmem:[%s6205_s4 + $0x44] sm:$0xf0] }
 0xf01   :  { %vm998_vm1 = vmor %vm996_vm14, %vm997_vm13  ;;  %v5005_v27 = vor.u32 %v3860_v20, %v3592_v17 }
 0xf02   :  { %v993_v12 = vsub.f32 1.0, %v992_v11  ;;  %v3856_v11 = vld [vmem:[%s6205_s4 + $0x24] sm:$0xf0]  ;;  %vm5123_vm13 = vmpackc.low %vm3654_vm9, %vm3654_vm9 }
 0xf03   :  { %1199 = vmatpush.bf16.msra.mxu0 %v5005_v27  ;;  %1328 = vmatpush.bf16.msrb.mxu1 %v5005_v27 }
 0xf04   :  { %v994_v18 = vmul.f32 %v4009_v6, %v993_v12  ;;  %v5036_v12 = vor.u32 %v3857_v39, %v3586_v57 }
 0xf06   :  { %v995_v19 = vadd.f32 %v4009_v6, %v994_v18  ;;  %v3855_v18 = vld [vmem:[%s6205_s4 + $0x24] sm:$0xf] }
 0xf07   :  { %1200 = vmatpush.bf16.msra.mxu0 %v5025_v58  ;;  %1329 = vmatpush.bf16.msrb.mxu1 %v5025_v58 }
 0xf08   :  { %v999_v26 = vsel %vm998_vm1, %v4009_v6, %v995_v19  ;;  %v3576_v6 = vld [vmem:[%s6205_s4 + $0x20] sm:$0xf]  ;;  %v3578_v19 = vld [vmem:[%s6205_s4 + $0x28] sm:$0xf0] }
 0xf09   :  { %v1004_v43 = vsel %vm1001_vm2, %v1003_v30, %v999_v26  ;;  %v5047_v24 = vor.u32 %v3856_v11, %v3576_v6  ;;  %v5056_v54 = vor.u32 %v3855_v18, %v3578_v19  ;;  %v3853_v26 = vld [vmem:[%s6205_s4 + $0x14] sm:$0xf]  ;;  %v3570_v30 = vld [vmem:[%s6205_s4 + $0x18] sm:$0xf0]  ;;  %v5163_v11 = vld [vmem:[#allocation2 + $0x8] sm:$0xff]  ;;  %v5167_v19 = vperm.slane %v1058_v4, 0 }
 0xf0a   :  { %v5076_v23 = vor.u32 %v3853_v26, %v3570_v30 }
 0xf0b   :  { %1201 = vmatpush.bf16.msra.mxu0 %v5047_v24  ;;  %1330 = vmatpush.bf16.msrb.mxu1 %v5047_v24 }
 0xf0f   :  { %1202 = vmatpush.bf16.msra.mxu0 %v5067_v52  ;;  %1331 = vmatpush.bf16.msrb.mxu1 %v5067_v52 }
 0xf68   :  { %v1025_v47 = vpop.permute.xlu0 %1024 }
 0xf69   :  { %v1027_v60 = vmul.f32 %v1025_v47, %v1004_v43  ;;  %v5087_v43 = vor.u32 %v3852_v35, %v3560_v31  ;;  %v5090_v47 = vor.u32 %v3851_v56, %v3562_v45 }
 0xf6b   :  { %v1031_v13 = vsel %vm4961_vm3, %v1027_v60, %v4833_v55  ;;  %v4990_v55 = vor.u32 %v3861_v59, %v3602_v15  ;;  %1203 = vmatpush.bf16.msra.mxu0 %v5087_v43  ;;  %1332 = vmatpush.bf16.msrb.mxu1 %v5087_v43 }
 0xf6c   :  { %1032 = vst.msk [vmem:[#allocation2 + $0x38] sm:$0xff] %vm238_vm6, %v1031_v13 }
 0xf6d   :  { %1033 = vst.msk [vmem:[#allocation2] sm:$0xff] %vm255_vm12, %v1031_v13  ;;  %1224 = vmatpush.bf16.msra.mxu2 %v4990_v55 }
 0xf6f   :  { %1351 = vmatpush.bf16.msrb.mxu0 %v4948_v63 }
 0xf71   :  { %1225 = vmatpush.bf16.msra.mxu2 %v5015_v8 }
 0xf73   :  { %v1065_v32 = vld [vmem:[#allocation2 + $0x38] sm:$0xff]  ;;  %1352 = vmatpush.bf16.msrb.mxu0 %v4966_v9 }
 0xf74   :  { %v1064_v36 = vld [vmem:[#allocation2] sm:$0xff]  ;;  %v1072_v38 = vpack.c.bf16 %v1065_v32, %v1065_v32 }
 0xf75   :  { %1067 = vrot.lane.b32.xlu1 %v1064_v36, %s4231_s17  ;;  %1226 = vmatpush.bf16.msra.mxu2 %v5036_v12 }
 0xf76   :  { %3659 = vmatmul.msk.bf16.vlgmr.msra.gmra.mxu1 %vm71_vm0, %v1072_v38  ;;  %3665 = vmatmul.msk.bf16.vlgmr.msra.gmra.mxu3 %vm71_vm0, %v1072_v38 }
 0xf77   :  { %1459 = vmatpush.bf16.msra.mxu3 %v4937_v37  ;;  %1476 = vmatpush.bf16.msra.mxu1 %v4859_v1 }
 0xf78   :  { %1353 = vmatpush.bf16.msrb.mxu0 %v4990_v55 }
 0xf79   :  { %1227 = vmatpush.bf16.msra.mxu2 %v5056_v54 }
 0xf7b   :  { %1460 = vmatpush.bf16.msra.mxu3 %v4957_v62  ;;  %1477 = vmatpush.bf16.msra.mxu1 %v4878_v28 }
 0xf7c   :  { %1354 = vmatpush.bf16.msrb.mxu0 %v5015_v8 }
 0xf7d   :  { %1228 = vmatpush.bf16.msra.mxu2 %v5076_v23 }
 0xf7f   :  { %1461 = vmatpush.bf16.msra.mxu3 %v4986_v16  ;;  %1478 = vmatpush.bf16.msra.mxu1 %v4896_v33 }
 0xf80   :  { %1355 = vmatpush.bf16.msrb.mxu0 %v5036_v12 }
 0xf81   :  { %1229 = vmatpush.bf16.msra.mxu2 %v5090_v47 }
 0xf83   :  { %1462 = vmatpush.bf16.msra.mxu3 %v5005_v27  ;;  %1479 = vmatpush.bf16.msra.mxu1 %v4916_v5 }
 0xf84   :  { %1356 = vmatpush.bf16.msrb.mxu0 %v5056_v54 }
 0xf85   :  { %1368 = vmatpush.bf16.msrb.mxu2 %v4864_v3 }
 0xf86   :  { %3668 = vmatmul.msk.bf16.vlgmr.msrb.gmra.mxu3 %vm71_vm0, %v1321_v49 }
 0xf87   :  { %1463 = vmatpush.bf16.msra.mxu3 %v5025_v58 }
 0xf88   :  { %1357 = vmatpush.bf16.msrb.mxu0 %v5076_v23 }
 0xf89   :  { %1369 = vmatpush.bf16.msrb.mxu2 %v4883_v29 }
 0xf8b   :  { %1464 = vmatpush.bf16.msra.mxu3 %v5047_v24 }
 0xf8c   :  { %1358 = vmatpush.bf16.msrb.mxu0 %v5090_v47 }
 0xf8d   :  { %1370 = vmatpush.bf16.msrb.mxu2 %v4907_v48 }
 0xf8f   :  { %1465 = vmatpush.bf16.msra.mxu3 %v5067_v52 }
 0xf91   :  { %1371 = vmatpush.bf16.msrb.mxu2 %v4919_v42 }
 0xf93   :  { %1466 = vmatpush.bf16.msra.mxu3 %v5087_v43 }
 0xf97   :  { %1502 = vmatpush.bf16.msrb.mxu3 %v4864_v3 }
 0xf9b   :  { %1503 = vmatpush.bf16.msrb.mxu3 %v4883_v29 }
 0xf9f   :  { %1504 = vmatpush.bf16.msrb.mxu3 %v4907_v48 }
 0xfa3   :  { %1505 = vmatpush.bf16.msrb.mxu3 %v4919_v42 }
 0xfe7   :  { %v1068_v0 = vpop.permute.xlu1 %1067 }
 0xfe8   :  { %v3657_v10 = vpack.c.bf16 %v1068_v0, %v1068_v0 }
 0xfea   :  { %3658 = vmatmul.msk.bf16.vlgmr.msra.gmra.mxu0 %vm5123_vm13, %v3657_v10  ;;  %3664 = vmatmul.msk.bf16.vlgmr.msra.gmra.mxu2 %vm5123_vm13, %v3657_v10 }
 0xfeb   :  { %1485 = vmatpush.bf16.msra.mxu2 %v4948_v63  ;;  %1619 = vmatpush.bf16.msra.mxu0 %v4948_v63 }
 0xfef   :  { %1486 = vmatpush.bf16.msra.mxu2 %v4966_v9  ;;  %1620 = vmatpush.bf16.msra.mxu0 %v4966_v9 }
 0xff3   :  { %v1218_v14 = vpop.f32.mrf.mxu1  ;;  %1487 = vmatpush.bf16.msra.mxu2 %v4990_v55  ;;  %1621 = vmatpush.bf16.msra.mxu0 %v4990_v55 }
 0xff7   :  { %1488 = vmatpush.bf16.msra.mxu2 %v5015_v8  ;;  %1622 = vmatpush.bf16.msra.mxu0 %v5015_v8 }
 0xff9   :  { %v1244_v13 = vpop.f32.mrf.mxu3 }
 0xffa   :  { %3669 = vmatmul.msk.bf16.vlgmr.msrb.gmra.mxu2 %vm71_vm0, %v1321_v49 }
 0xffb   :  { %v1220_v59 = vpop.f32.mrf.mxu1  ;;  %1489 = vmatpush.bf16.msra.mxu2 %v5036_v12  ;;  %1623 = vmatpush.bf16.msra.mxu0 %v5036_v12 }
 0xfff   :  { %1490 = vmatpush.bf16.msra.mxu2 %v5056_v54  ;;  %1624 = vmatpush.bf16.msra.mxu0 %v5056_v54 }
0x1001   :  { %v1246_v15 = vpop.f32.mrf.mxu3 }
0x1003   :  { %1491 = vmatpush.bf16.msra.mxu2 %v5076_v23  ;;  %1625 = vmatpush.bf16.msra.mxu0 %v5076_v23 }
0x1007   :  { %1492 = vmatpush.bf16.msra.mxu2 %v5090_v47  ;;  %1626 = vmatpush.bf16.msra.mxu0 %v5090_v47 }
0x1009   :  { %v5149_v17 = vpop.f32.mrf.mxu3 }
0x100b   :  { %1636 = vmatpush.bf16.msrb.mxu2 %v4864_v3 }
0x100f   :  { %1637 = vmatpush.bf16.msrb.mxu2 %v4883_v29 }
0x1011   :  { %v1349_v20 = vpop.f32.mrf.mxu3 }
0x1013   :  { %1638 = vmatpush.bf16.msrb.mxu2 %v4907_v48 }
0x1017   :  { %1639 = vmatpush.bf16.msrb.mxu2 %v4919_v42 }
0x1067   :  { %v1205_v22 = vpop.f32.mrf.mxu0 }
0x1068   :  { %v1206_v25 = vadd.f32 %v1205_v22, %v5167_v19 }
0x106a   :  { %v1219_v53 = vadd.f32 %v1218_v14, %v1206_v25 }
0x106c   :  { %v3666_v26 = vmul.f32 -1.442695, %v1219_v53 }
0x106d   :  { %v1231_v7 = vpop.f32.mrf.mxu2 }
0x106e   :  { %v1232_v32 = vadd.f32 %v1231_v7, %v5157_v44 }
0x106f   :  { %v1207_v36 = vpop.f32.mrf.mxu0 }
0x1070   :  { %v1245_v38 = vadd.f32 %v1244_v13, %v1232_v32 }
0x1072   :  { %4010 = vtanh.f32 %v1245_v38  ;;  %v3667_v36 = vmul.f32 -1.442695, %v1245_v38 }
0x1073   :  { %4012 = vpow2.f32 %v3666_v26 }
0x1075   :  { %v1233_v39 = vpop.f32.mrf.mxu2 }
0x1078   :  { %v4011_v57 = vpop.eup %4010 }
0x1079   :  { %1289 = vrot.lane.b32.xlu2 %v4011_v57, %s4231_s17  ;;  %v4013_v30 = vpop.eup %4012 }
0x107a   :  { %v1254_v31 = vadd.f32 1.0, %v4013_v30 }
0x107c   :  { %4014 = vrcp.f32 %v1254_v31  ;;  %v1267_v0 = vand.u32 2147483648, %v1254_v31  ;;  %vm1261_vm1 = vweird.f32 %v1254_v31  ;;  %v1265_v10 = vand.u32 2147483647, %v1254_v31 }
0x107d   :  { %v5161_v6 = vpop.f32.mrf.mxu2 }
0x107e   :  { %v1268_v59 = vor.u32 1.1754944e-38, %v1267_v0  ;;  %vm1266_vm9 = vcmp.eq.f32.partialorder %v1265_v10, 8.507059e+37 }
0x1081   :  { %1316 = vrot.lane.b32.xlu2 %v5163_v11, %s4231_s17 }
0x1082   :  { %v4015_v35 = vpop.eup %4014 }
0x1083   :  { %v1257_v56 = vmul.f32 %v4015_v35, %v1254_v31  ;;  %vm1262_vm14 = vweird.f32 %v4015_v35 }
0x1084   :  { %vm1263_vm2 = vmor %vm1261_vm1, %vm1262_vm14 }
0x1085   :  { %v1375_v18 = vpop.f32.mrf.mxu2  ;;  %v1258_v45 = vsub.f32 1.0, %v1257_v56 }
0x1087   :  { %v1259_v41 = vmul.f32 %v4015_v35, %v1258_v45 }
0x1089   :  { %v1260_v49 = vadd.f32 %v4015_v35, %v1259_v41 }
0x108b   :  { %v1264_v13 = vsel %vm1263_vm2, %v4015_v35, %v1260_v49 }
0x108c   :  { %v1269_v14 = vsel %vm1266_vm9, %v1268_v59, %v1264_v13  ;;  %v5179_v13 = vld [vmem:[#allocation2 + $0x10] sm:$0xff] }
0x108d   :  { %v1287_v22 = vmul.f32 0.0, %v1269_v14 }
0x10d3   :  { %v1290_v15 = vpop.permute.xlu2 %1289 }
0x10d4   :  { %v1292_v20 = vmul.f32 %v1290_v15, %v1269_v14 }
0x10d6   :  { %1294 = vrot.lane.b32.xlu0 %v1292_v20, %s4231_s17 }
0x10db   :  { %v1317_v59 = vpop.permute.xlu2 %1316 }
0x1148   :  { %v1295_v4 = vpop.permute.xlu0 %1294 }
0x1149   :  { %v1297_v7 = vadd.f32 %v1295_v4, %v1287_v22  ;;  %v5199_v22 = vld [vmem:[#allocation2 + $0x28] sm:$0xff] }
0x114a   :  { %v5205_v4 = vpack.c.bf16 %v5199_v22, %v5199_v22 }
0x114b   :  { %4016 = vtanh.f32 %v1297_v7  ;;  %1306 = vrot.lane.b32.xlu0 %v1297_v7, %s4231_s17 }
0x114c   :  { %4018 = vpow2.f32 %v3667_v36 }
0x1151   :  { %v4017_v32 = vpop.eup %4016 }
0x1152   :  { %1300 = vrot.lane.b32.xlu1 %v4017_v32, %s4231_s17  ;;  %v4019_v39 = vpop.eup %4018 }
0x1153   :  { %v1255_v57 = vadd.f32 1.0, %v4019_v39 }
0x1155   :  { %4020 = vrcp.f32 %v1255_v57  ;;  %v1282_v56 = vand.u32 2147483648, %v1255_v57  ;;  %vm1276_vm1 = vweird.f32 %v1255_v57  ;;  %v1280_v38 = vand.u32 2147483647, %v1255_v57 }
0x1157   :  { %v1283_v41 = vor.u32 1.1754944e-38, %v1282_v56  ;;  %vm1281_vm9 = vcmp.eq.f32.partialorder %v1280_v38, 8.507059e+37 }
0x115b   :  { %v4021_v18 = vpop.eup %4020 }
0x115c   :  { %v1272_v25 = vmul.f32 %v4021_v18, %v1255_v57  ;;  %vm1277_vm14 = vweird.f32 %v4021_v18 }
0x115d   :  { %vm1278_vm2 = vmor %vm1276_vm1, %vm1277_vm14 }
0x115e   :  { %v1273_v53 = vsub.f32 1.0, %v1272_v25 }
0x1160   :  { %v1274_v26 = vmul.f32 %v4021_v18, %v1273_v53 }
0x1162   :  { %v1275_v31 = vadd.f32 %v4021_v18, %v1274_v26 }
0x1164   :  { %v1279_v45 = vsel %vm1278_vm2, %v4021_v18, %v1275_v31 }
0x1165   :  { %v1284_v49 = vsel %vm1281_vm9, %v1283_v41, %v1279_v45 }
0x11bd   :  { %v1307_v30 = vpop.permute.xlu0 %1306 }
0x11be   :  { %v5175_v35 = vsel %vm4550_vm11, %v1307_v30, 0.0 }
0x11bf   :  { %1417 = vrot.lane.b32.xlu2 %v5175_v35, %s4231_s17 }
0x11c4   :  { %v1301_v0 = vpop.permute.xlu1 %1300 }
0x11c5   :  { %v1303_v10 = vmul.f32 %v1301_v0, %v1284_v49 }
0x11c7   :  { %v5183_v15 = vsel %vm4550_vm11, %v1303_v10, 0.0  ;;  %1450 = vrot.lane.b32.xlu2 %v5179_v13, %s4231_s17 }
0x11c8   :  { %1310 = vst.msk [vmem:[#allocation3] sm:$0xff] %vm238_vm6, %v5183_v15  ;;  %v1319_v14 = vsel %vm71_vm0, %v5183_v15, %v1317_v59 }
0x11c9   :  { %1312 = vst.msk [vmem:[#allocation3 + $0x38] sm:$0xff] %vm255_vm12, %v5183_v15  ;;  %v1320_v20 = vpack.c.bf16 %v1319_v14, %v1319_v14 }
0x11cb   :  { %1333 = vmatmul.bf16.vlgmr.msrb.gmra.mxu1 %v1320_v20  ;;  %1359 = vmatmul.bf16.vlgmr.msrb.gmra.mxu0 %v1320_v20 }
0x11cc   :  { %1593 = vmatpush.bf16.msrb.mxu1 %v4937_v37  ;;  %1770 = vmatpush.bf16.msrb.mxu0 %v4864_v3 }
0x11d0   :  { %1594 = vmatpush.bf16.msrb.mxu1 %v4957_v62  ;;  %1771 = vmatpush.bf16.msrb.mxu0 %v4883_v29 }
0x11d4   :  { %1595 = vmatpush.bf16.msrb.mxu1 %v4986_v16  ;;  %1772 = vmatpush.bf16.msrb.mxu0 %v4907_v48 }
0x11d8   :  { %1596 = vmatpush.bf16.msrb.mxu1 %v5005_v27  ;;  %1773 = vmatpush.bf16.msrb.mxu0 %v4919_v42 }
0x11db   :  { %3672 = vmatmul.msk.bf16.vlgmr.msra.gmra.mxu1 %vm71_vm0, %v5205_v4 }
0x11dc   :  { %1597 = vmatpush.bf16.msrb.mxu1 %v5025_v58 }
0x11e0   :  { %1598 = vmatpush.bf16.msrb.mxu1 %v5047_v24 }
0x11e4   :  { %1599 = vmatpush.bf16.msrb.mxu1 %v5067_v52 }
0x11e8   :  { %1600 = vmatpush.bf16.msrb.mxu1 %v5087_v43 }
0x11ec   :  { %1744 = vmatpush.bf16.msra.mxu1 %v4859_v1 }
0x11f0   :  { %1745 = vmatpush.bf16.msra.mxu1 %v4878_v28 }
0x11f4   :  { %1746 = vmatpush.bf16.msra.mxu1 %v4896_v33 }
0x11f8   :  { %1747 = vmatpush.bf16.msra.mxu1 %v4916_v5 }
0x1248   :  { %v1334_v7 = vpop.f32.mrf.mxu1  ;;  %v1360_v32 = vpop.f32.mrf.mxu0 }
0x1249   :  { %v1361_v36 = vadd.f32 %v1360_v32, %v5157_v44  ;;  %v1335_v30 = vadd.f32 %v1334_v7, %v5167_v19 }
0x124b   :  { %v1374_v39 = vadd.f32 %v5161_v6, %v1361_v36  ;;  %v1348_v31 = vadd.f32 %v5149_v17, %v1335_v30 }
0x124d   :  { %4022 = vtanh.f32 %v1374_v39  ;;  %v3670_v56 = vmul.f32 -1.442695, %v1348_v31  ;;  %v3671_v31 = vmul.f32 -1.442695, %v1374_v39 }
0x124f   :  { %4024 = vpow2.f32 %v3670_v56 }
0x1250   :  { %v1336_v57 = vpop.f32.mrf.mxu1  ;;  %v1362_v18 = vpop.f32.mrf.mxu0 }
0x1251   :  { %v1418_v57 = vpop.permute.xlu2 %1417 }
0x1253   :  { %v4023_v25 = vpop.eup %4022 }
0x1254   :  { %1422 = vrot.lane.b32.xlu1 %v4023_v25, %s4231_s17 }
0x1255   :  { %v4025_v38 = vpop.eup %4024 }
0x1256   :  { %v1383_v45 = vadd.f32 1.0, %v4025_v38 }
0x1258   :  { %v5220_v53 = vpop.f32.mrf.mxu1  ;;  %4026 = vrcp.f32 %v1383_v45  ;;  %v1396_v59 = vand.u32 2147483648, %v1383_v45  ;;  %vm1390_vm1 = vweird.f32 %v1383_v45  ;;  %v1394_v14 = vand.u32 2147483647, %v1383_v45 }
0x125a   :  { %v1397_v32 = vor.u32 1.1754944e-38, %v1396_v59  ;;  %vm1395_vm9 = vcmp.eq.f32.partialorder %v1394_v14, 8.507059e+37 }
0x125e   :  { %v4027_v41 = vpop.eup %4026 }
0x125f   :  { %v1386_v6 = vmul.f32 %v4027_v41, %v1383_v45  ;;  %vm1391_vm14 = vweird.f32 %v4027_v41 }
0x1260   :  { %v1483_v26 = vpop.f32.mrf.mxu1  ;;  %vm1392_vm2 = vmor %vm1390_vm1, %vm1391_vm14 }
0x1261   :  { %v1387_v49 = vsub.f32 1.0, %v1386_v6 }
0x1263   :  { %v1388_v0 = vmul.f32 %v4027_v41, %v1387_v49 }
0x1265   :  { %v1389_v10 = vadd.f32 %v4027_v41, %v1388_v0 }
0x1267   :  { %v1393_v20 = vsel %vm1392_vm2, %v4027_v41, %v1389_v10 }
0x1268   :  { %v1398_v17 = vsel %vm1395_vm9, %v1397_v32, %v1393_v20 }
0x1269   :  { %v1420_v18 = vmul.f32 %v1418_v57, %v1398_v17  ;;  %v5234_v57 = vld [vmem:[#allocation2 + $0x18] sm:$0xff] }
0x12c6   :  { %v1423_v7 = vpop.permute.xlu1 %1422 }
0x12c7   :  { %v1425_v36 = vmul.f32 %v1423_v7, %v1398_v17 }
0x12c9   :  { %1427 = vrot.lane.b32.xlu0 %v1425_v36, %s4231_s17 }
0x133b   :  { %v1428_v25 = vpop.permute.xlu0 %1427 }
0x133c   :  { %v1430_v26 = vadd.f32 %v1428_v25, %v1420_v18  ;;  %v1451_v18 = vpop.permute.xlu2 %1450 }
0x133e   :  { %4028 = vtanh.f32 %v1430_v26  ;;  %1439 = vrot.lane.b32.xlu0 %v1430_v26, %s4231_s17 }
0x133f   :  { %4030 = vpow2.f32 %v3671_v31 }
0x1344   :  { %v4029_v30 = vpop.eup %4028 }
0x1345   :  { %1433 = vrot.lane.b32.xlu1 %v4029_v30, %s4231_s17  ;;  %v4031_v56 = vpop.eup %4030 }
0x1346   :  { %v1384_v38 = vadd.f32 1.0, %v4031_v56 }
0x1348   :  { %4032 = vrcp.f32 %v1384_v38  ;;  %v1411_v14 = vand.u32 2147483648, %v1384_v38  ;;  %vm1405_vm1 = vweird.f32 %v1384_v38  ;;  %v1409_v39 = vand.u32 2147483647, %v1384_v38 }
0x134a   :  { %v1412_v32 = vor.u32 1.1754944e-38, %v1411_v14  ;;  %vm1410_vm9 = vcmp.eq.f32.partialorder %v1409_v39, 8.507059e+37 }
0x134e   :  { %v4033_v45 = vpop.eup %4032 }
0x134f   :  { %v1401_v41 = vmul.f32 %v4033_v45, %v1384_v38  ;;  %vm1406_vm14 = vweird.f32 %v4033_v45 }
0x1350   :  { %vm1407_vm2 = vmor %vm1405_vm1, %vm1406_vm14 }
0x1351   :  { %v1402_v6 = vsub.f32 1.0, %v1401_v41 }
0x1353   :  { %v1403_v49 = vmul.f32 %v4033_v45, %v1402_v6 }
0x1355   :  { %v1404_v10 = vadd.f32 %v4033_v45, %v1403_v49 }
0x1357   :  { %v1408_v20 = vsel %vm1407_vm2, %v4033_v45, %v1404_v10 }
0x1358   :  { %v1413_v7 = vsel %vm1410_vm9, %v1412_v32, %v1408_v20 }
0x13b0   :  { %v1440_v0 = vpop.permute.xlu0 %1439 }
0x13b1   :  { %v5230_v59 = vsel %vm4609_vm8, %v1440_v0, %v5175_v35 }
0x13b2   :  { %1551 = vrot.lane.b32.xlu2 %v5230_v59, %s4231_s17 }
0x13b7   :  { %v1434_v17 = vpop.permute.xlu1 %1433 }
0x13b8   :  { %v1436_v36 = vmul.f32 %v1434_v17, %v1413_v7 }
0x13ba   :  { %v5239_v35 = vsel %vm4609_vm8, %v1436_v36, %v5183_v15  ;;  %1584 = vrot.lane.b32.xlu2 %v5234_v57, %s4231_s17  ;;  %v5255_v15 = vld [vmem:[#allocation2 + $0x20] sm:$0xff] }
0x13bb   :  { %1444 = vst.msk [vmem:[#allocation3 + $0x8] sm:$0xff] %vm238_vm6, %v5239_v35  ;;  %v1453_v25 = vsel %vm71_vm0, %v5239_v35, %v1451_v18  ;;  %v1589_v30 = vpack.c.bf16 %v5255_v15, %v5255_v15 }
0x13bc   :  { %1446 = vst.msk [vmem:[#allocation3 + $0x30] sm:$0xff] %vm255_vm12, %v5239_v35  ;;  %v1454_v26 = vpack.c.bf16 %v1453_v25, %v1453_v25 }
0x13be   :  { %1467 = vmatmul.bf16.vlgmr.msra.gmra.mxu3 %v1454_v26  ;;  %1493 = vmatmul.bf16.vlgmr.msra.gmra.mxu2 %v1454_v26 }
0x13bf   :  { %1610 = vmatpush.bf16.msra.mxu3 %v4859_v1  ;;  %1753 = vmatpush.bf16.msra.mxu2 %v4948_v63 }
0x13c3   :  { %1611 = vmatpush.bf16.msra.mxu3 %v4878_v28  ;;  %1754 = vmatpush.bf16.msra.mxu2 %v4966_v9 }
0x13c7   :  { %1612 = vmatpush.bf16.msra.mxu3 %v4896_v33  ;;  %1755 = vmatpush.bf16.msra.mxu2 %v4990_v55 }
0x13cb   :  { %1613 = vmatpush.bf16.msra.mxu3 %v4916_v5  ;;  %1756 = vmatpush.bf16.msra.mxu2 %v5015_v8 }
0x13ce   :  { %3673 = vmatmul.msk.bf16.vlgmr.msrb.gmra.mxu3 %vm71_vm0, %v5205_v4  ;;  %3677 = vmatmul.msk.bf16.vlgmr.msrb.gmra.mxu2 %vm71_vm0, %v1589_v30 }
0x13cf   :  { %1727 = vmatpush.bf16.msrb.mxu3 %v4937_v37  ;;  %1757 = vmatpush.bf16.msra.mxu2 %v5036_v12 }
0x13d3   :  { %1728 = vmatpush.bf16.msrb.mxu3 %v4957_v62  ;;  %1758 = vmatpush.bf16.msra.mxu2 %v5056_v54 }
0x13d7   :  { %1729 = vmatpush.bf16.msrb.mxu3 %v4986_v16  ;;  %1759 = vmatpush.bf16.msra.mxu2 %v5076_v23 }
0x13db   :  { %1730 = vmatpush.bf16.msrb.mxu3 %v5005_v27  ;;  %1760 = vmatpush.bf16.msra.mxu2 %v5090_v47 }
0x13de   :  { %3676 = vmatmul.msk.bf16.vlgmr.msra.gmra.mxu3 %vm71_vm0, %v1589_v30 }
0x13df   :  { %1902 = vmatpush.bf16.msrb.mxu2 %v4864_v3  ;;  %1731 = vmatpush.bf16.msrb.mxu3 %v5025_v58 }
0x13e3   :  { %1903 = vmatpush.bf16.msrb.mxu2 %v4883_v29  ;;  %1732 = vmatpush.bf16.msrb.mxu3 %v5047_v24 }
0x13e7   :  { %1904 = vmatpush.bf16.msrb.mxu2 %v4907_v48  ;;  %1733 = vmatpush.bf16.msrb.mxu3 %v5067_v52 }
0x13eb   :  { %1905 = vmatpush.bf16.msrb.mxu2 %v4919_v42  ;;  %1734 = vmatpush.bf16.msrb.mxu3 %v5087_v43 }
0x13ef   :  { %1876 = vmatpush.bf16.msra.mxu3 %v4859_v1 }
0x13f3   :  { %1877 = vmatpush.bf16.msra.mxu3 %v4878_v28 }
0x13f7   :  { %1878 = vmatpush.bf16.msra.mxu3 %v4896_v33 }
0x13fb   :  { %1879 = vmatpush.bf16.msra.mxu3 %v4916_v5 }
0x1441   :  { %v1468_v4 = vpop.f32.mrf.mxu3  ;;  %v1494_v31 = vpop.f32.mrf.mxu2 }
0x1442   :  { %v1495_v45 = vadd.f32 %v1494_v31, %v5157_v44  ;;  %v1469_v32 = vadd.f32 %v1468_v4, %v5167_v19 }
0x1444   :  { %v1482_v7 = vadd.f32 %v5220_v53, %v1469_v32 }
0x1446   :  { %v3674_v17 = vmul.f32 -1.442695, %v1482_v7 }
0x1449   :  { %v1470_v56 = vpop.f32.mrf.mxu3  ;;  %v1496_v38 = vpop.f32.mrf.mxu2 }
0x1451   :  { %v1507_v41 = vpop.f32.mrf.mxu3  ;;  %v5286_v6 = vpop.f32.mrf.mxu2 }
0x1452   :  { %v1508_v49 = vadd.f32 %v1507_v41, %v1495_v45 }
0x1454   :  { %4034 = vtanh.f32 %v1508_v49 }
0x1455   :  { %4036 = vpow2.f32 %v3674_v17 }
0x1459   :  { %v1509_v0 = vpop.f32.mrf.mxu3  ;;  %v1643_v10 = vpop.f32.mrf.mxu2 }
0x145a   :  { %v4035_v14 = vpop.eup %4034 }
0x145b   :  { %1556 = vrot.lane.b32.xlu1 %v4035_v14, %s4231_s17  ;;  %v4037_v36 = vpop.eup %4036  ;;  %v1552_v14 = vpop.permute.xlu2 %1551 }
0x145c   :  { %v1517_v18 = vadd.f32 1.0, %v4037_v36  ;;  %v3675_v36 = vmul.f32 -1.442695, %v1508_v49 }
0x145e   :  { %4038 = vrcp.f32 %v1517_v18  ;;  %v1530_v38 = vand.u32 2147483648, %v1517_v18  ;;  %vm1524_vm1 = vweird.f32 %v1517_v18  ;;  %v1528_v45 = vand.u32 2147483647, %v1517_v18 }
0x1460   :  { %v1531_v0 = vor.u32 1.1754944e-38, %v1530_v38  ;;  %vm1529_vm9 = vcmp.eq.f32.partialorder %v1528_v45, 8.507059e+37 }
0x1461   :  { %v5289_v39 = vpop.f32.mrf.mxu3 }
0x1464   :  { %v4039_v25 = vpop.eup %4038 }
0x1465   :  { %v1520_v26 = vmul.f32 %v4039_v25, %v1517_v18  ;;  %vm1525_vm14 = vweird.f32 %v4039_v25 }
0x1466   :  { %vm1526_vm2 = vmor %vm1524_vm1, %vm1525_vm14 }
0x1467   :  { %v1521_v30 = vsub.f32 1.0, %v1520_v26 }
0x1469   :  { %v1617_v20 = vpop.f32.mrf.mxu3  ;;  %v1522_v31 = vmul.f32 %v4039_v25, %v1521_v30 }
0x146b   :  { %v1523_v56 = vadd.f32 %v4039_v25, %v1522_v31 }
0x146d   :  { %v1527_v41 = vsel %vm1526_vm2, %v4039_v25, %v1523_v56 }
0x146e   :  { %v1532_v53 = vsel %vm1529_vm9, %v1531_v0, %v1527_v41 }
0x146f   :  { %v1554_v20 = vmul.f32 %v1552_v14, %v1532_v53 }
0x14cd   :  { %v1557_v4 = vpop.permute.xlu1 %1556 }
0x14ce   :  { %v1559_v10 = vmul.f32 %v1557_v4, %v1532_v53 }
0x14d0   :  { %1561 = vrot.lane.b32.xlu0 %v1559_v10, %s4231_s17 }
0x1542   :  { %v1562_v32 = vpop.permute.xlu0 %1561 }
0x1543   :  { %v1564_v7 = vadd.f32 %v1562_v32, %v1554_v20  ;;  %v1585_v32 = vpop.permute.xlu2 %1584 }
0x1545   :  { %4040 = vtanh.f32 %v1564_v7  ;;  %1573 = vrot.lane.b32.xlu0 %v1564_v7, %s4231_s17 }
0x1546   :  { %4042 = vpow2.f32 %v3675_v36 }
0x154b   :  { %v4041_v17 = vpop.eup %4040 }
0x154c   :  { %1567 = vrot.lane.b32.xlu1 %v4041_v17, %s4231_s17  ;;  %v4043_v18 = vpop.eup %4042 }
0x154d   :  { %v1518_v25 = vadd.f32 1.0, %v4043_v18 }
0x154f   :  { %4044 = vrcp.f32 %v1518_v25  ;;  %v1545_v0 = vand.u32 2147483648, %v1518_v25  ;;  %vm1539_vm1 = vweird.f32 %v1518_v25  ;;  %v1543_v49 = vand.u32 2147483647, %v1518_v25 }
0x1551   :  { %v1546_v53 = vor.u32 1.1754944e-38, %v1545_v0  ;;  %vm1544_vm9 = vcmp.eq.f32.partialorder %v1543_v49, 8.507059e+37 }
0x1555   :  { %v4045_v26 = vpop.eup %4044 }
0x1556   :  { %v1535_v30 = vmul.f32 %v4045_v26, %v1518_v25  ;;  %vm1540_vm14 = vweird.f32 %v4045_v26 }
0x1557   :  { %vm1541_vm2 = vmor %vm1539_vm1, %vm1540_vm14 }
0x1558   :  { %v1536_v31 = vsub.f32 1.0, %v1535_v30 }
0x155a   :  { %v1537_v56 = vmul.f32 %v4045_v26, %v1536_v31 }
0x155c   :  { %v1538_v45 = vadd.f32 %v4045_v26, %v1537_v56 }
0x155e   :  { %v1542_v4 = vsel %vm1541_vm2, %v4045_v26, %v1538_v45 }
0x155f   :  { %v1547_v10 = vsel %vm1544_vm9, %v1546_v53, %v1542_v4 }
0x15b7   :  { %v1574_v38 = vpop.permute.xlu0 %1573 }
0x15b8   :  { %v5299_v41 = vsel %vm4667_vm5, %v1574_v38, %v5230_v59 }
0x15b9   :  { %1685 = vrot.lane.b32.xlu2 %v5299_v41, %s4231_s17 }
0x15be   :  { %v1568_v14 = vpop.permute.xlu1 %1567 }
0x15bf   :  { %v1570_v20 = vmul.f32 %v1568_v14, %v1547_v10 }
0x15c1   :  { %v5306_v7 = vsel %vm4667_vm5, %v1570_v20, %v5239_v35  ;;  %1718 = vrot.lane.b32.xlu2 %v5255_v15, %s4231_s17  ;;  %v1723_v35 = vpack.c.bf16 %v5234_v57, %v5234_v57 }
0x15c2   :  { %1578 = vst.msk [vmem:[#allocation3 + $0x10] sm:$0xff] %vm238_vm6, %v5306_v7  ;;  %v1587_v59 = vsel %vm71_vm0, %v5306_v7, %v1585_v32 }
0x15c3   :  { %1580 = vst.msk [vmem:[#allocation3 + $0x28] sm:$0xff] %vm255_vm12, %v5306_v7  ;;  %v1588_v17 = vpack.c.bf16 %v1587_v59, %v1587_v59 }
0x15c5   :  { %1601 = vmatmul.bf16.vlgmr.msrb.gmra.mxu1 %v1588_v17  ;;  %1627 = vmatmul.bf16.vlgmr.msra.gmra.mxu0 %v1588_v17 }
0x15c6   :  { %1859 = vmatpush.bf16.msrb.mxu1 %v4937_v37  ;;  %1885 = vmatpush.bf16.msra.mxu0 %v4948_v63 }
0x15ca   :  { %1860 = vmatpush.bf16.msrb.mxu1 %v4957_v62  ;;  %1886 = vmatpush.bf16.msra.mxu0 %v4966_v9 }
0x15ce   :  { %1861 = vmatpush.bf16.msrb.mxu1 %v4986_v16  ;;  %1887 = vmatpush.bf16.msra.mxu0 %v4990_v55 }
0x15d2   :  { %1862 = vmatpush.bf16.msrb.mxu1 %v5005_v27  ;;  %1888 = vmatpush.bf16.msra.mxu0 %v5015_v8 }
0x15d5   :  { %3680 = vmatmul.msk.bf16.vlgmr.msra.gmra.mxu1 %vm71_vm0, %v1723_v35  ;;  %3681 = vmatmul.msk.bf16.vlgmr.msrb.gmra.mxu0 %vm71_vm0, %v1723_v35 }
0x15d6   :  { %1863 = vmatpush.bf16.msrb.mxu1 %v5025_v58  ;;  %1889 = vmatpush.bf16.msra.mxu0 %v5036_v12 }
0x15da   :  { %1864 = vmatpush.bf16.msrb.mxu1 %v5047_v24  ;;  %1890 = vmatpush.bf16.msra.mxu0 %v5056_v54 }
0x15de   :  { %1865 = vmatpush.bf16.msrb.mxu1 %v5067_v52  ;;  %1891 = vmatpush.bf16.msra.mxu0 %v5076_v23 }
0x15e2   :  { %1866 = vmatpush.bf16.msrb.mxu1 %v5087_v43  ;;  %1892 = vmatpush.bf16.msra.mxu0 %v5090_v47 }
0x15e6   :  { %2008 = vmatpush.bf16.msra.mxu1 %v4859_v1  ;;  %2034 = vmatpush.bf16.msrb.mxu0 %v4864_v3 }
0x15ea   :  { %2009 = vmatpush.bf16.msra.mxu1 %v4878_v28  ;;  %2035 = vmatpush.bf16.msrb.mxu0 %v4883_v29 }
0x15ee   :  { %2010 = vmatpush.bf16.msra.mxu1 %v4896_v33  ;;  %2036 = vmatpush.bf16.msrb.mxu0 %v4907_v48 }
0x15f2   :  { %2011 = vmatpush.bf16.msra.mxu1 %v4916_v5  ;;  %2037 = vmatpush.bf16.msrb.mxu0 %v4919_v42 }
0x1642   :  { %v1602_v57 = vpop.f32.mrf.mxu1  ;;  %v1628_v15 = vpop.f32.mrf.mxu0 }
0x1643   :  { %v1629_v36 = vadd.f32 %v1628_v15, %v5157_v44  ;;  %v1603_v0 = vadd.f32 %v1602_v57, %v5167_v19 }
0x1645   :  { %v1642_v18 = vadd.f32 %v5286_v6, %v1629_v36  ;;  %v1616_v49 = vadd.f32 %v5289_v39, %v1603_v0 }
0x1647   :  { %4046 = vtanh.f32 %v1642_v18  ;;  %v3678_v4 = vmul.f32 -1.442695, %v1616_v49  ;;  %v3679_v49 = vmul.f32 -1.442695, %v1642_v18 }
0x1649   :  { %4048 = vpow2.f32 %v3678_v4 }
0x164a   :  { %v1604_v25 = vpop.f32.mrf.mxu1  ;;  %v1630_v26 = vpop.f32.mrf.mxu0 }
0x164b   :  { %v1686_v26 = vpop.permute.xlu2 %1685 }
0x164d   :  { %v4047_v30 = vpop.eup %4046 }
0x164e   :  { %1690 = vrot.lane.b32.xlu1 %v4047_v30, %s4231_s17 }
0x164f   :  { %v4049_v53 = vpop.eup %4048 }
0x1650   :  { %v1651_v6 = vadd.f32 1.0, %v4049_v53 }
0x1652   :  { %v5347_v31 = vpop.f32.mrf.mxu1  ;;  %v5349_v56 = vpop.f32.mrf.mxu0  ;;  %4050 = vrcp.f32 %v1651_v6  ;;  %v1664_v17 = vand.u32 2147483648, %v1651_v6  ;;  %vm1658_vm1 = vweird.f32 %v1651_v6  ;;  %v1662_v35 = vand.u32 2147483647, %v1651_v6 }
0x1654   :  { %v1665_v36 = vor.u32 1.1754944e-38, %v1664_v17  ;;  %vm1663_vm9 = vcmp.eq.f32.partialorder %v1662_v35, 8.507059e+37 }
0x1658   :  { %v4051_v10 = vpop.eup %4050 }
0x1659   :  { %v1654_v14 = vmul.f32 %v4051_v10, %v1651_v6  ;;  %vm1659_vm14 = vweird.f32 %v4051_v10 }
0x165a   :  { %v1751_v38 = vpop.f32.mrf.mxu1  ;;  %v1777_v45 = vpop.f32.mrf.mxu0  ;;  %vm1660_vm2 = vmor %vm1658_vm1, %vm1659_vm14 }
0x165b   :  { %v1655_v20 = vsub.f32 1.0, %v1654_v14 }
0x165d   :  { %v1656_v32 = vmul.f32 %v4051_v10, %v1655_v20 }
0x165f   :  { %v1657_v59 = vadd.f32 %v4051_v10, %v1656_v32 }
0x1661   :  { %v1661_v15 = vsel %vm1660_vm2, %v4051_v10, %v1657_v59 }
0x1662   :  { %v1666_v39 = vsel %vm1663_vm9, %v1665_v36, %v1661_v15 }
0x1663   :  { %v1688_v30 = vmul.f32 %v1686_v26, %v1666_v39  ;;  %v1719_v26 = vpop.permute.xlu2 %1718 }
0x16c0   :  { %v1691_v57 = vpop.permute.xlu1 %1690 }
0x16c1   :  { %v1693_v25 = vmul.f32 %v1691_v57, %v1666_v39 }
0x16c3   :  { %1695 = vrot.lane.b32.xlu0 %v1693_v25, %s4231_s17 }
0x1735   :  { %v1696_v38 = vpop.permute.xlu0 %1695 }
0x1736   :  { %v1698_v45 = vadd.f32 %v1696_v38, %v1688_v30 }
0x1738   :  { %4052 = vtanh.f32 %v1698_v45  ;;  %1707 = vrot.lane.b32.xlu0 %v1698_v45, %s4231_s17 }
0x1739   :  { %4054 = vpow2.f32 %v3679_v49 }
0x173e   :  { %v4053_v0 = vpop.eup %4052 }
0x173f   :  { %1701 = vrot.lane.b32.xlu1 %v4053_v0, %s4231_s17  ;;  %v4055_v4 = vpop.eup %4054 }
0x1740   :  { %v1652_v53 = vadd.f32 1.0, %v4055_v4 }
0x1742   :  { %4056 = vrcp.f32 %v1652_v53  ;;  %v1679_v35 = vand.u32 2147483648, %v1652_v53  ;;  %vm1673_vm1 = vweird.f32 %v1652_v53  ;;  %v1677_v18 = vand.u32 2147483647, %v1652_v53 }
0x1744   :  { %v1680_v36 = vor.u32 1.1754944e-38, %v1679_v35  ;;  %vm1678_vm9 = vcmp.eq.f32.partialorder %v1677_v18, 8.507059e+37 }
0x1748   :  { %v4057_v6 = vpop.eup %4056 }
0x1749   :  { %v1669_v10 = vmul.f32 %v4057_v6, %v1652_v53  ;;  %vm1674_vm14 = vweird.f32 %v4057_v6 }
0x174a   :  { %vm1675_vm2 = vmor %vm1673_vm1, %vm1674_vm14 }
0x174b   :  { %v1670_v14 = vsub.f32 1.0, %v1669_v10 }
0x174d   :  { %v1671_v20 = vmul.f32 %v4057_v6, %v1670_v14 }
0x174f   :  { %v1672_v59 = vadd.f32 %v4057_v6, %v1671_v20 }
0x1751   :  { %v1676_v15 = vsel %vm1675_vm2, %v4057_v6, %v1672_v59 }
0x1752   :  { %v1681_v57 = vsel %vm1678_vm9, %v1680_v36, %v1676_v15 }
0x17aa   :  { %v1708_v32 = vpop.permute.xlu0 %1707 }
0x17ab   :  { %v5359_v17 = vsel %vm4717_vm4, %v1708_v32, %v5299_v41 }
0x17ac   :  { %1819 = vrot.lane.b32.xlu2 %v5359_v17, %s4231_s17 }
0x17b1   :  { %v1702_v39 = vpop.permute.xlu1 %1701 }
0x17b2   :  { %v1704_v25 = vmul.f32 %v1702_v39, %v1681_v57 }
0x17b4   :  { %v5366_v30 = vsel %vm4717_vm4, %v1704_v25, %v5306_v7  ;;  %1850 = vrot.lane.b32.xlu2 %v5199_v22, %s4231_s17  ;;  %v1855_v22 = vpack.c.bf16 %v5179_v13, %v5179_v13 }
0x17b5   :  { %1712 = vst.msk [vmem:[#allocation3 + $0x18] sm:$0xff] %vm238_vm6, %v5366_v30  ;;  %v1721_v41 = vsel %vm71_vm0, %v5366_v30, %v1719_v26 }
0x17b6   :  { %1714 = vst.msk [vmem:[#allocation3 + $0x20] sm:$0xff] %vm255_vm12, %v5366_v30  ;;  %v1722_v38 = vpack.c.bf16 %v1721_v41, %v1721_v41 }
0x17b8   :  { %1735 = vmatmul.bf16.vlgmr.msrb.gmra.mxu3 %v1722_v38  ;;  %1761 = vmatmul.bf16.vlgmr.msra.gmra.mxu2 %v1722_v38 }
0x17b9   :  { %1991 = vmatpush.bf16.msrb.mxu3 %v4937_v37  ;;  %2017 = vmatpush.bf16.msra.mxu2 %v4948_v63 }
0x17bd   :  { %1992 = vmatpush.bf16.msrb.mxu3 %v4957_v62  ;;  %2018 = vmatpush.bf16.msra.mxu2 %v4966_v9 }
0x17c1   :  { %1993 = vmatpush.bf16.msrb.mxu3 %v4986_v16  ;;  %2019 = vmatpush.bf16.msra.mxu2 %v4990_v55 }
0x17c5   :  { %1994 = vmatpush.bf16.msrb.mxu3 %v5005_v27  ;;  %2020 = vmatpush.bf16.msra.mxu2 %v5015_v8 }
0x17c8   :  { %3684 = vmatmul.msk.bf16.vlgmr.msra.gmra.mxu3 %vm71_vm0, %v1855_v22  ;;  %3685 = vmatmul.msk.bf16.vlgmr.msrb.gmra.mxu2 %vm71_vm0, %v1855_v22 }
0x17c9   :  { %1995 = vmatpush.bf16.msrb.mxu3 %v5025_v58  ;;  %2021 = vmatpush.bf16.msra.mxu2 %v5036_v12 }
0x17cd   :  { %1996 = vmatpush.bf16.msrb.mxu3 %v5047_v24  ;;  %2022 = vmatpush.bf16.msra.mxu2 %v5056_v54 }
0x17d1   :  { %1997 = vmatpush.bf16.msrb.mxu3 %v5067_v52  ;;  %2023 = vmatpush.bf16.msra.mxu2 %v5076_v23 }
0x17d5   :  { %1998 = vmatpush.bf16.msrb.mxu3 %v5087_v43  ;;  %2024 = vmatpush.bf16.msra.mxu2 %v5090_v47 }
0x17d9   :  { %2140 = vmatpush.bf16.msra.mxu3 %v4859_v1  ;;  %2166 = vmatpush.bf16.msrb.mxu2 %v4864_v3 }
0x17dd   :  { %2141 = vmatpush.bf16.msra.mxu3 %v4878_v28  ;;  %2167 = vmatpush.bf16.msrb.mxu2 %v4883_v29 }
0x17e1   :  { %2142 = vmatpush.bf16.msra.mxu3 %v4896_v33  ;;  %2168 = vmatpush.bf16.msrb.mxu2 %v4907_v48 }
0x17e5   :  { %2143 = vmatpush.bf16.msra.mxu3 %v4916_v5  ;;  %2169 = vmatpush.bf16.msrb.mxu2 %v4919_v42 }
0x1806   :  { %v1820_v39 = vpop.permute.xlu2 %1819 }
0x183b   :  { %v1736_v13 = vpop.f32.mrf.mxu3  ;;  %v1762_v7 = vpop.f32.mrf.mxu2 }
0x183c   :  { %v1763_v45 = vadd.f32 %v1762_v7, %v5157_v44  ;;  %v1737_v42 = vadd.f32 %v1736_v13, %v5167_v19 }
0x183e   :  { %v1776_v1 = vadd.f32 %v5349_v56, %v1763_v45  ;;  %v1750_v49 = vadd.f32 %v5347_v31, %v1737_v42 }
0x1840   :  { %4058 = vtanh.f32 %v1776_v1  ;;  %v3682_v4 = vmul.f32 -1.442695, %v1750_v49  ;;  %v3683_v22 = vmul.f32 -1.442695, %v1776_v1 }
0x1842   :  { %4060 = vpow2.f32 %v3682_v4 }
0x1843   :  { %v1738_v3 = vpop.f32.mrf.mxu3  ;;  %v1764_v0 = vpop.f32.mrf.mxu2 }
0x1846   :  { %v4059_v28 = vpop.eup %4058 }
0x1847   :  { %1824 = vrot.lane.b32.xlu1 %v4059_v28, %s4231_s17 }
0x1848   :  { %v4061_v53 = vpop.eup %4060 }
0x1849   :  { %v1785_v56 = vadd.f32 1.0, %v4061_v53 }
0x184b   :  { %v5407_v29 = vpop.f32.mrf.mxu3  ;;  %v5409_v33 = vpop.f32.mrf.mxu2  ;;  %4062 = vrcp.f32 %v1785_v56  ;;  %v1798_v59 = vand.u32 2147483648, %v1785_v56  ;;  %vm1792_vm1 = vweird.f32 %v1785_v56  ;;  %v1796_v35 = vand.u32 2147483647, %v1785_v56 }
0x184d   :  { %v1799_v15 = vor.u32 1.1754944e-38, %v1798_v59  ;;  %vm1797_vm9 = vcmp.eq.f32.partialorder %v1796_v35, 8.507059e+37 }
0x1851   :  { %v4063_v6 = vpop.eup %4062 }
0x1852   :  { %v1788_v10 = vmul.f32 %v4063_v6, %v1785_v56  ;;  %vm1793_vm14 = vweird.f32 %v4063_v6 }
0x1853   :  { %v1883_v48 = vpop.f32.mrf.mxu3  ;;  %v1909_v5 = vpop.f32.mrf.mxu2  ;;  %vm1794_vm2 = vmor %vm1792_vm1, %vm1793_vm14 }
0x1854   :  { %v1789_v14 = vsub.f32 1.0, %v1788_v10 }
0x1856   :  { %v1790_v20 = vmul.f32 %v4063_v6, %v1789_v14  ;;  %v1979_v14 = vld [vmem:[#allocation2 + $0x30] sm:$0xff] }
0x1858   :  { %v1791_v32 = vadd.f32 %v4063_v6, %v1790_v20  ;;  %v1851_v20 = vpop.permute.xlu2 %1850 }
0x185a   :  { %v1795_v18 = vsel %vm1794_vm2, %v4063_v6, %v1791_v32 }
0x185b   :  { %v1800_v31 = vsel %vm1797_vm9, %v1799_v15, %v1795_v18 }
0x185c   :  { %v1822_v25 = vmul.f32 %v1820_v39, %v1800_v31 }
0x18b9   :  { %v1825_v36 = vpop.permute.xlu1 %1824 }
0x18ba   :  { %v1827_v57 = vmul.f32 %v1825_v36, %v1800_v31 }
0x18bc   :  { %1829 = vrot.lane.b32.xlu0 %v1827_v57, %s4231_s17 }
0x192e   :  { %v1830_v26 = vpop.permute.xlu0 %1829 }
0x192f   :  { %v1832_v41 = vadd.f32 %v1830_v26, %v1822_v25 }
0x1931   :  { %4064 = vtanh.f32 %v1832_v41  ;;  %1841 = vrot.lane.b32.xlu0 %v1832_v41, %s4231_s17 }
0x1932   :  { %4066 = vpow2.f32 %v3683_v22 }
0x1937   :  { %v4065_v38 = vpop.eup %4064 }
0x1938   :  { %1835 = vrot.lane.b32.xlu1 %v4065_v38, %s4231_s17  ;;  %v4067_v13 = vpop.eup %4066 }
0x1939   :  { %v1786_v7 = vadd.f32 1.0, %v4067_v13 }
0x193b   :  { %4068 = vrcp.f32 %v1786_v7  ;;  %v1813_v49 = vand.u32 2147483648, %v1786_v7  ;;  %vm1807_vm1 = vweird.f32 %v1786_v7  ;;  %v1811_v1 = vand.u32 2147483647, %v1786_v7 }
0x193d   :  { %v1814_v53 = vor.u32 1.1754944e-38, %v1813_v49  ;;  %vm1812_vm9 = vcmp.eq.f32.partialorder %v1811_v1, 8.507059e+37 }
0x1941   :  { %v4069_v45 = vpop.eup %4068 }
0x1942   :  { %v1803_v3 = vmul.f32 %v4069_v45, %v1786_v7  ;;  %vm1808_vm14 = vweird.f32 %v4069_v45 }
0x1943   :  { %vm1809_vm2 = vmor %vm1807_vm1, %vm1808_vm14 }
0x1944   :  { %v1804_v0 = vsub.f32 1.0, %v1803_v3 }
0x1946   :  { %v1805_v28 = vmul.f32 %v4069_v45, %v1804_v0 }
0x1948   :  { %v1806_v5 = vadd.f32 %v4069_v45, %v1805_v28 }
0x194a   :  { %v1810_v4 = vsel %vm1809_vm2, %v4069_v45, %v1806_v5 }
0x194b   :  { %v1815_v56 = vsel %vm1812_vm9, %v1814_v53, %v1810_v4 }
0x19a3   :  { %v1842_v48 = vpop.permute.xlu0 %1841 }
0x19a4   :  { %v5419_v42 = vsel %vm4752_vm7, %v1842_v48, %v5359_v17 }
0x19a5   :  { %1951 = vrot.lane.b32.xlu2 %v5419_v42, %s4231_s17 }
0x19aa   :  { %v1836_v6 = vpop.permute.xlu1 %1835 }
0x19ab   :  { %v1838_v10 = vmul.f32 %v1836_v6, %v1815_v56 }
0x19ad   :  { %v5426_v17 = vsel %vm4752_vm7, %v1838_v10, %v5366_v30  ;;  %1982 = vrot.lane.b32.xlu2 %v1979_v14, %s4231_s17  ;;  %v1987_v30 = vpack.c.bf16 %v5163_v11, %v5163_v11 }
0x19ae   :  { %1845 = vst.msk [vmem:[#allocation3 + $0x20] sm:$0xff] %vm238_vm6, %v5426_v17  ;;  %v1853_v32 = vsel %vm71_vm0, %v5426_v17, %v1851_v20 }
0x19af   :  { %1846 = vst.msk [vmem:[#allocation3 + $0x18] sm:$0xff] %vm255_vm12, %v5426_v17  ;;  %v1854_v59 = vpack.c.bf16 %v1853_v32, %v1853_v32 }
0x19b1   :  { %1867 = vmatmul.bf16.vlgmr.msrb.gmra.mxu1 %v1854_v59  ;;  %1893 = vmatmul.bf16.vlgmr.msra.gmra.mxu0 %v1854_v59 }
0x19b2   :  { %2123 = vmatpush.bf16.msrb.mxu1 %v4937_v37  ;;  %2149 = vmatpush.bf16.msra.mxu0 %v4948_v63 }
0x19b6   :  { %2124 = vmatpush.bf16.msrb.mxu1 %v4957_v62  ;;  %2150 = vmatpush.bf16.msra.mxu0 %v4966_v9  ;;  %v5931_v21 = vld [vmem:[#allocation3 + $0x18] sm:$0xff] }
0x19ba   :  { %2125 = vmatpush.bf16.msrb.mxu1 %v4986_v16  ;;  %2151 = vmatpush.bf16.msra.mxu0 %v4990_v55 }
0x19be   :  { %2126 = vmatpush.bf16.msrb.mxu1 %v5005_v27  ;;  %2152 = vmatpush.bf16.msra.mxu0 %v5015_v8 }
0x19c1   :  { %3688 = vmatmul.msk.bf16.vlgmr.msra.gmra.mxu1 %vm71_vm0, %v1987_v30  ;;  %3689 = vmatmul.msk.bf16.vlgmr.msrb.gmra.mxu0 %vm71_vm0, %v1987_v30  ;;  %v2111_v30 = vld [vmem:[#allocation2 + $0x38] sm:$0xff] }
0x19c2   :  { %2127 = vmatpush.bf16.msrb.mxu1 %v5025_v58  ;;  %2153 = vmatpush.bf16.msra.mxu0 %v5036_v12 }
0x19c6   :  { %2128 = vmatpush.bf16.msrb.mxu1 %v5047_v24  ;;  %2154 = vmatpush.bf16.msra.mxu0 %v5056_v54 }
0x19ca   :  { %2129 = vmatpush.bf16.msrb.mxu1 %v5067_v52  ;;  %2155 = vmatpush.bf16.msra.mxu0 %v5076_v23 }
0x19ce   :  { %2130 = vmatpush.bf16.msrb.mxu1 %v5087_v43  ;;  %2156 = vmatpush.bf16.msra.mxu0 %v5090_v47 }
0x19ff   :  { %v1952_v41 = vpop.permute.xlu2 %1951 }
0x1a2e   :  { %v1868_v37 = vpop.f32.mrf.mxu1  ;;  %v1894_v63 = vpop.f32.mrf.mxu0 }
0x1a2f   :  { %v1895_v62 = vadd.f32 %v1894_v63, %v5157_v44  ;;  %v1869_v54 = vadd.f32 %v1868_v37, %v5167_v19  ;;  %v1983_v37 = vpop.permute.xlu2 %1982 }
0x1a31   :  { %v1908_v9 = vadd.f32 %v5409_v33, %v1895_v62  ;;  %v1882_v52 = vadd.f32 %v5407_v29, %v1869_v54 }
0x1a33   :  { %4070 = vtanh.f32 %v1908_v9  ;;  %v3686_v23 = vmul.f32 -1.442695, %v1882_v52  ;;  %v3687_v45 = vmul.f32 -1.442695, %v1908_v9  ;;  %v2112_v9 = vld [vmem:[#allocation2] sm:$0xff] }
0x1a35   :  { %4072 = vpow2.f32 %v3686_v23 }
0x1a36   :  { %v1870_v16 = vpop.f32.mrf.mxu1  ;;  %v1896_v55 = vpop.f32.mrf.mxu0 }
0x1a37   :  { %v2119_v16 = vpack.c.bf16 %v2112_v9, %v2112_v9 }
0x1a39   :  { %v4071_v27 = vpop.eup %4070 }
0x1a3a   :  { %1956 = vrot.lane.b32.xlu1 %v4071_v27, %s4231_s17 }
0x1a3b   :  { %v4073_v43 = vpop.eup %4072 }
0x1a3c   :  { %v1917_v47 = vadd.f32 1.0, %v4073_v43 }
0x1a3e   :  { %v5458_v8 = vpop.f32.mrf.mxu1  ;;  %v5460_v58 = vpop.f32.mrf.mxu0  ;;  %4074 = vrcp.f32 %v1917_v47  ;;  %v1930_v36 = vand.u32 2147483648, %v1917_v47  ;;  %vm1924_vm1 = vweird.f32 %v1917_v47  ;;  %v1928_v31 = vand.u32 2147483647, %v1917_v47 }
0x1a40   :  { %v1931_v39 = vor.u32 1.1754944e-38, %v1930_v36  ;;  %vm1929_vm9 = vcmp.eq.f32.partialorder %v1928_v31, 8.507059e+37 }
0x1a44   :  { %v4075_v11 = vpop.eup %4074 }
0x1a45   :  { %v1920_v33 = vmul.f32 %v4075_v11, %v1917_v47  ;;  %vm1925_vm14 = vweird.f32 %v4075_v11 }
0x1a46   :  { %v2015_v12 = vpop.f32.mrf.mxu1  ;;  %v2041_v24 = vpop.f32.mrf.mxu0  ;;  %vm1926_vm2 = vmor %vm1924_vm1, %vm1925_vm14 }
0x1a47   :  { %v1921_v35 = vsub.f32 1.0, %v1920_v33 }
0x1a49   :  { %v1922_v18 = vmul.f32 %v4075_v11, %v1921_v35 }
0x1a4b   :  { %v1923_v15 = vadd.f32 %v4075_v11, %v1922_v18 }
0x1a4d   :  { %v1927_v57 = vsel %vm1926_vm2, %v4075_v11, %v1923_v15 }
0x1a4e   :  { %v1932_v29 = vsel %vm1929_vm9, %v1931_v39, %v1927_v57 }
0x1a4f   :  { %v1954_v38 = vmul.f32 %v1952_v41, %v1932_v29 }
0x1aac   :  { %v1957_v25 = vpop.permute.xlu1 %1956 }
0x1aad   :  { %v1959_v26 = vmul.f32 %v1957_v25, %v1932_v29 }
0x1aaf   :  { %1961 = vrot.lane.b32.xlu0 %v1959_v26, %s4231_s17 }
0x1b21   :  { %v1962_v22 = vpop.permute.xlu0 %1961 }
0x1b22   :  { %v1964_v13 = vadd.f32 %v1962_v22, %v1954_v38 }
0x1b24   :  { %4076 = vtanh.f32 %v1964_v13  ;;  %1973 = vrot.lane.b32.xlu0 %v1964_v13, %s4231_s17 }
0x1b25   :  { %4078 = vpow2.f32 %v3687_v45 }
0x1b2a   :  { %v4077_v7 = vpop.eup %4076 }
0x1b2b   :  { %1967 = vrot.lane.b32.xlu1 %v4077_v7, %s4231_s17  ;;  %v4079_v3 = vpop.eup %4078 }
0x1b2c   :  { %v1918_v0 = vadd.f32 1.0, %v4079_v3 }
0x1b2e   :  { %4080 = vrcp.f32 %v1918_v0  ;;  %v1945_v56 = vand.u32 2147483648, %v1918_v0  ;;  %vm1939_vm1 = vweird.f32 %v1918_v0  ;;  %v1943_v6 = vand.u32 2147483647, %v1918_v0 }
0x1b30   :  { %v1946_v14 = vor.u32 1.1754944e-38, %v1945_v56  ;;  %vm1944_vm9 = vcmp.eq.f32.partialorder %v1943_v6, 8.507059e+37 }
0x1b34   :  { %v4081_v28 = vpop.eup %4080 }
0x1b35   :  { %v1935_v48 = vmul.f32 %v4081_v28, %v1918_v0  ;;  %vm1940_vm14 = vweird.f32 %v4081_v28 }
0x1b36   :  { %vm1941_vm2 = vmor %vm1939_vm1, %vm1940_vm14 }
0x1b37   :  { %v1936_v5 = vsub.f32 1.0, %v1935_v48 }
0x1b39   :  { %v1937_v49 = vmul.f32 %v4081_v28, %v1936_v5 }
0x1b3b   :  { %v1938_v4 = vadd.f32 %v4081_v28, %v1937_v49 }
0x1b3d   :  { %v1942_v10 = vsel %vm1941_vm2, %v4081_v28, %v1938_v4 }
0x1b3e   :  { %v1947_v20 = vsel %vm1944_vm9, %v1946_v14, %v1942_v10 }
0x1b96   :  { %v1974_v1 = vpop.permute.xlu0 %1973 }
0x1b97   :  { %v5470_v53 = vsel %vm4787_vm10, %v1974_v1, %v5419_v42 }
0x1b98   :  { %2083 = vrot.lane.b32.xlu2 %v5470_v53, %s4231_s17 }
0x1b9d   :  { %v1968_v32 = vpop.permute.xlu1 %1967 }
0x1b9e   :  { %v1970_v59 = vmul.f32 %v1968_v32, %v1947_v20 }
0x1ba0   :  { %v5477_v42 = vsel %vm4787_vm10, %v1970_v59, %v5426_v17  ;;  %2114 = vrot.lane.b32.xlu2 %v2111_v30, %s4231_s17 }
0x1ba1   :  { %1977 = vst.msk [vmem:[#allocation3 + $0x28] sm:$0xff] %vm238_vm6, %v5477_v42  ;;  %v1985_v63 = vsel %vm71_vm0, %v5477_v42, %v1983_v37 }
0x1ba2   :  { %1978 = vst.msk [vmem:[#allocation3 + $0x10] sm:$0xff] %vm255_vm12, %v5477_v42  ;;  %v1986_v62 = vpack.c.bf16 %v1985_v63, %v1985_v63 }
0x1ba4   :  { %1999 = vmatmul.bf16.vlgmr.msrb.gmra.mxu3 %v1986_v62  ;;  %2025 = vmatmul.bf16.vlgmr.msra.gmra.mxu2 %v1986_v62 }
0x1ba9   :  { %v5871_v61 = vld [vmem:[#allocation3 + $0x10] sm:$0xff] }
0x1bb4   :  { %3692 = vmatmul.msk.bf16.vlgmr.msra.gmra.mxu3 %vm71_vm0, %v2119_v16  ;;  %3693 = vmatmul.msk.bf16.vlgmr.msrb.gmra.mxu2 %vm71_vm0, %v2119_v16 }
0x1bf2   :  { %v2084_v7 = vpop.permute.xlu2 %2083 }
0x1bfa   :  { %v2115_v16 = vpop.permute.xlu2 %2114 }
0x1c27   :  { %v2000_v17 = vpop.f32.mrf.mxu3  ;;  %v2026_v55 = vpop.f32.mrf.mxu2 }
0x1c28   :  { %v2027_v27 = vadd.f32 %v2026_v55, %v5157_v44  ;;  %v2001_v33 = vadd.f32 %v2000_v17, %v5167_v19 }
0x1c2a   :  { %v2040_v12 = vadd.f32 %v5460_v58, %v2027_v27  ;;  %v2014_v35 = vadd.f32 %v5458_v8, %v2001_v33 }
0x1c2c   :  { %4082 = vtanh.f32 %v2040_v12  ;;  %v3690_v18 = vmul.f32 -1.442695, %v2014_v35  ;;  %v3691_v48 = vmul.f32 -1.442695, %v2040_v12 }
0x1c2e   :  { %4084 = vpow2.f32 %v3690_v18 }
0x1c2f   :  { %v2002_v24 = vpop.f32.mrf.mxu3  ;;  %v2028_v54 = vpop.f32.mrf.mxu2 }
0x1c32   :  { %v4083_v52 = vpop.eup %4082 }
0x1c33   :  { %2088 = vrot.lane.b32.xlu1 %v4083_v52, %s4231_s17 }
0x1c34   :  { %v4085_v15 = vpop.eup %4084 }
0x1c35   :  { %v2049_v58 = vadd.f32 1.0, %v4085_v15 }
0x1c37   :  { %v5491_v23 = vpop.f32.mrf.mxu3  ;;  %v5493_v43 = vpop.f32.mrf.mxu2  ;;  %4086 = vrcp.f32 %v2049_v58  ;;  %v2062_v29 = vand.u32 2147483648, %v2049_v58  ;;  %vm2056_vm1 = vweird.f32 %v2049_v58  ;;  %v2060_v26 = vand.u32 2147483647, %v2049_v58 }
0x1c39   :  { %v2063_v38 = vor.u32 1.1754944e-38, %v2062_v29  ;;  %vm2061_vm9 = vcmp.eq.f32.partialorder %v2060_v26, 8.507059e+37 }
0x1c3d   :  { %v4087_v36 = vpop.eup %4086 }
0x1c3e   :  { %v2052_v31 = vmul.f32 %v4087_v36, %v2049_v58  ;;  %vm2057_vm14 = vweird.f32 %v4087_v36 }
0x1c3f   :  { %v2147_v47 = vpop.f32.mrf.mxu3  ;;  %v2173_v11 = vpop.f32.mrf.mxu2  ;;  %vm2058_vm2 = vmor %vm2056_vm1, %vm2057_vm14 }
0x1c40   :  { %v2053_v57 = vsub.f32 1.0, %v2052_v31 }
0x1c42   :  { %v2054_v39 = vmul.f32 %v4087_v36, %v2053_v57 }
0x1c44   :  { %v2055_v25 = vadd.f32 %v4087_v36, %v2054_v39 }
0x1c46   :  { %v2059_v41 = vsel %vm2058_vm2, %v4087_v36, %v2055_v25 }
0x1c47   :  { %v2064_v8 = vsel %vm2061_vm9, %v2063_v38, %v2059_v41  ;;  %v3786_v41 = vld [vmem:[%s6207_s6 + $0xb0] sm:$0xf]  ;;  %v3898_v38 = vld [vmem:[%s6207_s6 + $0xb4] sm:$0xf0] }
0x1c48   :  { %v2086_v45 = vmul.f32 %v2084_v7, %v2064_v8 }
0x1ca5   :  { %v2089_v22 = vpop.permute.xlu1 %2088 }
0x1ca6   :  { %v2091_v13 = vmul.f32 %v2089_v22, %v2064_v8  ;;  %v3897_v22 = vld [vmem:[%s6207_s6 + $0xb4] sm:$0xf]  ;;  %v5530_v8 = vor.u32 %v3898_v38, %v3786_v41  ;;  %v3730_v41 = vld [vmem:[%s6207_s6 + $0x40] sm:$0xf]  ;;  %v3884_v38 = vld [vmem:[%s6207_s6 + $0x44] sm:$0xf0] }
0x1ca8   :  { %2093 = vrot.lane.b32.xlu0 %v2091_v13, %s4231_s17  ;;  %v3788_v13 = vld [vmem:[%s6207_s6 + $0xb8] sm:$0xf0]  ;;  %2417 = vmatpush.bf16.msra.mxu1 %v5530_v8 }
0x1ca9   :  { %v5535_v7 = vor.u32 %v3897_v22, %v3788_v13  ;;  %v3883_v22 = vld [vmem:[%s6207_s6 + $0x44] sm:$0xf]  ;;  %v3732_v13 = vld [vmem:[%s6207_s6 + $0x48] sm:$0xf0] }
0x1cab   :  { %2443 = vmatpush.bf16.msrb.mxu0 %v5535_v7 }
0x1d1a   :  { %v2094_v3 = vpop.permute.xlu0 %2093 }
0x1d1b   :  { %v2096_v0 = vadd.f32 %v2094_v3, %v2086_v45 }
0x1d1d   :  { %4088 = vtanh.f32 %v2096_v0  ;;  %2105 = vrot.lane.b32.xlu0 %v2096_v0, %s4231_s17 }
0x1d1e   :  { %4090 = vpow2.f32 %v3691_v48 }
0x1d23   :  { %v4089_v28 = vpop.eup %4088 }
0x1d24   :  { %2099 = vrot.lane.b32.xlu1 %v4089_v28, %s4231_s17  ;;  %v4091_v5 = vpop.eup %4090 }
0x1d25   :  { %v2050_v49 = vadd.f32 1.0, %v4091_v5 }
0x1d27   :  { %4092 = vrcp.f32 %v2050_v49  ;;  %v2077_v32 = vand.u32 2147483648, %v2050_v49  ;;  %vm2071_vm1 = vweird.f32 %v2050_v49  ;;  %v2075_v59 = vand.u32 2147483647, %v2050_v49 }
0x1d29   :  { %v2078_v37 = vor.u32 1.1754944e-38, %v2077_v32  ;;  %vm2076_vm9 = vcmp.eq.f32.partialorder %v2075_v59, 8.507059e+37  ;;  %v3770_v32 = vld [vmem:[%s6207_s6 + $0x90] sm:$0xf]  ;;  %v3894_v59 = vld [vmem:[%s6207_s6 + $0x94] sm:$0xf0] }
0x1d2d   :  { %v4093_v1 = vpop.eup %4092 }
0x1d2e   :  { %v2067_v4 = vmul.f32 %v4093_v1, %v2050_v49  ;;  %vm2072_vm14 = vweird.f32 %v4093_v1 }
0x1d2f   :  { %vm2073_vm2 = vmor %vm2071_vm1, %vm2072_vm14 }
0x1d30   :  { %v2068_v56 = vsub.f32 1.0, %v2067_v4  ;;  %v3778_v4 = vld [vmem:[%s6207_s6 + $0xa0] sm:$0xf] }
0x1d32   :  { %v2069_v6 = vmul.f32 %v4093_v1, %v2068_v56  ;;  %v3896_v56 = vld [vmem:[%s6207_s6 + $0xa4] sm:$0xf0] }
0x1d34   :  { %v2070_v14 = vadd.f32 %v4093_v1, %v2069_v6  ;;  %v3895_v6 = vld [vmem:[%s6207_s6 + $0xa4] sm:$0xf] }
0x1d36   :  { %v2074_v30 = vsel %vm2073_vm2, %v4093_v1, %v2070_v14  ;;  %v3780_v14 = vld [vmem:[%s6207_s6 + $0xa8] sm:$0xf0] }
0x1d37   :  { %v2079_v63 = vsel %vm2076_vm9, %v2078_v37, %v2074_v30  ;;  %v3893_v30 = vld [vmem:[%s6207_s6 + $0x94] sm:$0xf]  ;;  %v5570_v37 = vor.u32 %v3894_v59, %v3770_v32  ;;  %v3714_v59 = vld [vmem:[%s6207_s6 + $0x20] sm:$0xf] }
0x1d8f   :  { %v2106_v10 = vpop.permute.xlu0 %2105 }
0x1d90   :  { %v2108_v20 = vsel %vm4826_vm15, %v2106_v10, %v5470_v53  ;;  %v5551_v10 = vor.u32 %v3896_v56, %v3778_v4  ;;  %v3881_v4 = vld [vmem:[%s6207_s6 + $0x34] sm:$0xf]  ;;  %v3724_v56 = vld [vmem:[%s6207_s6 + $0x38] sm:$0xf0] }
0x1d91   :  { %2215 = vrot.lane.b32.xlu2 %v2108_v20, %s4231_s17  ;;  %v5556_v20 = vor.u32 %v3895_v6, %v3780_v14 }
0x1d92   :  { %2418 = vmatpush.bf16.msra.mxu1 %v5551_v10 }
0x1d93   :  { %2444 = vmatpush.bf16.msrb.mxu0 %v5556_v20 }
0x1d96   :  { %v2100_v62 = vpop.permute.xlu1 %2099  ;;  %2419 = vmatpush.bf16.msra.mxu1 %v5570_v37 }
0x1d97   :  { %v2102_v9 = vmul.f32 %v2100_v62, %v2079_v63  ;;  %v3772_v63 = vld [vmem:[%s6207_s6 + $0x98] sm:$0xf0]  ;;  %v3762_v62 = vld [vmem:[%s6207_s6 + $0x80] sm:$0xf] }
0x1d99   :  { %v5507_v17 = vsel %vm4826_vm15, %v2102_v9, %v5477_v42  ;;  %v3892_v9 = vld [vmem:[%s6207_s6 + $0x84] sm:$0xf0] }
0x1d9a   :  { %2109 = vst.msk [vmem:[#allocation3 + $0x30] sm:$0xff] %vm238_vm6, %v5507_v17  ;;  %v2117_v53 = vsel %vm71_vm0, %v5507_v17, %v2115_v16  ;;  %v5581_v16 = vor.u32 %v3893_v30, %v3772_v63  ;;  %v3880_v30 = vld [vmem:[%s6207_s6 + $0x24] sm:$0xf0]  ;;  %v3879_v63 = vld [vmem:[%s6207_s6 + $0x24] sm:$0xf] }
0x1d9b   :  { %2110 = vst.msk [vmem:[#allocation3 + $0x8] sm:$0xff] %vm255_vm12, %v5507_v17  ;;  %v2118_v55 = vpack.c.bf16 %v2117_v53, %v2117_v53  ;;  %v3891_v53 = vld [vmem:[%s6207_s6 + $0x84] sm:$0xf] }
0x1d9c   :  { %2445 = vmatpush.bf16.msrb.mxu0 %v5581_v16 }
0x1d9d   :  { %2131 = vmatmul.bf16.vlgmr.msrb.gmra.mxu1 %v2118_v55  ;;  %2157 = vmatmul.bf16.vlgmr.msra.gmra.mxu0 %v2118_v55  ;;  %v3764_v55 = vld [vmem:[%s6207_s6 + $0x88] sm:$0xf0] }
0x1da1   :  { %v4202_v46 = vld [vmem:[#allocation3 + $0x30] sm:$0xff] }
0x1deb   :  { %v2216_v45 = vpop.permute.xlu2 %2215 }
0x1e1a   :  { %v2132_v27 = vpop.f32.mrf.mxu1  ;;  %v2158_v12 = vpop.f32.mrf.mxu0 }
0x1e1b   :  { %v2159_v24 = vadd.f32 %v2158_v12, %v5157_v44  ;;  %v2133_v11 = vadd.f32 %v2132_v27, %v5167_v19  ;;  %v5590_v27 = vor.u32 %v3892_v9, %v3762_v62  ;;  %v5593_v12 = vor.u32 %v3891_v53, %v3764_v55  ;;  %v3716_v62 = vld [vmem:[%s6207_s6 + $0x28] sm:$0xf0] }
0x1e1d   :  { %v2172_v54 = vadd.f32 %v5493_v43, %v2159_v24  ;;  %v2146_v33 = vadd.f32 %v5491_v23, %v2133_v11  ;;  %2420 = vmatpush.bf16.msra.mxu1 %v5590_v27  ;;  %2446 = vmatpush.bf16.msrb.mxu0 %v5593_v12 }
0x1e1f   :  { %4094 = vtanh.f32 %v2172_v54  ;;  %v3694_v35 = vmul.f32 -1.442695, %v2146_v33  ;;  %v3695_v5 = vmul.f32 -1.442695, %v2172_v54  ;;  %v3756_v33 = vld [vmem:[%s6207_s6 + $0x78] sm:$0xf0] }
0x1e21   :  { %4096 = vpow2.f32 %v3694_v35  ;;  %v3746_v35 = vld [vmem:[%s6207_s6 + $0x60] sm:$0xf] }
0x1e22   :  { %v2134_v42 = vpop.f32.mrf.mxu1  ;;  %v2160_v52 = vpop.f32.mrf.mxu0 }
0x1e23   :  { %v3754_v42 = vld [vmem:[%s6207_s6 + $0x70] sm:$0xf]  ;;  %v3890_v52 = vld [vmem:[%s6207_s6 + $0x74] sm:$0xf0] }
0x1e24   :  { %v5610_v11 = vor.u32 %v3890_v52, %v3754_v42  ;;  %v3706_v42 = vld [vmem:[%s6207_s6 + $0x10] sm:$0xf]  ;;  %v3878_v52 = vld [vmem:[%s6207_s6 + $0x14] sm:$0xf0] }
0x1e25   :  { %v4095_v47 = vpop.eup %4094 }
0x1e26   :  { %2220 = vrot.lane.b32.xlu1 %v4095_v47, %s4231_s17  ;;  %v3889_v47 = vld [vmem:[%s6207_s6 + $0x74] sm:$0xf]  ;;  %2400 = vmatpush.bf16.msrb.mxu3 %v5610_v11 }
0x1e27   :  { %v4097_v18 = vpop.eup %4096  ;;  %2526 = vmatpush.bf16.msrb.mxu1 %v5610_v11 }
0x1e28   :  { %v2181_v15 = vadd.f32 1.0, %v4097_v18  ;;  %v3888_v18 = vld [vmem:[%s6207_s6 + $0x64] sm:$0xf0] }
0x1e2a   :  { %4098 = vrcp.f32 %v2181_v15  ;;  %v2194_v57 = vand.u32 2147483648, %v2181_v15  ;;  %vm2188_vm1 = vweird.f32 %v2181_v15  ;;  %v2192_v39 = vand.u32 2147483647, %v2181_v15 }
0x1e2c   :  { %v2195_v29 = vor.u32 1.1754944e-38, %v2194_v57  ;;  %vm2193_vm9 = vcmp.eq.f32.partialorder %v2192_v39, 8.507059e+37  ;;  %v3738_v57 = vld [vmem:[%s6207_s6 + $0x50] sm:$0xf]  ;;  %v3886_v39 = vld [vmem:[%s6207_s6 + $0x54] sm:$0xf0] }
0x1e30   :  { %v4099_v58 = vpop.eup %4098 }
0x1e31   :  { %v2184_v36 = vmul.f32 %v4099_v58, %v2181_v15  ;;  %vm2189_vm14 = vweird.f32 %v4099_v58  ;;  %v5621_v15 = vor.u32 %v3889_v47, %v3756_v33  ;;  %v3877_v33 = vld [vmem:[%s6207_s6 + $0x14] sm:$0xf] }
0x1e32   :  { %vm2190_vm2 = vmor %vm2188_vm1, %vm2189_vm14 }
0x1e33   :  { %v2185_v44 = vsub.f32 1.0, %v2184_v36  ;;  %v3748_v36 = vld [vmem:[%s6207_s6 + $0x68] sm:$0xf0]  ;;  %2426 = vmatpush.bf16.msra.mxu2 %v5621_v15  ;;  %2552 = vmatpush.bf16.msra.mxu0 %v5621_v15 }
0x1e35   :  { %v2186_v31 = vmul.f32 %v4099_v58, %v2185_v44 }
0x1e37   :  { %v2187_v43 = vadd.f32 %v4099_v58, %v2186_v31  ;;  %v5630_v31 = vor.u32 %v3888_v18, %v3746_v35  ;;  %v3708_v35 = vld [vmem:[%s6207_s6 + $0x18] sm:$0xf0]  ;;  %v5742_v18 = vor.u32 %v3878_v52, %v3706_v42 }
0x1e39   :  { %v2191_v25 = vsel %vm2190_vm2, %v4099_v58, %v2187_v43  ;;  %v3887_v58 = vld [vmem:[%s6207_s6 + $0x64] sm:$0xf]  ;;  %2401 = vmatpush.bf16.msrb.mxu3 %v5630_v31  ;;  %2527 = vmatpush.bf16.msrb.mxu1 %v5630_v31 }
0x1e3a   :  { %v2196_v23 = vsel %vm2193_vm9, %v2195_v29, %v2191_v25  ;;  %v5634_v43 = vor.u32 %v3887_v58, %v3748_v36  ;;  %v3885_v25 = vld [vmem:[%s6207_s6 + $0x54] sm:$0xf]  ;;  %v3740_v29 = vld [vmem:[%s6207_s6 + $0x58] sm:$0xf0]  ;;  %v3698_v58 = vld [vmem:[%s6207_s6] sm:$0xf] }
0x1e3b   :  { %v2218_v3 = vmul.f32 %v2216_v45, %v2196_v23  ;;  %v3876_v36 = vld [vmem:[%s6207_s6 + $0x4] sm:$0xf0] }
0x1e3c   :  { %2427 = vmatpush.bf16.msra.mxu2 %v5634_v43  ;;  %2553 = vmatpush.bf16.msra.mxu0 %v5634_v43 }
0x1e98   :  { %v2221_v19 = vpop.permute.xlu1 %2220 }
0x1e99   :  { %v2223_v26 = vmul.f32 %v2221_v19, %v2196_v23  ;;  %v5651_v23 = vor.u32 %v3886_v39, %v3738_v57  ;;  %v3700_v57 = vld [vmem:[%s6207_s6 + $0x8] sm:$0xf0]  ;;  %v5762_v39 = vor.u32 %v3876_v36, %v3698_v58 }
0x1e9b   :  { %2225 = vrot.lane.b32.xlu0 %v2223_v26, %s4231_s17  ;;  %v5655_v26 = vor.u32 %v3885_v25, %v3740_v29  ;;  %2402 = vmatpush.bf16.msrb.mxu3 %v5651_v23 }
0x1e9c   :  { %2528 = vmatpush.bf16.msrb.mxu1 %v5651_v23 }
0x1e9d   :  { %2428 = vmatpush.bf16.msra.mxu2 %v5655_v26  ;;  %2554 = vmatpush.bf16.msra.mxu0 %v5655_v26 }
0x1f0d   :  { %v2226_v0 = vpop.permute.xlu0 %2225 }
0x1f0e   :  { %v2228_v28 = vadd.f32 %v2226_v0, %v2218_v3  ;;  %v5673_v3 = vor.u32 %v3884_v38, %v3730_v41 }
0x1f10   :  { %4100 = vtanh.f32 %v2228_v28  ;;  %v5678_v28 = vor.u32 %v3883_v22, %v3732_v13  ;;  %2403 = vmatpush.bf16.msrb.mxu3 %v5673_v3  ;;  %2529 = vmatpush.bf16.msrb.mxu1 %v5673_v3  ;;  %v2515_v13 = vld [vmem:[#allocation3 + $0x30] sm:$0xff] }
0x1f11   :  { %4102 = vpow2.f32 %v3695_v5  ;;  %v3882_v5 = vld [vmem:[%s6207_s6 + $0x34] sm:$0xf0] }
0x1f12   :  { %2429 = vmatpush.bf16.msra.mxu2 %v5678_v28  ;;  %2555 = vmatpush.bf16.msra.mxu0 %v5678_v28 }
0x1f16   :  { %v4101_v48 = vpop.eup %4100 }
0x1f17   :  { %2231 = vrot.lane.b32.xlu1 %v4101_v48, %s4231_s17  ;;  %v4103_v49 = vpop.eup %4102  ;;  %v3722_v48 = vld [vmem:[%s6207_s6 + $0x30] sm:$0xf] }
0x1f18   :  { %v5540_v1 = vadd.f32 1.0, %v4103_v49  ;;  %v5697_v14 = vor.u32 %v3882_v5, %v3722_v48 }
0x1f1a   :  { %4104 = vrcp.f32 %v5540_v1  ;;  %v2209_v0 = vand.u32 2147483648, %v5540_v1  ;;  %vm2203_vm1 = vweird.f32 %v5540_v1  ;;  %v2207_v49 = vand.u32 2147483647, %v5540_v1  ;;  %2404 = vmatpush.bf16.msrb.mxu3 %v5697_v14  ;;  %2530 = vmatpush.bf16.msrb.mxu1 %v5697_v14 }
0x1f1c   :  { %v2210_v32 = vor.u32 1.1754944e-38, %v2209_v0  ;;  %vm2208_vm9 = vcmp.eq.f32.partialorder %v2207_v49, 8.507059e+37  ;;  %v2262_v49 = vld [vmem:[%s6208_s7] sm:$0x3] }
0x1f20   :  { %v5595_v24 = vpop.eup %4104 }
0x1f21   :  { %v2199_v54 = vmul.f32 %v5595_v24, %v5540_v1  ;;  %vm2204_vm14 = vweird.f32 %v5595_v24  ;;  %v5701_v1 = vor.u32 %v3881_v4, %v3724_v56  ;;  %v5825_v4 = vperm.slane %v2262_v49, 1 }
0x1f22   :  { %vm2205_vm2 = vmor %vm2203_vm1, %vm2204_vm14 }
0x1f23   :  { %v2200_v44 = vsub.f32 1.0, %v2199_v54  ;;  %2430 = vmatpush.bf16.msra.mxu2 %v5701_v1  ;;  %v5721_v54 = vor.u32 %v3879_v63, %v3716_v62  ;;  %2556 = vmatpush.bf16.msra.mxu0 %v5701_v1 }
0x1f25   :  { %v2201_v19 = vmul.f32 %v5595_v24, %v2200_v44  ;;  %v3875_v44 = vld [vmem:[%s6207_s6 + $0x4] sm:$0xf] }
0x1f26   :  { %v5767_v29 = vor.u32 %v3875_v44, %v3700_v57 }
0x1f27   :  { %v2202_v45 = vadd.f32 %v5595_v24, %v2201_v19  ;;  %2431 = vmatpush.bf16.msra.mxu2 %v5721_v54  ;;  %2557 = vmatpush.bf16.msra.mxu0 %v5721_v54 }
0x1f29   :  { %v2206_v6 = vsel %vm2205_vm2, %v5595_v24, %v2202_v45  ;;  %v5717_v24 = vor.u32 %v3880_v30, %v3714_v59  ;;  %v2522_v45 = vpack.c.bf16 %v2515_v13, %v2515_v13 }
0x1f2a   :  { %v2211_v9 = vsel %vm2208_vm9, %v2210_v32, %v2206_v6 }
0x1f2b   :  { %2405 = vmatpush.bf16.msrb.mxu3 %v5717_v24  ;;  %2531 = vmatpush.bf16.msrb.mxu1 %v5717_v24 }
0x1f2f   :  { %2406 = vmatpush.bf16.msrb.mxu3 %v5742_v18  ;;  %2532 = vmatpush.bf16.msrb.mxu1 %v5742_v18 }
0x1f33   :  { %2407 = vmatpush.bf16.msrb.mxu3 %v5762_v39  ;;  %2533 = vmatpush.bf16.msrb.mxu1 %v5762_v39 }
0x1f37   :  { %2543 = vmatpush.bf16.msra.mxu3 %v5530_v8 }
0x1f3b   :  { %2544 = vmatpush.bf16.msra.mxu3 %v5551_v10 }
0x1f3f   :  { %2545 = vmatpush.bf16.msra.mxu3 %v5570_v37 }
0x1f43   :  { %2546 = vmatpush.bf16.msra.mxu3 %v5590_v27 }
0x1f89   :  { %v2232_v53 = vpop.permute.xlu1 %2231 }
0x1f8a   :  { %v2234_v55 = vmul.f32 %v2232_v53, %v2211_v9 }
0x1f8c   :  { %v2235_v47 = vsel %vm4961_vm3, %v2234_v55, %v5507_v17  ;;  %v5746_v17 = vor.u32 %v3877_v33, %v3708_v35  ;;  %v5833_v55 = vld [vmem:[#allocation3 + $0x8] sm:$0xff] }
0x1f8d   :  { %2236 = vst.msk [vmem:[#allocation3 + $0x38] sm:$0xff] %vm238_vm6, %v2235_v47 }
0x1f8e   :  { %2237 = vst.msk [vmem:[#allocation3] sm:$0xff] %vm255_vm12, %v2235_v47  ;;  %2432 = vmatpush.bf16.msra.mxu2 %v5746_v17  ;;  %2558 = vmatpush.bf16.msra.mxu0 %v5746_v17  ;;  %v5837_v47 = vperm.slane %v2262_v49, 0 }
0x1f92   :  { %2433 = vmatpush.bf16.msra.mxu2 %v5767_v29  ;;  %2559 = vmatpush.bf16.msra.mxu0 %v5767_v29 }
0x1f94   :  { %v2269_v25 = vld [vmem:[#allocation3 + $0x38] sm:$0xff] }
0x1f95   :  { %v2268_v19 = vld [vmem:[#allocation3] sm:$0xff]  ;;  %v2276_v41 = vpack.c.bf16 %v2269_v25, %v2269_v25 }
0x1f96   :  { %2271 = vrot.lane.b32.xlu2 %v2268_v19, %s4231_s17  ;;  %2569 = vmatpush.bf16.msrb.mxu2 %v5535_v7 }
0x1f97   :  { %3797 = vmatmul.msk.bf16.vlgmr.msra.gmra.mxu1 %vm71_vm0, %v2276_v41  ;;  %3803 = vmatmul.msk.bf16.vlgmr.msrb.gmra.mxu0 %vm71_vm0, %v2276_v41 }
0x1f98   :  { %2673 = vmatpush.bf16.msra.mxu1 %v5530_v8  ;;  %2699 = vmatpush.bf16.msrb.mxu0 %v5535_v7 }
0x1f9a   :  { %2570 = vmatpush.bf16.msrb.mxu2 %v5556_v20 }
0x1f9c   :  { %2674 = vmatpush.bf16.msra.mxu1 %v5551_v10  ;;  %2700 = vmatpush.bf16.msrb.mxu0 %v5556_v20 }
0x1f9e   :  { %2571 = vmatpush.bf16.msrb.mxu2 %v5581_v16 }
0x1fa0   :  { %2675 = vmatpush.bf16.msra.mxu1 %v5570_v37  ;;  %2701 = vmatpush.bf16.msrb.mxu0 %v5581_v16 }
0x1fa2   :  { %2572 = vmatpush.bf16.msrb.mxu2 %v5593_v12 }
0x1fa4   :  { %2676 = vmatpush.bf16.msra.mxu1 %v5590_v27  ;;  %2702 = vmatpush.bf16.msrb.mxu0 %v5593_v12 }
0x1ff0   :  { %v2272_v38 = vpop.permute.xlu2 %2271 }
0x1ff1   :  { %v3795_v22 = vpack.c.bf16 %v2272_v38, %v2272_v38 }
0x1ff3   :  { %3796 = vmatmul.msk.bf16.vlgmr.msrb.gmra.mxu3 %vm5123_vm13, %v3795_v22  ;;  %3802 = vmatmul.msk.bf16.vlgmr.msra.gmra.mxu2 %vm5123_vm13, %v3795_v22 }
0x1ff4   :  { %2656 = vmatpush.bf16.msrb.mxu3 %v5610_v11  ;;  %2682 = vmatpush.bf16.msra.mxu2 %v5621_v15 }
0x1ff8   :  { %2657 = vmatpush.bf16.msrb.mxu3 %v5630_v31  ;;  %2683 = vmatpush.bf16.msra.mxu2 %v5634_v43 }
0x1ffc   :  { %2658 = vmatpush.bf16.msrb.mxu3 %v5651_v23  ;;  %2684 = vmatpush.bf16.msra.mxu2 %v5655_v26 }
0x2000   :  { %2659 = vmatpush.bf16.msrb.mxu3 %v5673_v3  ;;  %2685 = vmatpush.bf16.msra.mxu2 %v5678_v28 }
0x2003   :  { %3806 = vmatmul.msk.bf16.vlgmr.msra.gmra.mxu3 %vm71_vm0, %v2522_v45  ;;  %3807 = vmatmul.msk.bf16.vlgmr.msrb.gmra.mxu2 %vm71_vm0, %v2522_v45 }
0x2004   :  { %2660 = vmatpush.bf16.msrb.mxu3 %v5697_v14  ;;  %2686 = vmatpush.bf16.msra.mxu2 %v5701_v1 }
0x2008   :  { %2661 = vmatpush.bf16.msrb.mxu3 %v5717_v24  ;;  %2687 = vmatpush.bf16.msra.mxu2 %v5721_v54 }
0x200c   :  { %2662 = vmatpush.bf16.msrb.mxu3 %v5742_v18  ;;  %2688 = vmatpush.bf16.msra.mxu2 %v5746_v17 }
0x2010   :  { %2663 = vmatpush.bf16.msrb.mxu3 %v5762_v39  ;;  %2689 = vmatpush.bf16.msra.mxu2 %v5767_v29 }
0x2014   :  { %2803 = vmatpush.bf16.msra.mxu3 %v5530_v8  ;;  %2829 = vmatpush.bf16.msrb.mxu2 %v5535_v7  ;;  %v2422_v60 = vpop.f32.mrf.mxu1  ;;  %v2448_v0 = vpop.f32.mrf.mxu0 }
0x2018   :  { %2804 = vmatpush.bf16.msra.mxu3 %v5551_v10  ;;  %2830 = vmatpush.bf16.msrb.mxu2 %v5556_v20 }
0x201c   :  { %2805 = vmatpush.bf16.msra.mxu3 %v5570_v37  ;;  %2831 = vmatpush.bf16.msrb.mxu2 %v5581_v16  ;;  %v2424_v48 = vpop.f32.mrf.mxu1  ;;  %v2450_v5 = vpop.f32.mrf.mxu0 }
0x2020   :  { %2806 = vmatpush.bf16.msra.mxu3 %v5590_v27  ;;  %2832 = vmatpush.bf16.msrb.mxu2 %v5593_v12 }
0x2076   :  { %v2409_v56 = vpop.f32.mrf.mxu3  ;;  %v2435_v6 = vpop.f32.mrf.mxu2 }
0x2077   :  { %v2436_v32 = vadd.f32 %v2435_v6, %v5825_v4  ;;  %v2410_v33 = vadd.f32 %v2409_v56, %v5837_v47 }
0x2079   :  { %v2449_v59 = vadd.f32 %v2448_v0, %v2436_v32  ;;  %v2423_v35 = vadd.f32 %v2422_v60, %v2410_v33 }
0x207b   :  { %4106 = vtanh.f32 %v2449_v59  ;;  %v3804_v58 = vmul.f32 -1.442695, %v2423_v35 }
0x207d   :  { %4108 = vpow2.f32 %v3804_v58 }
0x207e   :  { %v2411_v30 = vpop.f32.mrf.mxu3  ;;  %v2437_v63 = vpop.f32.mrf.mxu2 }
0x207f   :  { %v3805_v30 = vmul.f32 -1.442695, %v2449_v59 }
0x2081   :  { %v4107_v62 = vpop.eup %4106 }
0x2082   :  { %2493 = vrot.lane.b32.xlu0 %v4107_v62, %s4231_s17 }
0x2083   :  { %v4109_v36 = vpop.eup %4108 }
0x2084   :  { %v2458_v44 = vadd.f32 1.0, %v4109_v36 }
0x2086   :  { %v5829_v9 = vpop.f32.mrf.mxu3  ;;  %v5831_v53 = vpop.f32.mrf.mxu2  ;;  %4110 = vrcp.f32 %v2458_v44  ;;  %v2471_v22 = vand.u32 2147483648, %v2458_v44  ;;  %vm2465_vm12 = vweird.f32 %v2458_v44  ;;  %v2469_v13 = vand.u32 2147483647, %v2458_v44 }
0x2088   :  { %v2472_v0 = vor.u32 1.1754944e-38, %v2471_v22  ;;  %vm2470_vm14 = vcmp.eq.f32.partialorder %v2469_v13, 8.507059e+37 }
0x208a   :  { %2517 = vrot.lane.b32.xlu0 %v5833_v55, %s4231_s17 }
0x208c   :  { %v4111_v57 = vpop.eup %4110 }
0x208d   :  { %v2461_v25 = vmul.f32 %v4111_v57, %v2458_v44  ;;  %vm2466_vm6 = vweird.f32 %v4111_v57 }
0x208e   :  { %v2550_v42 = vpop.f32.mrf.mxu3  ;;  %v2576_v52 = vpop.f32.mrf.mxu2  ;;  %vm2467_vm13 = vmor %vm2465_vm12, %vm2466_vm6 }
0x208f   :  { %v2462_v19 = vsub.f32 1.0, %v2461_v25 }
0x2091   :  { %v2463_v41 = vmul.f32 %v4111_v57, %v2462_v19 }
0x2093   :  { %v2464_v38 = vadd.f32 %v4111_v57, %v2463_v41 }
0x2095   :  { %v2468_v45 = vsel %vm2467_vm13, %v4111_v57, %v2464_v38 }
0x2096   :  { %v2473_v60 = vsel %vm2470_vm14, %v2472_v0, %v2468_v45 }
0x2097   :  { %v2491_v49 = vmul.f32 0.0, %v2473_v60 }
0x20f4   :  { %v2494_v48 = vpop.permute.xlu0 %2493 }
0x20f5   :  { %v2496_v5 = vmul.f32 %v2494_v48, %v2473_v60  ;;  %v5859_v60 = vld [vmem:[#allocation3 + $0x28] sm:$0xff] }
0x20f7   :  { %2498 = vrot.lane.b32.xlu1 %v2496_v5, %s4231_s17  ;;  %v2652_v5 = vpack.c.bf16 %v5859_v60, %v5859_v60 }
0x20fc   :  { %v2518_v38 = vpop.permute.xlu0 %2517 }
0x2169   :  { %v2499_v56 = vpop.permute.xlu1 %2498 }
0x216a   :  { %v2501_v6 = vadd.f32 %v2499_v56, %v2491_v49 }
0x216c   :  { %4112 = vtanh.f32 %v2501_v6  ;;  %2510 = vrot.lane.b32.xlu1 %v2501_v6, %s4231_s17 }
0x216d   :  { %4114 = vpow2.f32 %v3805_v30 }
0x2172   :  { %v4113_v32 = vpop.eup %4112 }
0x2173   :  { %2504 = vrot.lane.b32.xlu2 %v4113_v32, %s4231_s17  ;;  %v4115_v63 = vpop.eup %4114 }
0x2174   :  { %v2459_v62 = vadd.f32 1.0, %v4115_v63 }
0x2176   :  { %4116 = vrcp.f32 %v2459_v62  ;;  %v2486_v36 = vand.u32 2147483648, %v2459_v62  ;;  %vm2480_vm2 = vweird.f32 %v2459_v62  ;;  %v2484_v44 = vand.u32 2147483647, %v2459_v62 }
0x2178   :  { %v2487_v25 = vor.u32 1.1754944e-38, %v2486_v36  ;;  %vm2485_vm6 = vcmp.eq.f32.partialorder %v2484_v44, 8.507059e+37 }
0x217c   :  { %v4117_v42 = vpop.eup %4116 }
0x217d   :  { %v2476_v52 = vmul.f32 %v4117_v42, %v2459_v62  ;;  %vm2481_vm1 = vweird.f32 %v4117_v42 }
0x217e   :  { %vm2482_vm9 = vmor %vm2480_vm2, %vm2481_vm1 }
0x217f   :  { %v2477_v33 = vsub.f32 1.0, %v2476_v52 }
0x2181   :  { %v2478_v35 = vmul.f32 %v4117_v42, %v2477_v33 }
0x2183   :  { %v2479_v58 = vadd.f32 %v4117_v42, %v2478_v35 }
0x2185   :  { %v2483_v57 = vsel %vm2482_vm9, %v4117_v42, %v2479_v58 }
0x2186   :  { %v2488_v19 = vsel %vm2485_vm6, %v2487_v25, %v2483_v57 }
0x21cd   :  { %v2505_v41 = vpop.permute.xlu2 %2504 }
0x21ce   :  { %v2507_v59 = vmul.f32 %v2505_v41, %v2488_v19 }
0x21d0   :  { %v5845_v22 = vsel %vm4550_vm11, %v2507_v59, 0.0 }
0x21d1   :  { %v2520_v13 = vsel %vm71_vm0, %v5845_v22, %v2518_v38 }
0x21d2   :  { %v2521_v45 = vpack.c.bf16 %v2520_v13, %v2520_v13 }
0x21d4   :  { %2534 = vmatmul.bf16.vlgmr.msrb.gmra.mxu1 %v2521_v45  ;;  %2560 = vmatmul.bf16.vlgmr.msra.gmra.mxu0 %v2521_v45 }
0x21d5   :  { %2786 = vmatpush.bf16.msrb.mxu1 %v5610_v11  ;;  %2812 = vmatpush.bf16.msra.mxu0 %v5621_v15 }
0x21d9   :  { %2787 = vmatpush.bf16.msrb.mxu1 %v5630_v31  ;;  %2813 = vmatpush.bf16.msra.mxu0 %v5634_v43 }
0x21dd   :  { %2788 = vmatpush.bf16.msrb.mxu1 %v5651_v23  ;;  %2814 = vmatpush.bf16.msra.mxu0 %v5655_v26 }
0x21de   :  { %v2511_v0 = vpop.permute.xlu1 %2510 }
0x21df   :  { %v5857_v48 = vsel %vm4550_vm11, %v2511_v0, 0.0 }
0x21e0   :  { %2618 = vrot.lane.b32.xlu0 %v5857_v48, %s4231_s17 }
0x21e1   :  { %2789 = vmatpush.bf16.msrb.mxu1 %v5673_v3  ;;  %2815 = vmatpush.bf16.msra.mxu0 %v5678_v28 }
0x21e4   :  { %3810 = vmatmul.msk.bf16.vlgmr.msra.gmra.mxu1 %vm71_vm0, %v2652_v5  ;;  %3811 = vmatmul.msk.bf16.vlgmr.msrb.gmra.mxu0 %vm71_vm0, %v2652_v5 }
0x21e5   :  { %2790 = vmatpush.bf16.msrb.mxu1 %v5697_v14  ;;  %2816 = vmatpush.bf16.msra.mxu0 %v5701_v1 }
0x21e8   :  { %2647 = vrot.lane.b32.xlu0 %v5871_v61, %s4231_s17 }
0x21e9   :  { %2791 = vmatpush.bf16.msrb.mxu1 %v5717_v24  ;;  %2817 = vmatpush.bf16.msra.mxu0 %v5721_v54 }
0x21ed   :  { %2792 = vmatpush.bf16.msrb.mxu1 %v5742_v18  ;;  %2818 = vmatpush.bf16.msra.mxu0 %v5746_v17 }
0x21f1   :  { %2793 = vmatpush.bf16.msrb.mxu1 %v5762_v39  ;;  %2819 = vmatpush.bf16.msra.mxu0 %v5767_v29 }
0x21f5   :  { %2931 = vmatpush.bf16.msra.mxu1 %v5530_v8  ;;  %2957 = vmatpush.bf16.msrb.mxu0 %v5535_v7 }
0x21f9   :  { %2932 = vmatpush.bf16.msra.mxu1 %v5551_v10  ;;  %2958 = vmatpush.bf16.msrb.mxu0 %v5556_v20 }
0x21fd   :  { %2933 = vmatpush.bf16.msra.mxu1 %v5570_v37  ;;  %2959 = vmatpush.bf16.msrb.mxu0 %v5581_v16 }
0x2201   :  { %2934 = vmatpush.bf16.msra.mxu1 %v5590_v27  ;;  %2960 = vmatpush.bf16.msrb.mxu0 %v5593_v12 }
0x2251   :  { %v2535_v49 = vpop.f32.mrf.mxu1  ;;  %v2561_v56 = vpop.f32.mrf.mxu0 }
0x2252   :  { %v2562_v6 = vadd.f32 %v2561_v56, %v5825_v4  ;;  %v2536_v58 = vadd.f32 %v2535_v49, %v5837_v47 }
0x2254   :  { %v2575_v32 = vadd.f32 %v5831_v53, %v2562_v6  ;;  %v2549_v36 = vadd.f32 %v5829_v9, %v2536_v58  ;;  %v2619_v6 = vpop.permute.xlu0 %2618 }
0x2256   :  { %4118 = vtanh.f32 %v2575_v32  ;;  %v3808_v44 = vmul.f32 -1.442695, %v2549_v36 }
0x2258   :  { %4120 = vpow2.f32 %v3808_v44 }
0x2259   :  { %v2537_v30 = vpop.f32.mrf.mxu1  ;;  %v2563_v63 = vpop.f32.mrf.mxu0 }
0x225c   :  { %v4119_v62 = vpop.eup %4118 }
0x225d   :  { %2623 = vrot.lane.b32.xlu2 %v4119_v62, %s4231_s17 }
0x225e   :  { %v4121_v57 = vpop.eup %4120 }
0x225f   :  { %v2584_v53 = vadd.f32 1.0, %v4121_v57 }
0x2261   :  { %v5892_v42 = vpop.f32.mrf.mxu1  ;;  %v5894_v52 = vpop.f32.mrf.mxu0  ;;  %4122 = vrcp.f32 %v2584_v53  ;;  %v2597_v13 = vand.u32 2147483648, %v2584_v53  ;;  %vm2591_vm12 = vweird.f32 %v2584_v53  ;;  %v2595_v45 = vand.u32 2147483647, %v2584_v53 }
0x2263   :  { %v2598_v5 = vor.u32 1.1754944e-38, %v2597_v13  ;;  %vm2596_vm14 = vcmp.eq.f32.partialorder %v2595_v45, 8.507059e+37 }
0x2267   :  { %v4123_v25 = vpop.eup %4122 }
0x2268   :  { %v2587_v19 = vmul.f32 %v4123_v25, %v2584_v53  ;;  %vm2592_vm11 = vweird.f32 %v4123_v25 }
0x2269   :  { %v2680_v33 = vpop.f32.mrf.mxu1  ;;  %v2706_v35 = vpop.f32.mrf.mxu0  ;;  %vm2593_vm13 = vmor %vm2591_vm12, %vm2592_vm11 }
0x226a   :  { %v2588_v41 = vsub.f32 1.0, %v2587_v19  ;;  %v3809_v35 = vmul.f32 -1.442695, %v2575_v32 }
0x226c   :  { %v2589_v59 = vmul.f32 %v4123_v25, %v2588_v41 }
0x226e   :  { %v2590_v38 = vadd.f32 %v4123_v25, %v2589_v59 }
0x2270   :  { %v2594_v0 = vsel %vm2593_vm13, %v4123_v25, %v2590_v38 }
0x2271   :  { %v2599_v49 = vsel %vm2596_vm14, %v2598_v5, %v2594_v0  ;;  %v2648_v5 = vpop.permute.xlu0 %2647 }
0x2272   :  { %v2621_v30 = vmul.f32 %v2619_v6, %v2599_v49 }
0x22b7   :  { %v2624_v9 = vpop.permute.xlu2 %2623 }
0x22b8   :  { %v2626_v56 = vmul.f32 %v2624_v9, %v2599_v49 }
0x22ba   :  { %2628 = vrot.lane.b32.xlu1 %v2626_v56, %s4231_s17 }
0x232c   :  { %v2629_v63 = vpop.permute.xlu1 %2628 }
0x232d   :  { %v2631_v62 = vadd.f32 %v2629_v63, %v2621_v30  ;;  %v5919_v30 = vld [vmem:[#allocation3 + $0x20] sm:$0xff] }
0x232e   :  { %v2782_v63 = vpack.c.bf16 %v5919_v30, %v5919_v30 }
0x232f   :  { %4124 = vtanh.f32 %v2631_v62  ;;  %2640 = vrot.lane.b32.xlu1 %v2631_v62, %s4231_s17 }
0x2330   :  { %4126 = vpow2.f32 %v3809_v35 }
0x2335   :  { %v4125_v33 = vpop.eup %4124 }
0x2336   :  { %2634 = vrot.lane.b32.xlu2 %v4125_v33, %s4231_s17  ;;  %v4127_v58 = vpop.eup %4126 }
0x2337   :  { %v2585_v36 = vadd.f32 1.0, %v4127_v58 }
0x2339   :  { %4128 = vrcp.f32 %v2585_v36  ;;  %v2612_v41 = vand.u32 2147483648, %v2585_v36  ;;  %vm2606_vm2 = vweird.f32 %v2585_v36  ;;  %v2610_v59 = vand.u32 2147483647, %v2585_v36 }
0x233b   :  { %v2613_v13 = vor.u32 1.1754944e-38, %v2612_v41  ;;  %vm2611_vm6 = vcmp.eq.f32.partialorder %v2610_v59, 8.507059e+37 }
0x233f   :  { %v4129_v44 = vpop.eup %4128 }
0x2340   :  { %v2602_v57 = vmul.f32 %v4129_v44, %v2585_v36  ;;  %vm2607_vm1 = vweird.f32 %v4129_v44 }
0x2341   :  { %vm2608_vm9 = vmor %vm2606_vm2, %vm2607_vm1 }
0x2342   :  { %v2603_v53 = vsub.f32 1.0, %v2602_v57 }
0x2344   :  { %v2604_v25 = vmul.f32 %v4129_v44, %v2603_v53 }
0x2346   :  { %v2605_v19 = vadd.f32 %v4129_v44, %v2604_v25 }
0x2348   :  { %v2609_v38 = vsel %vm2608_vm9, %v4129_v44, %v2605_v19 }
0x2349   :  { %v2614_v45 = vsel %vm2611_vm6, %v2613_v13, %v2609_v38 }
0x2390   :  { %v2635_v0 = vpop.permute.xlu2 %2634 }
0x2391   :  { %v2637_v32 = vmul.f32 %v2635_v0, %v2614_v45 }
0x2393   :  { %v5904_v49 = vsel %vm4609_vm8, %v2637_v32, %v5845_v22 }
0x2394   :  { %v2650_v9 = vsel %vm71_vm0, %v5904_v49, %v2648_v5 }
0x2395   :  { %v2651_v56 = vpack.c.bf16 %v2650_v9, %v2650_v9 }
0x2397   :  { %2664 = vmatmul.bf16.vlgmr.msrb.gmra.mxu3 %v2651_v56  ;;  %2690 = vmatmul.bf16.vlgmr.msra.gmra.mxu2 %v2651_v56 }
0x2398   :  { %2914 = vmatpush.bf16.msrb.mxu3 %v5610_v11  ;;  %2940 = vmatpush.bf16.msra.mxu2 %v5621_v15 }
0x239c   :  { %2915 = vmatpush.bf16.msrb.mxu3 %v5630_v31  ;;  %2941 = vmatpush.bf16.msra.mxu2 %v5634_v43 }
0x23a0   :  { %2916 = vmatpush.bf16.msrb.mxu3 %v5651_v23  ;;  %2942 = vmatpush.bf16.msra.mxu2 %v5655_v26 }
0x23a1   :  { %v2641_v22 = vpop.permute.xlu1 %2640 }
0x23a2   :  { %v5917_v6 = vsel %vm4609_vm8, %v2641_v22, %v5857_v48 }
0x23a3   :  { %2748 = vrot.lane.b32.xlu0 %v5917_v6, %s4231_s17 }
0x23a4   :  { %2917 = vmatpush.bf16.msrb.mxu3 %v5673_v3  ;;  %2943 = vmatpush.bf16.msra.mxu2 %v5678_v28 }
0x23a7   :  { %3814 = vmatmul.msk.bf16.vlgmr.msra.gmra.mxu3 %vm71_vm0, %v2782_v63  ;;  %3815 = vmatmul.msk.bf16.vlgmr.msrb.gmra.mxu2 %vm71_vm0, %v2782_v63 }
0x23a8   :  { %2918 = vmatpush.bf16.msrb.mxu3 %v5697_v14  ;;  %2944 = vmatpush.bf16.msra.mxu2 %v5701_v1 }
0x23ab   :  { %2777 = vrot.lane.b32.xlu0 %v5931_v21, %s4231_s17 }
0x23ac   :  { %2919 = vmatpush.bf16.msrb.mxu3 %v5717_v24  ;;  %2945 = vmatpush.bf16.msra.mxu2 %v5721_v54 }
0x23b0   :  { %2920 = vmatpush.bf16.msrb.mxu3 %v5742_v18  ;;  %2946 = vmatpush.bf16.msra.mxu2 %v5746_v17 }
0x23b4   :  { %2921 = vmatpush.bf16.msrb.mxu3 %v5762_v39  ;;  %2947 = vmatpush.bf16.msra.mxu2 %v5767_v29 }
0x23b8   :  { %3059 = vmatpush.bf16.msra.mxu3 %v5530_v8  ;;  %3085 = vmatpush.bf16.msrb.mxu2 %v5535_v7 }
0x23bc   :  { %3060 = vmatpush.bf16.msra.mxu3 %v5551_v10  ;;  %3086 = vmatpush.bf16.msrb.mxu2 %v5556_v20 }
0x23c0   :  { %3061 = vmatpush.bf16.msra.mxu3 %v5570_v37  ;;  %3087 = vmatpush.bf16.msrb.mxu2 %v5581_v16 }
0x23c4   :  { %3062 = vmatpush.bf16.msra.mxu3 %v5590_v27  ;;  %3088 = vmatpush.bf16.msrb.mxu2 %v5593_v12 }
0x241a   :  { %v2665_v48 = vpop.f32.mrf.mxu3  ;;  %v2691_v62 = vpop.f32.mrf.mxu2 }
0x241b   :  { %v2692_v33 = vadd.f32 %v2691_v62, %v5825_v4  ;;  %v2666_v41 = vadd.f32 %v2665_v48, %v5837_v47 }
0x241d   :  { %v2705_v35 = vadd.f32 %v5894_v52, %v2692_v33  ;;  %v2679_v59 = vadd.f32 %v5892_v42, %v2666_v41 }
0x241f   :  { %4130 = vtanh.f32 %v2705_v35  ;;  %v3812_v38 = vmul.f32 -1.442695, %v2679_v59  ;;  %v3813_v41 = vmul.f32 -1.442695, %v2705_v35 }
0x2421   :  { %4132 = vpow2.f32 %v3812_v38 }
0x2422   :  { %v2667_v58 = vpop.f32.mrf.mxu3  ;;  %v2693_v36 = vpop.f32.mrf.mxu2 }
0x2423   :  { %v2749_v58 = vpop.permute.xlu0 %2748 }
0x2425   :  { %v4131_v44 = vpop.eup %4130 }
0x2426   :  { %2753 = vrot.lane.b32.xlu2 %v4131_v44, %s4231_s17 }
0x2427   :  { %v4133_v13 = vpop.eup %4132 }
0x2428   :  { %v2714_v52 = vadd.f32 1.0, %v4133_v13 }
0x242a   :  { %v5952_v57 = vpop.f32.mrf.mxu3  ;;  %v5954_v53 = vpop.f32.mrf.mxu2  ;;  %4134 = vrcp.f32 %v2714_v52  ;;  %v2727_v56 = vand.u32 2147483648, %v2714_v52  ;;  %vm2721_vm11 = vweird.f32 %v2714_v52  ;;  %v2725_v22 = vand.u32 2147483647, %v2714_v52 }
0x242c   :  { %v2728_v62 = vor.u32 1.1754944e-38, %v2727_v56  ;;  %vm2726_vm13 = vcmp.eq.f32.partialorder %v2725_v22, 8.507059e+37 }
0x2430   :  { %v4135_v45 = vpop.eup %4134 }
0x2431   :  { %v2717_v0 = vmul.f32 %v4135_v45, %v2714_v52  ;;  %vm2722_vm8 = vweird.f32 %v4135_v45 }
0x2432   :  { %v2810_v25 = vpop.f32.mrf.mxu3  ;;  %v2836_v19 = vpop.f32.mrf.mxu2  ;;  %vm2723_vm12 = vmor %vm2721_vm11, %vm2722_vm8 }
0x2433   :  { %v2718_v32 = vsub.f32 1.0, %v2717_v0 }
0x2435   :  { %v2719_v5 = vmul.f32 %v4135_v45, %v2718_v32 }
0x2437   :  { %v2720_v9 = vadd.f32 %v4135_v45, %v2719_v5 }
0x2439   :  { %v2724_v63 = vsel %vm2723_vm12, %v4135_v45, %v2720_v9 }
0x243a   :  { %v2729_v42 = vsel %vm2726_vm13, %v2728_v62, %v2724_v63 }
0x243b   :  { %v2751_v36 = vmul.f32 %v2749_v58, %v2729_v42 }
0x2480   :  { %v2754_v48 = vpop.permute.xlu2 %2753 }
0x2481   :  { %v2756_v33 = vmul.f32 %v2754_v48, %v2729_v42  ;;  %v2778_v48 = vpop.permute.xlu0 %2777 }
0x2483   :  { %2758 = vrot.lane.b32.xlu1 %v2756_v33, %s4231_s17 }
0x24f5   :  { %v2759_v44 = vpop.permute.xlu1 %2758 }
0x24f6   :  { %v2761_v25 = vadd.f32 %v2759_v44, %v2751_v36  ;;  %v2910_v44 = vpack.c.bf16 %v5931_v21, %v5931_v21 }
0x24f8   :  { %4136 = vtanh.f32 %v2761_v25  ;;  %2770 = vrot.lane.b32.xlu1 %v2761_v25, %s4231_s17 }
0x24f9   :  { %4138 = vpow2.f32 %v3813_v41 }
0x24fe   :  { %v4137_v19 = vpop.eup %4136 }
0x24ff   :  { %2764 = vrot.lane.b32.xlu2 %v4137_v19, %s4231_s17  ;;  %v4139_v59 = vpop.eup %4138 }
0x2500   :  { %v2715_v38 = vadd.f32 1.0, %v4139_v59 }
0x2502   :  { %4140 = vrcp.f32 %v2715_v38  ;;  %v2742_v5 = vand.u32 2147483648, %v2715_v38  ;;  %vm2736_vm1 = vweird.f32 %v2715_v38  ;;  %v2740_v9 = vand.u32 2147483647, %v2715_v38 }
0x2504   :  { %v2743_v22 = vor.u32 1.1754944e-38, %v2742_v5  ;;  %vm2741_vm9 = vcmp.eq.f32.partialorder %v2740_v9, 8.507059e+37 }
0x2508   :  { %v4141_v13 = vpop.eup %4140 }
0x2509   :  { %v2732_v52 = vmul.f32 %v4141_v13, %v2715_v38  ;;  %vm2737_vm14 = vweird.f32 %v4141_v13 }
0x250a   :  { %vm2738_vm2 = vmor %vm2736_vm1, %vm2737_vm14 }
0x250b   :  { %v2733_v45 = vsub.f32 1.0, %v2732_v52 }
0x250d   :  { %v2734_v0 = vmul.f32 %v4141_v13, %v2733_v45 }
0x250f   :  { %v2735_v32 = vadd.f32 %v4141_v13, %v2734_v0 }
0x2511   :  { %v2739_v56 = vsel %vm2738_vm2, %v4141_v13, %v2735_v32 }
0x2512   :  { %v2744_v63 = vsel %vm2741_vm9, %v2743_v22, %v2739_v56 }
0x2559   :  { %v2765_v62 = vpop.permute.xlu2 %2764 }
0x255a   :  { %v2767_v35 = vmul.f32 %v2765_v62, %v2744_v63 }
0x255c   :  { %v5964_v42 = vsel %vm4667_vm5, %v2767_v35, %v5904_v49 }
0x255d   :  { %v2780_v33 = vsel %vm71_vm0, %v5964_v42, %v2778_v48 }
0x255e   :  { %v2781_v58 = vpack.c.bf16 %v2780_v33, %v2780_v33 }
0x2560   :  { %2794 = vmatmul.bf16.vlgmr.msrb.gmra.mxu1 %v2781_v58  ;;  %2820 = vmatmul.bf16.vlgmr.msra.gmra.mxu0 %v2781_v58 }
0x2561   :  { %3042 = vmatpush.bf16.msrb.mxu1 %v5610_v11  ;;  %3068 = vmatpush.bf16.msra.mxu0 %v5621_v15 }
0x2565   :  { %3043 = vmatpush.bf16.msrb.mxu1 %v5630_v31  ;;  %3069 = vmatpush.bf16.msra.mxu0 %v5634_v43 }
0x2569   :  { %3044 = vmatpush.bf16.msrb.mxu1 %v5651_v23  ;;  %3070 = vmatpush.bf16.msra.mxu0 %v5655_v26 }
0x256a   :  { %v2771_v49 = vpop.permute.xlu1 %2770 }
0x256b   :  { %v5977_v36 = vsel %vm4667_vm5, %v2771_v49, %v5917_v6 }
0x256c   :  { %2878 = vrot.lane.b32.xlu0 %v5977_v36, %s4231_s17 }
0x256d   :  { %3045 = vmatpush.bf16.msrb.mxu1 %v5673_v3  ;;  %3071 = vmatpush.bf16.msra.mxu0 %v5678_v28 }
0x2570   :  { %3818 = vmatmul.msk.bf16.vlgmr.msra.gmra.mxu1 %vm71_vm0, %v2910_v44  ;;  %3819 = vmatmul.msk.bf16.vlgmr.msrb.gmra.mxu0 %vm71_vm0, %v2910_v44 }
0x2571   :  { %3046 = vmatpush.bf16.msrb.mxu1 %v5697_v14  ;;  %3072 = vmatpush.bf16.msra.mxu0 %v5701_v1 }
0x2574   :  { %2905 = vrot.lane.b32.xlu0 %v5919_v30, %s4231_s17 }
0x2575   :  { %3047 = vmatpush.bf16.msrb.mxu1 %v5717_v24  ;;  %3073 = vmatpush.bf16.msra.mxu0 %v5721_v54 }
0x2579   :  { %3048 = vmatpush.bf16.msrb.mxu1 %v5742_v18  ;;  %3074 = vmatpush.bf16.msra.mxu0 %v5746_v17 }
0x257d   :  { %3049 = vmatpush.bf16.msrb.mxu1 %v5762_v39  ;;  %3075 = vmatpush.bf16.msra.mxu0 %v5767_v29 }
0x2581   :  { %3187 = vmatpush.bf16.msra.mxu1 %v5530_v8  ;;  %3213 = vmatpush.bf16.msrb.mxu0 %v5535_v7 }
0x2585   :  { %3188 = vmatpush.bf16.msra.mxu1 %v5551_v10  ;;  %3214 = vmatpush.bf16.msrb.mxu0 %v5556_v20 }
0x2589   :  { %3189 = vmatpush.bf16.msra.mxu1 %v5570_v37  ;;  %3215 = vmatpush.bf16.msrb.mxu0 %v5581_v16 }
0x258d   :  { %3190 = vmatpush.bf16.msra.mxu1 %v5590_v27  ;;  %3216 = vmatpush.bf16.msrb.mxu0 %v5593_v12 }
0x25dd   :  { %v2795_v51 = vpop.f32.mrf.mxu1  ;;  %v2821_v6 = vpop.f32.mrf.mxu0 }
0x25de   :  { %v2822_v30 = vadd.f32 %v2821_v6, %v5825_v4  ;;  %v2796_v45 = vadd.f32 %v2795_v51, %v5837_v47  ;;  %v2879_v51 = vpop.permute.xlu0 %2878 }
0x25e0   :  { %v2835_v21 = vadd.f32 %v5954_v53, %v2822_v30  ;;  %v2809_v0 = vadd.f32 %v5952_v57, %v2796_v45 }
0x25e2   :  { %4142 = vtanh.f32 %v2835_v21  ;;  %v3816_v32 = vmul.f32 -1.442695, %v2809_v0 }
0x25e4   :  { %4144 = vpow2.f32 %v3816_v32 }
0x25e5   :  { %v2797_v25 = vpop.f32.mrf.mxu1  ;;  %v2823_v19 = vpop.f32.mrf.mxu0 }
0x25e8   :  { %v4143_v41 = vpop.eup %4142 }
0x25e9   :  { %2883 = vrot.lane.b32.xlu2 %v4143_v41, %s4231_s17  ;;  %v3817_v41 = vmul.f32 -1.442695, %v2835_v21 }
0x25ea   :  { %v4145_v5 = vpop.eup %4144 }
0x25eb   :  { %v2844_v53 = vadd.f32 1.0, %v4145_v5 }
0x25ed   :  { %v6008_v59 = vpop.f32.mrf.mxu1  ;;  %v6010_v38 = vpop.f32.mrf.mxu0  ;;  %4146 = vrcp.f32 %v2844_v53  ;;  %v2857_v35 = vand.u32 2147483648, %v2844_v53  ;;  %vm2851_vm6 = vweird.f32 %v2844_v53  ;;  %v2855_v48 = vand.u32 2147483647, %v2844_v53 }
0x25ef   :  { %v2858_v58 = vor.u32 1.1754944e-38, %v2857_v35  ;;  %vm2856_vm11 = vcmp.eq.f32.partialorder %v2855_v48, 8.507059e+37  ;;  %v2906_v48 = vpop.permute.xlu0 %2905 }
0x25f3   :  { %v4147_v9 = vpop.eup %4146 }
0x25f4   :  { %v2847_v56 = vmul.f32 %v4147_v9, %v2844_v53  ;;  %vm2852_vm5 = vweird.f32 %v4147_v9 }
0x25f5   :  { %v2938_v13 = vpop.f32.mrf.mxu1  ;;  %v2964_v52 = vpop.f32.mrf.mxu0  ;;  %vm2853_vm8 = vmor %vm2851_vm6, %vm2852_vm5 }
0x25f6   :  { %v2848_v22 = vsub.f32 1.0, %v2847_v56 }
0x25f8   :  { %v2849_v63 = vmul.f32 %v4147_v9, %v2848_v22 }
0x25fa   :  { %v2850_v62 = vadd.f32 %v4147_v9, %v2849_v63 }
0x25fc   :  { %v2854_v33 = vsel %vm2853_vm8, %v4147_v9, %v2850_v62 }
0x25fd   :  { %v2859_v49 = vsel %vm2856_vm11, %v2858_v58, %v2854_v33 }
0x25fe   :  { %v2881_v6 = vmul.f32 %v2879_v51, %v2859_v49 }
0x2643   :  { %v2884_v57 = vpop.permute.xlu2 %2883 }
0x2644   :  { %v2886_v44 = vmul.f32 %v2884_v57, %v2859_v49 }
0x2646   :  { %2888 = vrot.lane.b32.xlu1 %v2886_v44, %s4231_s17  ;;  %v3038_v44 = vpack.c.bf16 %v5871_v61, %v5871_v61 }
0x26b8   :  { %v2889_v30 = vpop.permute.xlu1 %2888 }
0x26b9   :  { %v2891_v25 = vadd.f32 %v2889_v30, %v2881_v6 }
0x26bb   :  { %4148 = vtanh.f32 %v2891_v25  ;;  %2900 = vrot.lane.b32.xlu1 %v2891_v25, %s4231_s17 }
0x26bc   :  { %4150 = vpow2.f32 %v3817_v41 }
0x26c1   :  { %v4149_v19 = vpop.eup %4148 }
0x26c2   :  { %2894 = vrot.lane.b32.xlu2 %v4149_v19, %s4231_s17  ;;  %v4151_v13 = vpop.eup %4150 }
0x26c3   :  { %v2845_v52 = vadd.f32 1.0, %v4151_v13 }
0x26c5   :  { %4152 = vrcp.f32 %v2845_v52  ;;  %v2872_v9 = vand.u32 2147483648, %v2845_v52  ;;  %vm2866_vm13 = vweird.f32 %v2845_v52  ;;  %v2870_v56 = vand.u32 2147483647, %v2845_v52 }
0x26c7   :  { %v2873_v63 = vor.u32 1.1754944e-38, %v2872_v9  ;;  %vm2871_vm1 = vcmp.eq.f32.partialorder %v2870_v56, 8.507059e+37 }
0x26cb   :  { %v4153_v45 = vpop.eup %4152 }
0x26cc   :  { %v2862_v0 = vmul.f32 %v4153_v45, %v2845_v52  ;;  %vm2867_vm12 = vweird.f32 %v4153_v45 }
0x26cd   :  { %vm2868_vm14 = vmor %vm2866_vm13, %vm2867_vm12 }
0x26ce   :  { %v2863_v32 = vsub.f32 1.0, %v2862_v0 }
0x26d0   :  { %v2864_v5 = vmul.f32 %v4153_v45, %v2863_v32 }
0x26d2   :  { %v2865_v53 = vadd.f32 %v4153_v45, %v2864_v5 }
0x26d4   :  { %v2869_v22 = vsel %vm2868_vm14, %v4153_v45, %v2865_v53 }
0x26d5   :  { %v2874_v62 = vsel %vm2871_vm1, %v2873_v63, %v2869_v22 }
0x271c   :  { %v2895_v35 = vpop.permute.xlu2 %2894 }
0x271d   :  { %v2897_v21 = vmul.f32 %v2895_v35, %v2874_v62 }
0x271f   :  { %v6020_v33 = vsel %vm4717_vm4, %v2897_v21, %v5964_v42 }
0x2720   :  { %v2908_v58 = vsel %vm71_vm0, %v6020_v33, %v2906_v48 }
0x2721   :  { %v2909_v49 = vpack.c.bf16 %v2908_v58, %v2908_v58 }
0x2723   :  { %2922 = vmatmul.bf16.vlgmr.msrb.gmra.mxu3 %v2909_v49  ;;  %2948 = vmatmul.bf16.vlgmr.msra.gmra.mxu2 %v2909_v49 }
0x2724   :  { %3170 = vmatpush.bf16.msrb.mxu3 %v5610_v11  ;;  %3196 = vmatpush.bf16.msra.mxu2 %v5621_v15 }
0x2728   :  { %3171 = vmatpush.bf16.msrb.mxu3 %v5630_v31  ;;  %3197 = vmatpush.bf16.msra.mxu2 %v5634_v43 }
0x272c   :  { %3172 = vmatpush.bf16.msrb.mxu3 %v5651_v23  ;;  %3198 = vmatpush.bf16.msra.mxu2 %v5655_v26 }
0x272d   :  { %v2901_v42 = vpop.permute.xlu1 %2900 }
0x272e   :  { %v6033_v57 = vsel %vm4717_vm4, %v2901_v42, %v5977_v36 }
0x272f   :  { %3006 = vrot.lane.b32.xlu0 %v6033_v57, %s4231_s17 }
0x2730   :  { %3173 = vmatpush.bf16.msrb.mxu3 %v5673_v3  ;;  %3199 = vmatpush.bf16.msra.mxu2 %v5678_v28 }
0x2733   :  { %3822 = vmatmul.msk.bf16.vlgmr.msra.gmra.mxu3 %vm71_vm0, %v3038_v44  ;;  %3823 = vmatmul.msk.bf16.vlgmr.msrb.gmra.mxu2 %vm71_vm0, %v3038_v44 }
0x2734   :  { %3174 = vmatpush.bf16.msrb.mxu3 %v5697_v14  ;;  %3200 = vmatpush.bf16.msra.mxu2 %v5701_v1 }
0x2737   :  { %3033 = vrot.lane.b32.xlu0 %v5859_v60, %s4231_s17 }
0x2738   :  { %3175 = vmatpush.bf16.msrb.mxu3 %v5717_v24  ;;  %3201 = vmatpush.bf16.msra.mxu2 %v5721_v54 }
0x273c   :  { %3176 = vmatpush.bf16.msrb.mxu3 %v5742_v18  ;;  %3202 = vmatpush.bf16.msra.mxu2 %v5746_v17 }
0x2740   :  { %3177 = vmatpush.bf16.msrb.mxu3 %v5762_v39  ;;  %3203 = vmatpush.bf16.msra.mxu2 %v5767_v29 }
0x2744   :  { %3315 = vmatpush.bf16.msra.mxu3 %v5530_v8  ;;  %3341 = vmatpush.bf16.msrb.mxu2 %v5535_v7 }
0x2748   :  { %3316 = vmatpush.bf16.msra.mxu3 %v5551_v10  ;;  %3342 = vmatpush.bf16.msrb.mxu2 %v5556_v20 }
0x274c   :  { %3317 = vmatpush.bf16.msra.mxu3 %v5570_v37  ;;  %3343 = vmatpush.bf16.msrb.mxu2 %v5581_v16 }
0x2750   :  { %3318 = vmatpush.bf16.msra.mxu3 %v5590_v27  ;;  %3344 = vmatpush.bf16.msrb.mxu2 %v5593_v12 }
0x27a1   :  { %v3007_v56 = vpop.permute.xlu0 %3006 }
0x27a6   :  { %v2923_v50 = vpop.f32.mrf.mxu3  ;;  %v2949_v60 = vpop.f32.mrf.mxu2 }
0x27a7   :  { %v2950_v61 = vadd.f32 %v2949_v60, %v5825_v4  ;;  %v2924_v12 = vadd.f32 %v2923_v50, %v5837_v47 }
0x27a9   :  { %v2963_v8 = vadd.f32 %v6010_v38, %v2950_v61  ;;  %v2937_v51 = vadd.f32 %v6008_v59, %v2924_v12  ;;  %v3034_v12 = vpop.permute.xlu0 %3033 }
0x27ab   :  { %4154 = vtanh.f32 %v2963_v8  ;;  %v3820_v6 = vmul.f32 -1.442695, %v2937_v51  ;;  %v3821_v21 = vmul.f32 -1.442695, %v2963_v8 }
0x27ad   :  { %4156 = vpow2.f32 %v3820_v6 }
0x27ae   :  { %v2925_v7 = vpop.f32.mrf.mxu3  ;;  %v2951_v36 = vpop.f32.mrf.mxu2 }
0x27b1   :  { %v4155_v10 = vpop.eup %4154 }
0x27b2   :  { %3011 = vrot.lane.b32.xlu2 %v4155_v10, %s4231_s17 }
0x27b3   :  { %v4157_v30 = vpop.eup %4156 }
0x27b4   :  { %v2972_v38 = vadd.f32 1.0, %v4157_v30 }
0x27b6   :  { %v6064_v20 = vpop.f32.mrf.mxu3  ;;  %v6066_v37 = vpop.f32.mrf.mxu2  ;;  %4158 = vrcp.f32 %v2972_v38  ;;  %v2985_v45 = vand.u32 2147483648, %v2972_v38  ;;  %vm2979_vm2 = vweird.f32 %v2972_v38  ;;  %v2983_v0 = vand.u32 2147483647, %v2972_v38 }
0x27b8   :  { %v2986_v5 = vor.u32 1.1754944e-38, %v2985_v45  ;;  %vm2984_vm5 = vcmp.eq.f32.partialorder %v2983_v0, 8.507059e+37 }
0x27bc   :  { %v4159_v25 = vpop.eup %4158 }
0x27bd   :  { %v2975_v19 = vmul.f32 %v4159_v25, %v2972_v38  ;;  %vm2980_vm4 = vweird.f32 %v4159_v25 }
0x27be   :  { %v3066_v16 = vpop.f32.mrf.mxu3  ;;  %v3092_v27 = vpop.f32.mrf.mxu2  ;;  %vm2981_vm9 = vmor %vm2979_vm2, %vm2980_vm4 }
0x27bf   :  { %v2976_v41 = vsub.f32 1.0, %v2975_v19 }
0x27c1   :  { %v2977_v13 = vmul.f32 %v4159_v25, %v2976_v41 }
0x27c3   :  { %v2978_v52 = vadd.f32 %v4159_v25, %v2977_v13 }
0x27c5   :  { %v2982_v32 = vsel %vm2981_vm9, %v4159_v25, %v2978_v52 }
0x27c6   :  { %v2987_v59 = vsel %vm2984_vm5, %v2986_v5, %v2982_v32 }
0x27c7   :  { %v3009_v22 = vmul.f32 %v3007_v56, %v2987_v59 }
0x280c   :  { %v3012_v53 = vpop.permute.xlu2 %3011 }
0x280d   :  { %v3014_v9 = vmul.f32 %v3012_v53, %v2987_v59 }
0x280f   :  { %3016 = vrot.lane.b32.xlu1 %v3014_v9, %s4231_s17 }
0x2881   :  { %v3017_v63 = vpop.permute.xlu1 %3016 }
0x2882   :  { %v3019_v62 = vadd.f32 %v3017_v63, %v3009_v22 }
0x2884   :  { %4160 = vtanh.f32 %v3019_v62  ;;  %3028 = vrot.lane.b32.xlu1 %v3019_v62, %s4231_s17 }
0x2885   :  { %4162 = vpow2.f32 %v3821_v21 }
0x288a   :  { %v4161_v35 = vpop.eup %4160 }
0x288b   :  { %3022 = vrot.lane.b32.xlu2 %v4161_v35, %s4231_s17  ;;  %v4163_v48 = vpop.eup %4162 }
0x288c   :  { %v2973_v58 = vadd.f32 1.0, %v4163_v48 }
0x288e   :  { %4164 = vrcp.f32 %v2973_v58  ;;  %v3000_v61 = vand.u32 2147483648, %v2973_v58  ;;  %vm2994_vm8 = vweird.f32 %v2973_v58  ;;  %v2998_v7 = vand.u32 2147483647, %v2973_v58 }
0x2890   :  { %v3001_v10 = vor.u32 1.1754944e-38, %v3000_v61  ;;  %vm2999_vm12 = vcmp.eq.f32.partialorder %v2998_v7, 8.507059e+37 }
0x2894   :  { %v4165_v49 = vpop.eup %4164 }
0x2895   :  { %v2990_v42 = vmul.f32 %v4165_v49, %v2973_v58  ;;  %vm2995_vm6 = vweird.f32 %v4165_v49 }
0x2896   :  { %vm2996_vm11 = vmor %vm2994_vm8, %vm2995_vm6 }
0x2897   :  { %v2991_v44 = vsub.f32 1.0, %v2990_v42 }
0x2899   :  { %v2992_v50 = vmul.f32 %v4165_v49, %v2991_v44 }
0x289b   :  { %v2993_v60 = vadd.f32 %v4165_v49, %v2992_v50 }
0x289d   :  { %v2997_v36 = vsel %vm2996_vm11, %v4165_v49, %v2993_v60 }
0x289e   :  { %v3002_v16 = vsel %vm2999_vm12, %v3001_v10, %v2997_v36 }
0x28e5   :  { %v3023_v27 = vpop.permute.xlu2 %3022 }
0x28e6   :  { %v3025_v8 = vmul.f32 %v3023_v27, %v3002_v16 }
0x28e8   :  { %v6076_v51 = vsel %vm4752_vm7, %v3025_v8, %v6020_v33 }
0x28e9   :  { %v3036_v6 = vsel %vm71_vm0, %v6076_v51, %v3034_v12 }
0x28ea   :  { %v3037_v30 = vpack.c.bf16 %v3036_v6, %v3036_v6 }
0x28ec   :  { %3050 = vmatmul.bf16.vlgmr.msrb.gmra.mxu1 %v3037_v30  ;;  %3076 = vmatmul.bf16.vlgmr.msra.gmra.mxu0 %v3037_v30 }
0x28ed   :  { %3298 = vmatpush.bf16.msrb.mxu1 %v5610_v11  ;;  %3324 = vmatpush.bf16.msra.mxu0 %v5621_v15  ;;  %v3166_v11 = vpack.c.bf16 %v5833_v55, %v5833_v55 }
0x28f1   :  { %3299 = vmatpush.bf16.msrb.mxu1 %v5630_v31  ;;  %3325 = vmatpush.bf16.msra.mxu0 %v5634_v43 }
0x28f5   :  { %3300 = vmatpush.bf16.msrb.mxu1 %v5651_v23  ;;  %3326 = vmatpush.bf16.msra.mxu0 %v5655_v26 }
0x28f6   :  { %v3029_v33 = vpop.permute.xlu1 %3028 }
0x28f7   :  { %v6089_v38 = vsel %vm4752_vm7, %v3029_v33, %v6033_v57  ;;  %v4203_v33 = vld [vmem:[#allocation3] sm:$0xff] }
0x28f8   :  { %3134 = vrot.lane.b32.xlu0 %v6089_v38, %s4231_s17 }
0x28f9   :  { %3301 = vmatpush.bf16.msrb.mxu1 %v5673_v3  ;;  %3327 = vmatpush.bf16.msra.mxu0 %v5678_v28 }
0x28fc   :  { %3826 = vmatmul.msk.bf16.vlgmr.msra.gmra.mxu1 %vm71_vm0, %v3166_v11  ;;  %3827 = vmatmul.msk.bf16.vlgmr.msrb.gmra.mxu0 %vm71_vm0, %v3166_v11  ;;  %v3294_v11 = vpack.c.bf16 %v4203_v33, %v4203_v33 }
0x28fd   :  { %3302 = vmatpush.bf16.msrb.mxu1 %v5697_v14  ;;  %3328 = vmatpush.bf16.msra.mxu0 %v5701_v1 }
0x2900   :  { %3161 = vrot.lane.b32.xlu0 %v4202_v46, %s4231_s17 }
0x2901   :  { %3303 = vmatpush.bf16.msrb.mxu1 %v5717_v24  ;;  %3329 = vmatpush.bf16.msra.mxu0 %v5721_v54 }
0x2905   :  { %3304 = vmatpush.bf16.msrb.mxu1 %v5742_v18  ;;  %3330 = vmatpush.bf16.msra.mxu0 %v5746_v17 }
0x2909   :  { %3305 = vmatpush.bf16.msrb.mxu1 %v5762_v39  ;;  %3331 = vmatpush.bf16.msra.mxu0 %v5767_v29 }
0x2969   :  { %v3051_v15 = vpop.f32.mrf.mxu1  ;;  %v3077_v31 = vpop.f32.mrf.mxu0 }
0x296a   :  { %v3078_v43 = vadd.f32 %v3077_v31, %v5825_v4  ;;  %v3052_v18 = vadd.f32 %v3051_v15, %v5837_v47  ;;  %v3135_v53 = vpop.permute.xlu0 %3134 }
0x296c   :  { %v3091_v23 = vadd.f32 %v6066_v37, %v3078_v43  ;;  %v3065_v17 = vadd.f32 %v6064_v20, %v3052_v18 }
0x296e   :  { %4166 = vtanh.f32 %v3091_v23  ;;  %v3824_v39 = vmul.f32 -1.442695, %v3065_v17  ;;  %v3825_v63 = vmul.f32 -1.442695, %v3091_v23 }
0x2970   :  { %4168 = vpow2.f32 %v3824_v39 }
0x2971   :  { %v3053_v26 = vpop.f32.mrf.mxu1  ;;  %v3079_v3 = vpop.f32.mrf.mxu0 }
0x2972   :  { %v3162_v16 = vpop.permute.xlu0 %3161 }
0x2974   :  { %v4167_v28 = vpop.eup %4166 }
0x2975   :  { %3139 = vrot.lane.b32.xlu2 %v4167_v28, %s4231_s17 }
0x2976   :  { %v4169_v29 = vpop.eup %4168 }
0x2977   :  { %v3100_v55 = vadd.f32 1.0, %v4169_v29 }
0x2979   :  { %v6111_v14 = vpop.f32.mrf.mxu1  ;;  %v6113_v1 = vpop.f32.mrf.mxu0  ;;  %4170 = vrcp.f32 %v3100_v55  ;;  %v3113_v13 = vand.u32 2147483648, %v3100_v55  ;;  %vm3107_vm13 = vweird.f32 %v3100_v55  ;;  %v3111_v52 = vand.u32 2147483647, %v3100_v55 }
0x297b   :  { %v3114_v0 = vor.u32 1.1754944e-38, %v3113_v13  ;;  %vm3112_vm1 = vcmp.eq.f32.partialorder %v3111_v52, 8.507059e+37 }
0x297f   :  { %v4171_v57 = vpop.eup %4170 }
0x2980   :  { %v3103_v37 = vmul.f32 %v4171_v57, %v3100_v55  ;;  %vm3108_vm7 = vweird.f32 %v4171_v57 }
0x2981   :  { %v3194_v24 = vpop.f32.mrf.mxu1  ;;  %v3220_v54 = vpop.f32.mrf.mxu0  ;;  %vm3109_vm14 = vmor %vm3107_vm13, %vm3108_vm7 }
0x2982   :  { %v3104_v25 = vsub.f32 1.0, %v3103_v37 }
0x2984   :  { %v3105_v19 = vmul.f32 %v4171_v57, %v3104_v25 }
0x2986   :  { %v3106_v41 = vadd.f32 %v4171_v57, %v3105_v19 }
0x2988   :  { %v3110_v45 = vsel %vm3109_vm14, %v4171_v57, %v3106_v41 }
0x2989   :  { %v3115_v32 = vsel %vm3112_vm1, %v3114_v0, %v3110_v45 }
0x298a   :  { %v3137_v59 = vmul.f32 %v3135_v53, %v3115_v32 }
0x29cf   :  { %v3140_v20 = vpop.permute.xlu2 %3139 }
0x29d0   :  { %v3142_v5 = vmul.f32 %v3140_v20, %v3115_v32 }
0x29d2   :  { %3144 = vrot.lane.b32.xlu1 %v3142_v5, %s4231_s17 }
0x2a44   :  { %v3145_v9 = vpop.permute.xlu1 %3144 }
0x2a45   :  { %v3147_v56 = vadd.f32 %v3145_v9, %v3137_v59 }
0x2a47   :  { %4172 = vtanh.f32 %v3147_v56  ;;  %3156 = vrot.lane.b32.xlu1 %v3147_v56, %s4231_s17 }
0x2a48   :  { %4174 = vpow2.f32 %v3825_v63 }
0x2a4d   :  { %v4173_v22 = vpop.eup %4172 }
0x2a4e   :  { %3150 = vrot.lane.b32.xlu2 %v4173_v22, %s4231_s17  ;;  %v4175_v62 = vpop.eup %4174 }
0x2a4f   :  { %v3101_v35 = vadd.f32 1.0, %v4175_v62 }
0x2a51   :  { %4176 = vrcp.f32 %v3101_v35  ;;  %v3128_v44 = vand.u32 2147483648, %v3101_v35  ;;  %vm3122_vm2 = vweird.f32 %v3101_v35  ;;  %v3126_v50 = vand.u32 2147483647, %v3101_v35 }
0x2a53   :  { %v3129_v61 = vor.u32 1.1754944e-38, %v3128_v44  ;;  %vm3127_vm5 = vcmp.eq.f32.partialorder %v3126_v50, 8.507059e+37 }
0x2a57   :  { %v4177_v21 = vpop.eup %4176 }
0x2a58   :  { %v3118_v48 = vmul.f32 %v4177_v21, %v3101_v35  ;;  %vm3123_vm4 = vweird.f32 %v4177_v21 }
0x2a59   :  { %vm3124_vm9 = vmor %vm3122_vm2, %vm3123_vm4 }
0x2a5a   :  { %v3119_v58 = vsub.f32 1.0, %v3118_v48 }
0x2a5c   :  { %v3120_v49 = vmul.f32 %v4177_v21, %v3119_v58 }
0x2a5e   :  { %v3121_v42 = vadd.f32 %v4177_v21, %v3120_v49 }
0x2a60   :  { %v3125_v60 = vsel %vm3124_vm9, %v4177_v21, %v3121_v42 }
0x2a61   :  { %v3130_v7 = vsel %vm3127_vm5, %v3129_v61, %v3125_v60 }
0x2aa8   :  { %v3151_v36 = vpop.permute.xlu2 %3150 }
0x2aa9   :  { %v3153_v10 = vmul.f32 %v3151_v36, %v3130_v7 }
0x2aab   :  { %v6123_v27 = vsel %vm4787_vm10, %v3153_v10, %v6076_v51  ;;  %v4204_v51 = vld [vmem:[#allocation3 + $0x38] sm:$0xff] }
0x2aac   :  { %v3164_v8 = vsel %vm71_vm0, %v6123_v27, %v3162_v16 }
0x2aad   :  { %v3165_v12 = vpack.c.bf16 %v3164_v8, %v3164_v8 }
0x2aaf   :  { %3178 = vmatmul.bf16.vlgmr.msrb.gmra.mxu3 %v3165_v12  ;;  %3204 = vmatmul.bf16.vlgmr.msra.gmra.mxu2 %v3165_v12 }
0x2ab9   :  { %v3157_v6 = vpop.permute.xlu1 %3156 }
0x2aba   :  { %v6130_v30 = vsel %vm4787_vm10, %v3157_v6, %v6089_v38 }
0x2abb   :  { %3262 = vrot.lane.b32.xlu0 %v6130_v30, %s4231_s17 }
0x2abf   :  { %3830 = vmatmul.msk.bf16.vlgmr.msra.gmra.mxu3 %vm71_vm0, %v3294_v11  ;;  %3831 = vmatmul.msk.bf16.vlgmr.msrb.gmra.mxu2 %vm71_vm0, %v3294_v11 }
0x2ac3   :  { %3289 = vrot.lane.b32.xlu0 %v4204_v51, %s4231_s17 }
0x2b2d   :  { %v3263_v32 = vpop.permute.xlu0 %3262 }
0x2b32   :  { %v3179_v46 = vpop.f32.mrf.mxu3  ;;  %v3205_v15 = vpop.f32.mrf.mxu2 }
0x2b33   :  { %v3206_v31 = vadd.f32 %v3205_v15, %v5825_v4  ;;  %v3180_v54 = vadd.f32 %v3179_v46, %v5837_v47 }
0x2b35   :  { %v3219_v40 = vadd.f32 %v6113_v1, %v3206_v31  ;;  %v3193_v18 = vadd.f32 %v6111_v14, %v3180_v54  ;;  %v3290_v7 = vpop.permute.xlu0 %3289 }
0x2b37   :  { %4178 = vtanh.f32 %v3219_v40  ;;  %v3828_v17 = vmul.f32 -1.442695, %v3193_v18  ;;  %v3829_v9 = vmul.f32 -1.442695, %v3219_v40 }
0x2b39   :  { %4180 = vpow2.f32 %v3828_v17 }
0x2b3a   :  { %v3181_v38 = vpop.f32.mrf.mxu3  ;;  %v3207_v43 = vpop.f32.mrf.mxu2 }
0x2b3d   :  { %v4179_v23 = vpop.eup %4178 }
0x2b3e   :  { %3267 = vrot.lane.b32.xlu2 %v4179_v23, %s4231_s17 }
0x2b3f   :  { %v4181_v39 = vpop.eup %4180 }
0x2b40   :  { %v3228_v1 = vadd.f32 1.0, %v4181_v39 }
0x2b42   :  { %v6140_v26 = vpop.f32.mrf.mxu3  ;;  %v6142_v3 = vpop.f32.mrf.mxu2  ;;  %4182 = vrcp.f32 %v3228_v1  ;;  %v3241_v19 = vand.u32 2147483648, %v3228_v1  ;;  %vm3235_vm6 = vweird.f32 %v3228_v1  ;;  %v3239_v41 = vand.u32 2147483647, %v3228_v1 }
0x2b44   :  { %v3242_v52 = vor.u32 1.1754944e-38, %v3241_v19  ;;  %vm3240_vm11 = vcmp.eq.f32.partialorder %v3239_v41, 8.507059e+37  ;;  %v3412_v19 = vld [vmem:[%s6209_s8 + $0x8] sm:$0xff] }
0x2b48   :  { %v4183_v29 = vpop.eup %4182 }
0x2b49   :  { %v3231_v55 = vmul.f32 %v4183_v29, %v3228_v1  ;;  %vm3236_vm10 = vweird.f32 %v4183_v29  ;;  %v3418_v1 = vld [vmem:[%s6209_s8 + $0x38] sm:$0xff] }
0x2b4a   :  { %v3322_v28 = vpop.f32.mrf.mxu3  ;;  %v3348_v24 = vpop.f32.mrf.mxu2  ;;  %vm3237_vm8 = vmor %vm3235_vm6, %vm3236_vm10  ;;  %3434 = vmatpush.msrb.mxu3 %v3418_v1 }
0x2b4b   :  { %v3232_v57 = vsub.f32 1.0, %v3231_v55  ;;  %v3416_v55 = vld [vmem:[%s6209_s8 + $0x28] sm:$0xff] }
0x2b4d   :  { %v3233_v37 = vmul.f32 %v4183_v29, %v3232_v57  ;;  %v3415_v57 = vld [vmem:[%s6209_s8 + $0x20] sm:$0xff] }
0x2b4f   :  { %v3234_v25 = vadd.f32 %v4183_v29, %v3233_v37  ;;  %v3414_v37 = vld [vmem:[%s6209_s8 + $0x18] sm:$0xff] }
0x2b51   :  { %v3238_v13 = vsel %vm3237_vm8, %v4183_v29, %v3234_v25  ;;  %v3417_v29 = vld [vmem:[%s6209_s8 + $0x30] sm:$0xff]  ;;  %vm3446_vm8 = vcmask 48128  }
0x2b52   :  { %v3243_v14 = vsel %vm3240_vm11, %v3242_v52, %v3238_v13  ;;  %3435 = vmatpush.msrb.mxu3 %v3417_v29  ;;  %v3413_v25 = vld [vmem:[%s6209_s8 + $0x10] sm:$0xff] }
0x2b53   :  { %v3265_v20 = vmul.f32 %v3263_v32, %v3243_v14 }
0x2b54   :  { %3436 = vmatpush.msrb.mxu3 %v3416_v55 }
0x2b56   :  { %3437 = vmatpush.msrb.mxu3 %v3415_v57 }
0x2b58   :  { %3438 = vmatpush.msrb.mxu3 %v3414_v37 }
0x2b5a   :  { %3439 = vmatpush.msrb.mxu3 %v3413_v25 }
0x2b5c   :  { %3440 = vmatpush.msrb.mxu3 %v3412_v19 }
0x2b98   :  { %v3268_v45 = vpop.permute.xlu2 %3267 }
0x2b99   :  { %v3270_v0 = vmul.f32 %v3268_v45, %v3243_v14 }
0x2b9b   :  { %3272 = vrot.lane.b32.xlu1 %v3270_v0, %s4231_s17 }
0x2c0d   :  { %v3273_v5 = vpop.permute.xlu1 %3272 }
0x2c0e   :  { %v3275_v53 = vadd.f32 %v3273_v5, %v3265_v20  ;;  %v3411_v5 = vld [vmem:[%s6209_s8] sm:$0xff] }
0x2c0f   :  { %3441 = vmatpush.msrb.mxu3 %v3411_v5 }
0x2c10   :  { %4184 = vtanh.f32 %v3275_v53  ;;  %3284 = vrot.lane.b32.xlu1 %v3275_v53, %s4231_s17 }
0x2c11   :  { %4186 = vpow2.f32 %v3829_v9 }
0x2c16   :  { %v4185_v59 = vpop.eup %4184 }
0x2c17   :  { %3278 = vrot.lane.b32.xlu2 %v4185_v59, %s4231_s17  ;;  %v4187_v56 = vpop.eup %4186 }
0x2c18   :  { %v3229_v22 = vadd.f32 1.0, %v4187_v56 }
0x2c1a   :  { %4188 = vrcp.f32 %v3229_v22  ;;  %v3256_v58 = vand.u32 2147483648, %v3229_v22  ;;  %vm3250_vm7 = vweird.f32 %v3229_v22  ;;  %v3254_v49 = vand.u32 2147483647, %v3229_v22 }
0x2c1c   :  { %v3257_v44 = vor.u32 1.1754944e-38, %v3256_v58  ;;  %vm3255_vm14 = vcmp.eq.f32.partialorder %v3254_v49, 8.507059e+37 }
0x2c20   :  { %v4189_v63 = vpop.eup %4188 }
0x2c21   :  { %v3246_v62 = vmul.f32 %v4189_v63, %v3229_v22  ;;  %vm3251_vm12 = vweird.f32 %v4189_v63 }
0x2c22   :  { %vm3252_vm13 = vmor %vm3250_vm7, %vm3251_vm12 }
0x2c23   :  { %v3247_v35 = vsub.f32 1.0, %v3246_v62 }
0x2c25   :  { %v3248_v21 = vmul.f32 %v4189_v63, %v3247_v35 }
0x2c27   :  { %v3249_v48 = vadd.f32 %v4189_v63, %v3248_v21 }
0x2c29   :  { %v3253_v42 = vsel %vm3252_vm13, %v4189_v63, %v3249_v48 }
0x2c2a   :  { %v3258_v50 = vsel %vm3255_vm14, %v3257_v44, %v3253_v42  ;;  %v3913_v44 = vld [vmem:[%s6210_s9] ss:$0 sm:$0xff] }
0x2c71   :  { %v3279_v60 = vpop.permute.xlu2 %3278 }
0x2c72   :  { %v3281_v61 = vmul.f32 %v3279_v60, %v3258_v50 }
0x2c74   :  { %v6152_v36 = vsel %vm4826_vm15, %v3281_v61, %v6123_v27 }
0x2c75   :  { %v3292_v10 = vsel %vm71_vm0, %v6152_v36, %v3290_v7 }
0x2c76   :  { %v3293_v16 = vpack.c.bf16 %v3292_v10, %v3292_v10 }
0x2c78   :  { %3306 = vmatmul.bf16.vlgmr.msrb.gmra.mxu1 %v3293_v16  ;;  %3332 = vmatmul.bf16.vlgmr.msra.gmra.mxu0 %v3293_v16 }
0x2c82   :  { %v3285_v8 = vpop.permute.xlu1 %3284 }
0x2c83   :  { %v3287_v12 = vsel %vm4826_vm15, %v3285_v8, %v6130_v30 }
0x2c84   :  { %3390 = vrot.lane.b32.xlu0 %v3287_v12, %s4231_s17 }
0x2cf5   :  { %v3307_v6 = vpop.f32.mrf.mxu1  ;;  %v3333_v33 = vpop.f32.mrf.mxu0 }
0x2cf6   :  { %v3334_v11 = vadd.f32 %v3333_v33, %v5825_v4  ;;  %v3308_v31 = vadd.f32 %v3307_v6, %v5837_v47  ;;  %v3391_v41 = vpop.permute.xlu0 %3390 }
0x2cf8   :  { %v3347_v27 = vadd.f32 %v6142_v3, %v3334_v11  ;;  %v3321_v40 = vadd.f32 %v6140_v26, %v3308_v31 }
0x2cfa   :  { %4190 = vtanh.f32 %v3347_v27  ;;  %v3832_v34 = vmul.f32 -1.442695, %v3321_v40  ;;  %v3833_v0 = vmul.f32 -1.442695, %v3347_v27 }
0x2cfc   :  { %4192 = vpow2.f32 %v3832_v34 }
0x2cfd   :  { %v3309_v51 = vpop.f32.mrf.mxu1  ;;  %v3335_v46 = vpop.f32.mrf.mxu0 }
0x2d00   :  { %v4191_v15 = vpop.eup %4190 }
0x2d01   :  { %3395 = vrot.lane.b32.xlu2 %v4191_v15, %s4231_s17 }
0x2d02   :  { %v4193_v30 = vpop.eup %4192 }
0x2d03   :  { %v3356_v38 = vadd.f32 1.0, %v4193_v30 }
0x2d05   :  { %4194 = vrcp.f32 %v3356_v38  ;;  %v3369_v24 = vand.u32 2147483648, %v3356_v38  ;;  %vm3363_vm1 = vweird.f32 %v3356_v38  ;;  %v3367_v54 = vand.u32 2147483647, %v3356_v38 }
0x2d07   :  { %v3370_v17 = vor.u32 1.1754944e-38, %v3369_v24  ;;  %vm3368_vm2 = vcmp.eq.f32.partialorder %v3367_v54, 8.507059e+37 }
0x2d0b   :  { %v4195_v43 = vpop.eup %4194 }
0x2d0c   :  { %v3359_v23 = vmul.f32 %v4195_v43, %v3356_v38  ;;  %vm3364_vm15 = vweird.f32 %v4195_v43 }
0x2d0d   :  { %vm3365_vm4 = vmor %vm3363_vm1, %vm3364_vm15 }
0x2d0e   :  { %v3360_v4 = vsub.f32 1.0, %v3359_v23 }
0x2d10   :  { %v3361_v28 = vmul.f32 %v4195_v43, %v3360_v4 }
0x2d12   :  { %v3362_v3 = vadd.f32 %v4195_v43, %v3361_v28 }
0x2d14   :  { %v3366_v18 = vsel %vm3365_vm4, %v4195_v43, %v3362_v3 }
0x2d15   :  { %v3371_v47 = vsel %vm3368_vm2, %v3370_v17, %v3366_v18 }
0x2d16   :  { %v3393_v13 = vmul.f32 %v3391_v41, %v3371_v47 }
0x2d5b   :  { %v3396_v26 = vpop.permute.xlu2 %3395 }
0x2d5c   :  { %v3398_v39 = vmul.f32 %v3396_v26, %v3371_v47 }
0x2d5e   :  { %3400 = vrot.lane.b32.xlu1 %v3398_v39, %s4231_s17 }
0x2dd0   :  { %v3401_v52 = vpop.permute.xlu1 %3400 }
0x2dd1   :  { %v3403_v45 = vadd.f32 %v3401_v52, %v3393_v13 }
0x2dd3   :  { %4196 = vtanh.f32 %v3403_v45 }
0x2dd4   :  { %4198 = vpow2.f32 %v3833_v0 }
0x2dd9   :  { %v4197_v14 = vpop.eup %4196 }
0x2dda   :  { %3406 = vrot.lane.b32.xlu2 %v4197_v14, %s4231_s17  ;;  %v4199_v32 = vpop.eup %4198 }
0x2ddb   :  { %v3357_v20 = vadd.f32 1.0, %v4199_v32 }
0x2ddd   :  { %4200 = vrcp.f32 %v3357_v20  ;;  %v3384_v63 = vand.u32 2147483648, %v3357_v20  ;;  %vm3378_vm5 = vweird.f32 %v3357_v20  ;;  %v3382_v62 = vand.u32 2147483647, %v3357_v20 }
0x2ddf   :  { %v3385_v21 = vor.u32 1.1754944e-38, %v3384_v63  ;;  %vm3383_vm6 = vcmp.eq.f32.partialorder %v3382_v62, 8.507059e+37 }
0x2de3   :  { %v4201_v53 = vpop.eup %4200 }
0x2de4   :  { %v3374_v59 = vmul.f32 %v4201_v53, %v3357_v20  ;;  %vm3379_vm9 = vweird.f32 %v4201_v53 }
0x2de5   :  { %vm3380_vm10 = vmor %vm3378_vm5, %vm3379_vm9 }
0x2de6   :  { %v3375_v9 = vsub.f32 1.0, %v3374_v59 }
0x2de8   :  { %v3376_v56 = vmul.f32 %v4201_v53, %v3375_v9 }
0x2dea   :  { %v3377_v22 = vadd.f32 %v4201_v53, %v3376_v56 }
0x2dec   :  { %v3381_v35 = vsel %vm3380_vm10, %v4201_v53, %v3377_v22 }
0x2ded   :  { %v3386_v48 = vsel %vm3383_vm6, %v3385_v21, %v3381_v35 }
0x2e34   :  { %v3407_v58 = vpop.permute.xlu2 %3406 }
0x2e35   :  { %v3409_v49 = vmul.f32 %v3407_v58, %v3386_v48 }
0x2e37   :  { %v3410_v42 = vsel %vm4961_vm3, %v3409_v49, %v6152_v36 }
0x2e38   :  { %3834 = vmatmul.msk.f32.vlgmr.msrb.gmra.mxu3 %vm71_vm0, %v3410_v42 }
0x2ebb   :  { %v3443_v50 = vpop.f32.mrf.mxu3 }
0x2ebc   :  { %v3444_v60 = vadd.f32 %v3913_v44, %v3443_v50 }
0x2ebe   :  { %3447 = vst.msk [vmem:[#allocation4] sm:$0xff] %vm3446_vm8, %v3444_v60 }
0x2ebf   :  { %3458 = dma.vmem_to_hbm [thread:$0]  %s3454_s20, 128, %s3456_s23, [#allocation5]  }
0x2ec0   :  { %4229 = dma.done.wait [#allocation5], 128  }
0x2ec1   :  { %4230 = vsyncadd [#allocation5], 4294967168 }
0x2ec2   :  { %3463 = vsyncpa [#allocation5], 1 }

</bundles_post_ra>
